<compile_context>
chip_gen: v7x
topology: tpu7x:2x2x1
jax: 0.10.0
libtpu: 0.0.40
codegen_flags: <defaults>
</compile_context>

<pallas_src>
import jax
import jax.numpy as jnp
from jax.experimental import pallas as pl
from jax.experimental.pallas import tpu as pltpu


def _round_up(v, m):
    return ((v + m - 1) // m) * m


def _padded_bytes(shape, itemsize):
    """VMEM footprint of a block: last two dims padded to the (8, 128) tile."""
    lead = 1
    for d in shape[:-2]:
        lead *= d
    return lead * _round_up(shape[-2], 8) * _round_up(shape[-1], 128) * itemsize


def _auto_batch_block(N, H, W, Cout):
    """Batch several small images per grid step (amortize ~0.35us/step overhead)."""
    bn = 1
    while bn < N and N % (bn * 2) == 0 and bn * H * W * Cout <= 32 * 1024:
        bn *= 2
    return bn


def _auto_tile_h(H, W, Cin, itemsize, budget=8 * 2**20):
    """Largest row-tile TH dividing H with (TH*W) % 128 == 0 (lane-dense output
    slab) whose per-step VMEM working set stays under `budget`."""
    lane_cin = _round_up(max(Cin, 1), 128)
    lane_k = _round_up(9 * Cin, 128)
    sub_wp = _round_up(W + 2, 8)

    def step_bytes(th):
        window = (th + 2) * sub_wp * lane_cin * itemsize      # stitched input window
        patches = _round_up(th * W, 8) * lane_k * itemsize    # im2col patch matrix
        return window + patches

    cands = [th for th in range(1, H + 1)
             if H % th == 0 and (th == H or (th * W) % 128 == 0)]
    fitting = [th for th in cands if step_bytes(th) <= budget]
    return max(fitting) if fitting else min(cands)


def _conv3x3_kernel(x_main_ref, x_lo_ref, x_hi_ref, w_ref, b_ref, o_ref,
                    xwin_ref, patch_ref):
    # x_main_ref: (BN, TH, Wp, Cin)   padded rows [i*TH, i*TH+TH) of BN images
    # x_lo_ref:   (BN, 1,  Wp, Cin)   halo row  i*TH+TH
    # x_hi_ref:   (BN, 1,  Wp, Cin)   halo row  i*TH+TH+1
    # w_ref:      (Cout, 9*Cin)       weights, column order (kh, kw, ci)
    # b_ref:      (Cout, 1)           bias (f32)
    # o_ref:      (BN, Cout, TH*W)    NCHW-flat output slab (lane-dense minor dim)
    # xwin_ref:   (TH+2, Wp, Cin)     VMEM scratch: stitched padded window
    # patch_ref:  (TH*W, 9*Cin)       VMEM scratch: im2col patch matrix
    BN, TH, Wp, Cin = x_main_ref.shape
    W = Wp - 2

    for bn in range(BN):
        # Stitch the (TH+2)-row padded window for image `bn` (main rows plus the
        # two halo rows delivered by their own 1-row BlockSpecs).
        xwin_ref[0:TH] = x_main_ref[bn]
        xwin_ref[TH:TH + 1] = x_lo_ref[bn]
        xwin_ref[TH + 1:TH + 2] = x_hi_ref[bn]

        # im2col ONCE into VMEM scratch: (TH*W, 9*Cin).  This replaces the nine
        # strided-slice + tiny-K matmuls of the previous version.
        for kh in range(3):
            for kw in range(3):
                c0 = (kh * 3 + kw) * Cin
                patch_ref[:, c0:c0 + Cin] = (
                    xwin_ref[kh:kh + TH, kw:kw + W, :].reshape(TH * W, Cin))

        # Single fat-K matmul on the MXU:
        #   (Cout, 9*Cin) x (TH*W, 9*Cin)^T -> (Cout, TH*W)
        # The result's minor dim is TH*W (multiple of 128), so both the bias add
        # and the store are full-width lane-dense ops.
        acc = jax.lax.dot_general(
            w_ref[...], patch_ref[...].astype(w_ref.dtype),
            dimension_numbers=(((1,), (1,)), ((), ())),
            preferred_element_type=jnp.float32)
        acc = acc + b_ref[...]                 # bias broadcast along lanes, added once
        o_ref[bn] = acc.astype(o_ref.dtype)


def conv3x3(x_nchw, weight_oihw, bias, use_refl=True, *,
            tile_h=None, batch_block=None, mxu_dtype=None):
    """Equivalent of Conv3x3.forward: pad by 1 (reflect or zero) then 3x3 conv.

    mxu_dtype: optionally run the MXU matmul in bf16 (f32 accumulation) on
    v6e/v7x; default (None) keeps the input dtype for an exact f32 path.
    """
    N, Cin, H, W = x_nchw.shape
    Cout = weight_oihw.shape[0]
    itemsize = jnp.dtype(x_nchw.dtype).itemsize

    BN = batch_block if batch_block is not None else _auto_batch_block(N, H, W, Cout)
    TH = tile_h if tile_h is not None else _auto_tile_h(H, W, Cin, itemsize)
    if N % BN != 0:
        raise ValueError(f"batch_block={BN} must divide N={N}")
    if H % TH != 0 or (TH != H and (TH * W) % 128 != 0):
        raise ValueError(f"tile_h={TH} must divide H={H} and give a 128-multiple "
                         f"output slab (tile_h*W={TH * W})")

    nb, nh = N // BN, H // TH
    Hp, Wp = H + 2, W + 2

    # Wrapper glue (plain XLA): NCHW -> NHWC + reflect/zero pad of the input.
    # The output side needs NO transpose: the kernel writes NCHW directly.
    x = jnp.transpose(x_nchw, (0, 2, 3, 1))
    x_pad = jnp.pad(x, ((0, 0), (1, 1), (1, 1), (0, 0)),
                    mode="reflect" if use_refl else "constant")

    # OIHW -> (Cout, kh, kw, Cin) -> (Cout, 9*Cin): matches the kernel's patch
    # column order (kh, kw, ci).
    w_t = jnp.transpose(weight_oihw, (0, 2, 3, 1)).reshape(Cout, 9 * Cin)
    if mxu_dtype is not None:
        w_t = w_t.astype(mxu_dtype)
    b_col = bias.astype(jnp.float32).reshape(Cout, 1)

    # Explicit VMEM budget: double-buffered blocks + scratch (with (8,128) padding).
    w_itemsize = jnp.dtype(w_t.dtype).itemsize
    block_bytes = (
        _padded_bytes((BN, TH, Wp, Cin), itemsize)
        + 2 * _padded_bytes((BN, 1, Wp, Cin), itemsize)
        + _padded_bytes((Cout, 9 * Cin), w_itemsize)
        + _padded_bytes((Cout, 1), 4)
        + _padded_bytes((BN, Cout, TH * W), itemsize))
    scratch_bytes = (_padded_bytes((TH + 2, Wp, Cin), itemsize)
                     + _padded_bytes((TH * W, 9 * Cin), itemsize))
    vmem_limit = int(min(64 * 2**20,
                         max(32 * 2**20, 2 * (2 * block_bytes + scratch_bytes))))

    out_flat = pl.pallas_call(
        _conv3x3_kernel,
        out_shape=jax.ShapeDtypeStruct((N, Cout, H * W), x_nchw.dtype),
        grid_spec=pltpu.PrefetchScalarGridSpec(
            num_scalar_prefetch=0,
            grid=(nb, nh),
            in_specs=[
                # TH "main" padded rows of BN images.
                pl.BlockSpec((BN, TH, Wp, Cin), lambda b, i: (b, i, 0, 0)),
                # 2-row halo as two 1-row blocks over the SAME padded array:
                # keeps automatic double-buffered pipelining, no manual DMA.
                pl.BlockSpec((BN, 1, Wp, Cin), lambda b, i: (b, (i + 1) * TH, 0, 0)),
                pl.BlockSpec((BN, 1, Wp, Cin), lambda b, i: (b, (i + 1) * TH + 1, 0, 0)),
                pl.BlockSpec((Cout, 9 * Cin), lambda b, i: (0, 0)),
                pl.BlockSpec((Cout, 1), lambda b, i: (0, 0)),
            ],
            out_specs=pl.BlockSpec((BN, Cout, TH * W), lambda b, i: (b, 0, i)),
            scratch_shapes=[
                pltpu.VMEM((TH + 2, Wp, Cin), x_nchw.dtype),   # stitched window
                pltpu.VMEM((TH * W, 9 * Cin), x_nchw.dtype),   # im2col patches
            ],
        ),
        compiler_params=pltpu.CompilerParams(
            # All output blocks are disjoint -> both axes parallel (v7x dual-TC).
            dimension_semantics=("parallel", "parallel"),
            vmem_limit_bytes=vmem_limit,
        ),
    )(x_pad, x_pad, x_pad, w_t, b_col)

    # Free reshape: (N, Cout, H*W) is already NCHW order, just unflatten spatial.
    return out_flat.reshape(N, Cout, H, W)


if __name__ == "__main__":
    key = jax.random.PRNGKey(0)
    kx, kw, kb = jax.random.split(key, 3)

    N, Cin, H, W = 2, 4, 16, 16
    Cout = 8

    x = jax.random.normal(kx, (N, Cin, H, W), dtype=jnp.float32)
    # Deterministic synthetic parameters matching nn.Conv2d(Cin, Cout, 3) shapes.
    weight = jax.random.normal(kw, (Cout, Cin, 3, 3), dtype=jnp.float32) * 0.1
    bias = jax.random.normal(kb, (Cout,), dtype=jnp.float32) * 0.1

    # tile_h=8, batch_block=2 exercises both the row-tiling (halo) path and the
    # multi-image-per-step path on the small demo shapes.
    out = conv3x3(x, weight, bias, use_refl=True, tile_h=8, batch_block=2)
    out = jax.block_until_ready(out)

    # Reference check against XLA conv on the reflection-padded input.
    x_pad = jnp.pad(x, ((0, 0), (0, 0), (1, 1), (1, 1)), mode="reflect")
    ref = jax.lax.conv_general_dilated(
        x_pad, weight, window_strides=(1, 1), padding="VALID",
        dimension_numbers=("NCHW", "OIHW", "NCHW"),
        precision=jax.lax.Precision.HIGHEST,
    ) + bias.reshape(1, Cout, 1, 1)
    assert out.shape == (N, Cout, H, W)
    assert jnp.allclose(out, ref, atol=1e-4, rtol=1e-4)

    print("KERNEL_OK")
</pallas_src>

<mosaic_0001>
module attributes {stable_mosaic.version = 11 : i64} {
  func.func @_conv3x3_kernel(%arg0: i32, %arg1: i32, %arg2: memref<2x8x18x4xf32, #tpu.memory_space<vmem>>, %arg3: memref<2x1x18x4xf32, #tpu.memory_space<vmem>>, %arg4: memref<2x1x18x4xf32, #tpu.memory_space<vmem>>, %arg5: memref<8x36xf32, #tpu.memory_space<vmem>>, %arg6: memref<8x1xf32, #tpu.memory_space<vmem>>, %arg7: memref<2x8x128xf32, #tpu.memory_space<vmem>>, %arg8: memref<10x18x4xf32, #tpu.memory_space<vmem>>, %arg9: memref<128x36xf32, #tpu.memory_space<vmem>>) attributes {dimension_semantics = [#tpu.dimension_semantics<parallel>, #tpu.dimension_semantics<parallel>], iteration_bounds = array<i64: 1, 2>, scalar_prefetch = 0 : i64, scratch_operands = 2 : i64, tpu.core_type = #tpu.core_type<tc>, window_params = [{transform_indices = @transform_0, window_bounds = array<i64: 2, 8, 18, 4>}, {transform_indices = @transform_1, window_bounds = array<i64: 2, 1, 18, 4>}, {transform_indices = @transform_2, window_bounds = array<i64: 2, 1, 18, 4>}, {pipeline_mode = #tpu.pipeline_mode<synchronous>, transform_indices = @transform_3, window_bounds = array<i64: 8, 36>}, {pipeline_mode = #tpu.pipeline_mode<synchronous>, transform_indices = @transform_4, window_bounds = array<i64: 8, 1>}, {transform_indices = @transform_5, window_bounds = array<i64: 2, 8, 128>}]} {
    %c0 = arith.constant 0 : index
    %c0_0 = arith.constant 0 : index
    %c0_1 = arith.constant 0 : index
    %c0_2 = arith.constant 0 : index
    %0 = vector.load %arg2[%c0, %c0_0, %c0_1, %c0_2] : memref<2x8x18x4xf32, #tpu.memory_space<vmem>>, vector<1x8x18x4xf32>
    %1 = vector.shape_cast %0 : vector<1x8x18x4xf32> to vector<8x18x4xf32>
    %c0_3 = arith.constant 0 : index
    %c0_4 = arith.constant 0 : index
    %c0_5 = arith.constant 0 : index
    %2 = vector.load %arg8[%c0_3, %c0_4, %c0_5] : memref<10x18x4xf32, #tpu.memory_space<vmem>>, vector<8x18x4xf32>
    tpu.vector_store %arg8[%c0_3, %c0_4, %c0_5], %1 {strides = array<i32>} : memref<10x18x4xf32, #tpu.memory_space<vmem>>, vector<8x18x4xf32>,
    %c0_6 = arith.constant 0 : index
    %c0_7 = arith.constant 0 : index
    %c0_8 = arith.constant 0 : index
    %c0_9 = arith.constant 0 : index
    %3 = vector.load %arg3[%c0_6, %c0_7, %c0_8, %c0_9] : memref<2x1x18x4xf32, #tpu.memory_space<vmem>>, vector<1x1x18x4xf32>
    %4 = vector.shape_cast %3 : vector<1x1x18x4xf32> to vector<1x18x4xf32>
    %c8 = arith.constant 8 : index
    %c0_10 = arith.constant 0 : index
    %c0_11 = arith.constant 0 : index
    %5 = vector.load %arg8[%c8, %c0_10, %c0_11] : memref<10x18x4xf32, #tpu.memory_space<vmem>>, vector<1x18x4xf32>
    tpu.vector_store %arg8[%c8, %c0_10, %c0_11], %4 {strides = array<i32>} : memref<10x18x4xf32, #tpu.memory_space<vmem>>, vector<1x18x4xf32>,
    %c0_12 = arith.constant 0 : index
    %c0_13 = arith.constant 0 : index
    %c0_14 = arith.constant 0 : index
    %c0_15 = arith.constant 0 : index
    %6 = vector.load %arg4[%c0_12, %c0_13, %c0_14, %c0_15] : memref<2x1x18x4xf32, #tpu.memory_space<vmem>>, vector<1x1x18x4xf32>
    %7 = vector.shape_cast %6 : vector<1x1x18x4xf32> to vector<1x18x4xf32>
    %c9 = arith.constant 9 : index
    %c0_16 = arith.constant 0 : index
    %c0_17 = arith.constant 0 : index
    %8 = vector.load %arg8[%c9, %c0_16, %c0_17] : memref<10x18x4xf32, #tpu.memory_space<vmem>>, vector<1x18x4xf32>
    tpu.vector_store %arg8[%c9, %c0_16, %c0_17], %7 {strides = array<i32>} : memref<10x18x4xf32, #tpu.memory_space<vmem>>, vector<1x18x4xf32>,
    %c0_18 = arith.constant 0 : index
    %c0_19 = arith.constant 0 : index
    %c0_20 = arith.constant 0 : index
    %9 = vector.load %arg8[%c0_18, %c0_19, %c0_20] : memref<10x18x4xf32, #tpu.memory_space<vmem>>, vector<8x16x4xf32>
    %10 = vector.shape_cast %9 : vector<8x16x4xf32> to vector<128x4xf32>
    %c0_21 = arith.constant 0 : index
    %c0_22 = arith.constant 0 : index
    %11 = vector.load %arg9[%c0_21, %c0_22] : memref<128x36xf32, #tpu.memory_space<vmem>>, vector<128x4xf32>
    tpu.vector_store %arg9[%c0_21, %c0_22], %10 {strides = array<i32>} : memref<128x36xf32, #tpu.memory_space<vmem>>, vector<128x4xf32>,
    %c0_23 = arith.constant 0 : index
    %c1 = arith.constant 1 : index
    %c0_24 = arith.constant 0 : index
    %12 = vector.load %arg8[%c0_23, %c1, %c0_24] : memref<10x18x4xf32, #tpu.memory_space<vmem>>, vector<8x16x4xf32>
    %13 = vector.shape_cast %12 : vector<8x16x4xf32> to vector<128x4xf32>
    %c0_25 = arith.constant 0 : index
    %c4 = arith.constant 4 : index
    %14 = vector.load %arg9[%c0_25, %c4] : memref<128x36xf32, #tpu.memory_space<vmem>>, vector<128x4xf32>
    tpu.vector_store %arg9[%c0_25, %c4], %13 {strides = array<i32>} : memref<128x36xf32, #tpu.memory_space<vmem>>, vector<128x4xf32>,
    %c0_26 = arith.constant 0 : index
    %c2 = arith.constant 2 : index
    %c0_27 = arith.constant 0 : index
    %15 = vector.load %arg8[%c0_26, %c2, %c0_27] : memref<10x18x4xf32, #tpu.memory_space<vmem>>, vector<8x16x4xf32>
    %16 = vector.shape_cast %15 : vector<8x16x4xf32> to vector<128x4xf32>
    %c0_28 = arith.constant 0 : index
    %c8_29 = arith.constant 8 : index
    %17 = vector.load %arg9[%c0_28, %c8_29] : memref<128x36xf32, #tpu.memory_space<vmem>>, vector<128x4xf32>
    tpu.vector_store %arg9[%c0_28, %c8_29], %16 {strides = array<i32>} : memref<128x36xf32, #tpu.memory_space<vmem>>, vector<128x4xf32>,
    %c1_30 = arith.constant 1 : index
    %c0_31 = arith.constant 0 : index
    %c0_32 = arith.constant 0 : index
    %18 = vector.load %arg8[%c1_30, %c0_31, %c0_32] : memref<10x18x4xf32, #tpu.memory_space<vmem>>, vector<8x16x4xf32>
    %19 = vector.shape_cast %18 : vector<8x16x4xf32> to vector<128x4xf32>
    %c0_33 = arith.constant 0 : index
    %c12 = arith.constant 12 : index
    %20 = vector.load %arg9[%c0_33, %c12] : memref<128x36xf32, #tpu.memory_space<vmem>>, vector<128x4xf32>
    tpu.vector_store %arg9[%c0_33, %c12], %19 {strides = array<i32>} : memref<128x36xf32, #tpu.memory_space<vmem>>, vector<128x4xf32>,
    %c1_34 = arith.constant 1 : index
    %c1_35 = arith.constant 1 : index
    %c0_36 = arith.constant 0 : index
    %21 = vector.load %arg8[%c1_34, %c1_35, %c0_36] : memref<10x18x4xf32, #tpu.memory_space<vmem>>, vector<8x16x4xf32>
    %22 = vector.shape_cast %21 : vector<8x16x4xf32> to vector<128x4xf32>
    %c0_37 = arith.constant 0 : index
    %c16 = arith.constant 16 : index
    %23 = vector.load %arg9[%c0_37, %c16] : memref<128x36xf32, #tpu.memory_space<vmem>>, vector<128x4xf32>
    tpu.vector_store %arg9[%c0_37, %c16], %22 {strides = array<i32>} : memref<128x36xf32, #tpu.memory_space<vmem>>, vector<128x4xf32>,
    %c1_38 = arith.constant 1 : index
    %c2_39 = arith.constant 2 : index
    %c0_40 = arith.constant 0 : index
    %24 = vector.load %arg8[%c1_38, %c2_39, %c0_40] : memref<10x18x4xf32, #tpu.memory_space<vmem>>, vector<8x16x4xf32>
    %25 = vector.shape_cast %24 : vector<8x16x4xf32> to vector<128x4xf32>
    %c0_41 = arith.constant 0 : index
    %c20 = arith.constant 20 : index
    %26 = vector.load %arg9[%c0_41, %c20] : memref<128x36xf32, #tpu.memory_space<vmem>>, vector<128x4xf32>
    tpu.vector_store %arg9[%c0_41, %c20], %25 {strides = array<i32>} : memref<128x36xf32, #tpu.memory_space<vmem>>, vector<128x4xf32>,
    %c2_42 = arith.constant 2 : index
    %c0_43 = arith.constant 0 : index
    %c0_44 = arith.constant 0 : index
    %27 = vector.load %arg8[%c2_42, %c0_43, %c0_44] : memref<10x18x4xf32, #tpu.memory_space<vmem>>, vector<8x16x4xf32>
    %28 = vector.shape_cast %27 : vector<8x16x4xf32> to vector<128x4xf32>
    %c0_45 = arith.constant 0 : index
    %c24 = arith.constant 24 : index
    %29 = vector.load %arg9[%c0_45, %c24] : memref<128x36xf32, #tpu.memory_space<vmem>>, vector<128x4xf32>
    tpu.vector_store %arg9[%c0_45, %c24], %28 {strides = array<i32>} : memref<128x36xf32, #tpu.memory_space<vmem>>, vector<128x4xf32>,
    %c2_46 = arith.constant 2 : index
    %c1_47 = arith.constant 1 : index
    %c0_48 = arith.constant 0 : index
    %30 = vector.load %arg8[%c2_46, %c1_47, %c0_48] : memref<10x18x4xf32, #tpu.memory_space<vmem>>, vector<8x16x4xf32>
    %31 = vector.shape_cast %30 : vector<8x16x4xf32> to vector<128x4xf32>
    %c0_49 = arith.constant 0 : index
    %c28 = arith.constant 28 : index
    %32 = vector.load %arg9[%c0_49, %c28] : memref<128x36xf32, #tpu.memory_space<vmem>>, vector<128x4xf32>
    tpu.vector_store %arg9[%c0_49, %c28], %31 {strides = array<i32>} : memref<128x36xf32, #tpu.memory_space<vmem>>, vector<128x4xf32>,
    %c2_50 = arith.constant 2 : index
    %c2_51 = arith.constant 2 : index
    %c0_52 = arith.constant 0 : index
    %33 = vector.load %arg8[%c2_50, %c2_51, %c0_52] : memref<10x18x4xf32, #tpu.memory_space<vmem>>, vector<8x16x4xf32>
    %34 = vector.shape_cast %33 : vector<8x16x4xf32> to vector<128x4xf32>
    %c0_53 = arith.constant 0 : index
    %c32 = arith.constant 32 : index
    %35 = vector.load %arg9[%c0_53, %c32] : memref<128x36xf32, #tpu.memory_space<vmem>>, vector<128x4xf32>
    tpu.vector_store %arg9[%c0_53, %c32], %34 {strides = array<i32>} : memref<128x36xf32, #tpu.memory_space<vmem>>, vector<128x4xf32>,
    %c0_54 = arith.constant 0 : index
    %c0_55 = arith.constant 0 : index
    %36 = vector.load %arg5[%c0_54, %c0_55] : memref<8x36xf32, #tpu.memory_space<vmem>>, vector<8x36xf32>
    %c0_56 = arith.constant 0 : index
    %c0_57 = arith.constant 0 : index
    %37 = vector.load %arg9[%c0_56, %c0_57] : memref<128x36xf32, #tpu.memory_space<vmem>>, vector<128x36xf32>
    %cst = arith.constant dense<0.000000e+00> : vector<8x128xf32>
    %38 = tpu.matmul %36, %37, %cst {dimension_numbers = #tpu.dot_dimension_numbers<[1], [1], [0], [0], [0, 0, 1, 0], [], []>} : vector<8x36xf32>, vector<128x36xf32>, vector<8x128xf32> -> vector<8x128xf32>
    %c0_58 = arith.constant 0 : index
    %c0_59 = arith.constant 0 : index
    %39 = vector.load %arg6[%c0_58, %c0_59] : memref<8x1xf32, #tpu.memory_space<vmem>>, vector<8x1xf32>
    %40 = vector.broadcast %39 : vector<8x1xf32> to vector<8x128xf32>
    %41 = arith.addf %38, %40 : vector<8x128xf32>
    %c0_60 = arith.constant 0 : index
    %c0_61 = arith.constant 0 : index
    %c0_62 = arith.constant 0 : index
    %42 = vector.load %arg7[%c0_60, %c0_61, %c0_62] : memref<2x8x128xf32, #tpu.memory_space<vmem>>, vector<1x8x128xf32>
    %43 = vector.shape_cast %42 : vector<1x8x128xf32> to vector<8x128xf32>
    %44 = vector.shape_cast %41 : vector<8x128xf32> to vector<1x8x128xf32>
    tpu.vector_store %arg7[%c0_60, %c0_61, %c0_62], %44 {strides = array<i32>} : memref<2x8x128xf32, #tpu.memory_space<vmem>>, vector<1x8x128xf32>,
    %c1_63 = arith.constant 1 : index
    %c0_64 = arith.constant 0 : index
    %c0_65 = arith.constant 0 : index
    %c0_66 = arith.constant 0 : index
    %45 = vector.load %arg2[%c1_63, %c0_64, %c0_65, %c0_66] : memref<2x8x18x4xf32, #tpu.memory_space<vmem>>, vector<1x8x18x4xf32>
    %46 = vector.shape_cast %45 : vector<1x8x18x4xf32> to vector<8x18x4xf32>
    %c0_67 = arith.constant 0 : index
    %c0_68 = arith.constant 0 : index
    %c0_69 = arith.constant 0 : index
    %47 = vector.load %arg8[%c0_67, %c0_68, %c0_69] : memref<10x18x4xf32, #tpu.memory_space<vmem>>, vector<8x18x4xf32>
    tpu.vector_store %arg8[%c0_67, %c0_68, %c0_69], %46 {strides = array<i32>} : memref<10x18x4xf32, #tpu.memory_space<vmem>>, vector<8x18x4xf32>,
    %c1_70 = arith.constant 1 : index
    %c0_71 = arith.constant 0 : index
    %c0_72 = arith.constant 0 : index
    %c0_73 = arith.constant 0 : index
    %48 = vector.load %arg3[%c1_70, %c0_71, %c0_72, %c0_73] : memref<2x1x18x4xf32, #tpu.memory_space<vmem>>, vector<1x1x18x4xf32>
    %49 = vector.shape_cast %48 : vector<1x1x18x4xf32> to vector<1x18x4xf32>
    %c8_74 = arith.constant 8 : index
    %c0_75 = arith.constant 0 : index
    %c0_76 = arith.constant 0 : index
    %50 = vector.load %arg8[%c8_74, %c0_75, %c0_76] : memref<10x18x4xf32, #tpu.memory_space<vmem>>, vector<1x18x4xf32>
    tpu.vector_store %arg8[%c8_74, %c0_75, %c0_76], %49 {strides = array<i32>} : memref<10x18x4xf32, #tpu.memory_space<vmem>>, vector<1x18x4xf32>,
    %c1_77 = arith.constant 1 : index
    %c0_78 = arith.constant 0 : index
    %c0_79 = arith.constant 0 : index
    %c0_80 = arith.constant 0 : index
    %51 = vector.load %arg4[%c1_77, %c0_78, %c0_79, %c0_80] : memref<2x1x18x4xf32, #tpu.memory_space<vmem>>, vector<1x1x18x4xf32>
    %52 = vector.shape_cast %51 : vector<1x1x18x4xf32> to vector<1x18x4xf32>
    %c9_81 = arith.constant 9 : index
    %c0_82 = arith.constant 0 : index
    %c0_83 = arith.constant 0 : index
    %53 = vector.load %arg8[%c9_81, %c0_82, %c0_83] : memref<10x18x4xf32, #tpu.memory_space<vmem>>, vector<1x18x4xf32>
    tpu.vector_store %arg8[%c9_81, %c0_82, %c0_83], %52 {strides = array<i32>} : memref<10x18x4xf32, #tpu.memory_space<vmem>>, vector<1x18x4xf32>,
    %c0_84 = arith.constant 0 : index
    %c0_85 = arith.constant 0 : index
    %c0_86 = arith.constant 0 : index
    %54 = vector.load %arg8[%c0_84, %c0_85, %c0_86] : memref<10x18x4xf32, #tpu.memory_space<vmem>>, vector<8x16x4xf32>
    %55 = vector.shape_cast %54 : vector<8x16x4xf32> to vector<128x4xf32>
    %c0_87 = arith.constant 0 : index
    %c0_88 = arith.constant 0 : index
    %56 = vector.load %arg9[%c0_87, %c0_88] : memref<128x36xf32, #tpu.memory_space<vmem>>, vector<128x4xf32>
    tpu.vector_store %arg9[%c0_87, %c0_88], %55 {strides = array<i32>} : memref<128x36xf32, #tpu.memory_space<vmem>>, vector<128x4xf32>,
    %c0_89 = arith.constant 0 : index
    %c1_90 = arith.constant 1 : index
    %c0_91 = arith.constant 0 : index
    %57 = vector.load %arg8[%c0_89, %c1_90, %c0_91] : memref<10x18x4xf32, #tpu.memory_space<vmem>>, vector<8x16x4xf32>
    %58 = vector.shape_cast %57 : vector<8x16x4xf32> to vector<128x4xf32>
    %c0_92 = arith.constant 0 : index
    %c4_93 = arith.constant 4 : index
    %59 = vector.load %arg9[%c0_92, %c4_93] : memref<128x36xf32, #tpu.memory_space<vmem>>, vector<128x4xf32>
    tpu.vector_store %arg9[%c0_92, %c4_93], %58 {strides = array<i32>} : memref<128x36xf32, #tpu.memory_space<vmem>>, vector<128x4xf32>,
    %c0_94 = arith.constant 0 : index
    %c2_95 = arith.constant 2 : index
    %c0_96 = arith.constant 0 : index
    %60 = vector.load %arg8[%c0_94, %c2_95, %c0_96] : memref<10x18x4xf32, #tpu.memory_space<vmem>>, vector<8x16x4xf32>
    %61 = vector.shape_cast %60 : vector<8x16x4xf32> to vector<128x4xf32>
    %c0_97 = arith.constant 0 : index
    %c8_98 = arith.constant 8 : index
    %62 = vector.load %arg9[%c0_97, %c8_98] : memref<128x36xf32, #tpu.memory_space<vmem>>, vector<128x4xf32>
    tpu.vector_store %arg9[%c0_97, %c8_98], %61 {strides = array<i32>} : memref<128x36xf32, #tpu.memory_space<vmem>>, vector<128x4xf32>,
    %c1_99 = arith.constant 1 : index
    %c0_100 = arith.constant 0 : index
    %c0_101 = arith.constant 0 : index
    %63 = vector.load %arg8[%c1_99, %c0_100, %c0_101] : memref<10x18x4xf32, #tpu.memory_space<vmem>>, vector<8x16x4xf32>
    %64 = vector.shape_cast %63 : vector<8x16x4xf32> to vector<128x4xf32>
    %c0_102 = arith.constant 0 : index
    %c12_103 = arith.constant 12 : index
    %65 = vector.load %arg9[%c0_102, %c12_103] : memref<128x36xf32, #tpu.memory_space<vmem>>, vector<128x4xf32>
    tpu.vector_store %arg9[%c0_102, %c12_103], %64 {strides = array<i32>} : memref<128x36xf32, #tpu.memory_space<vmem>>, vector<128x4xf32>,
    %c1_104 = arith.constant 1 : index
    %c1_105 = arith.constant 1 : index
    %c0_106 = arith.constant 0 : index
    %66 = vector.load %arg8[%c1_104, %c1_105, %c0_106] : memref<10x18x4xf32, #tpu.memory_space<vmem>>, vector<8x16x4xf32>
    %67 = vector.shape_cast %66 : vector<8x16x4xf32> to vector<128x4xf32>
    %c0_107 = arith.constant 0 : index
    %c16_108 = arith.constant 16 : index
    %68 = vector.load %arg9[%c0_107, %c16_108] : memref<128x36xf32, #tpu.memory_space<vmem>>, vector<128x4xf32>
    tpu.vector_store %arg9[%c0_107, %c16_108], %67 {strides = array<i32>} : memref<128x36xf32, #tpu.memory_space<vmem>>, vector<128x4xf32>,
    %c1_109 = arith.constant 1 : index
    %c2_110 = arith.constant 2 : index
    %c0_111 = arith.constant 0 : index
    %69 = vector.load %arg8[%c1_109, %c2_110, %c0_111] : memref<10x18x4xf32, #tpu.memory_space<vmem>>, vector<8x16x4xf32>
    %70 = vector.shape_cast %69 : vector<8x16x4xf32> to vector<128x4xf32>
    %c0_112 = arith.constant 0 : index
    %c20_113 = arith.constant 20 : index
    %71 = vector.load %arg9[%c0_112, %c20_113] : memref<128x36xf32, #tpu.memory_space<vmem>>, vector<128x4xf32>
    tpu.vector_store %arg9[%c0_112, %c20_113], %70 {strides = array<i32>} : memref<128x36xf32, #tpu.memory_space<vmem>>, vector<128x4xf32>,
    %c2_114 = arith.constant 2 : index
    %c0_115 = arith.constant 0 : index
    %c0_116 = arith.constant 0 : index
    %72 = vector.load %arg8[%c2_114, %c0_115, %c0_116] : memref<10x18x4xf32, #tpu.memory_space<vmem>>, vector<8x16x4xf32>
    %73 = vector.shape_cast %72 : vector<8x16x4xf32> to vector<128x4xf32>
    %c0_117 = arith.constant 0 : index
    %c24_118 = arith.constant 24 : index
    %74 = vector.load %arg9[%c0_117, %c24_118] : memref<128x36xf32, #tpu.memory_space<vmem>>, vector<128x4xf32>
    tpu.vector_store %arg9[%c0_117, %c24_118], %73 {strides = array<i32>} : memref<128x36xf32, #tpu.memory_space<vmem>>, vector<128x4xf32>,
    %c2_119 = arith.constant 2 : index
    %c1_120 = arith.constant 1 : index
    %c0_121 = arith.constant 0 : index
    %75 = vector.load %arg8[%c2_119, %c1_120, %c0_121] : memref<10x18x4xf32, #tpu.memory_space<vmem>>, vector<8x16x4xf32>
    %76 = vector.shape_cast %75 : vector<8x16x4xf32> to vector<128x4xf32>
    %c0_122 = arith.constant 0 : index
    %c28_123 = arith.constant 28 : index
    %77 = vector.load %arg9[%c0_122, %c28_123] : memref<128x36xf32, #tpu.memory_space<vmem>>, vector<128x4xf32>
    tpu.vector_store %arg9[%c0_122, %c28_123], %76 {strides = array<i32>} : memref<128x36xf32, #tpu.memory_space<vmem>>, vector<128x4xf32>,
    %c2_124 = arith.constant 2 : index
    %c2_125 = arith.constant 2 : index
    %c0_126 = arith.constant 0 : index
    %78 = vector.load %arg8[%c2_124, %c2_125, %c0_126] : memref<10x18x4xf32, #tpu.memory_space<vmem>>, vector<8x16x4xf32>
    %79 = vector.shape_cast %78 : vector<8x16x4xf32> to vector<128x4xf32>
    %c0_127 = arith.constant 0 : index
    %c32_128 = arith.constant 32 : index
    %80 = vector.load %arg9[%c0_127, %c32_128] : memref<128x36xf32, #tpu.memory_space<vmem>>, vector<128x4xf32>
    tpu.vector_store %arg9[%c0_127, %c32_128], %79 {strides = array<i32>} : memref<128x36xf32, #tpu.memory_space<vmem>>, vector<128x4xf32>,
    %c0_129 = arith.constant 0 : index
    %c0_130 = arith.constant 0 : index
    %81 = vector.load %arg5[%c0_129, %c0_130] : memref<8x36xf32, #tpu.memory_space<vmem>>, vector<8x36xf32>
    %c0_131 = arith.constant 0 : index
    %c0_132 = arith.constant 0 : index
    %82 = vector.load %arg9[%c0_131, %c0_132] : memref<128x36xf32, #tpu.memory_space<vmem>>, vector<128x36xf32>
    %cst_133 = arith.constant dense<0.000000e+00> : vector<8x128xf32>
    %83 = tpu.matmul %81, %82, %cst_133 {dimension_numbers = #tpu.dot_dimension_numbers<[1], [1], [0], [0], [0, 0, 1, 0], [], []>} : vector<8x36xf32>, vector<128x36xf32>, vector<8x128xf32> -> vector<8x128xf32>
    %c0_134 = arith.constant 0 : index
    %c0_135 = arith.constant 0 : index
    %84 = vector.load %arg6[%c0_134, %c0_135] : memref<8x1xf32, #tpu.memory_space<vmem>>, vector<8x1xf32>
    %85 = vector.broadcast %84 : vector<8x1xf32> to vector<8x128xf32>
    %86 = arith.addf %83, %85 : vector<8x128xf32>
    %c1_136 = arith.constant 1 : index
    %c0_137 = arith.constant 0 : index
    %c0_138 = arith.constant 0 : index
    %87 = vector.load %arg7[%c1_136, %c0_137, %c0_138] : memref<2x8x128xf32, #tpu.memory_space<vmem>>, vector<1x8x128xf32>
    %88 = vector.shape_cast %87 : vector<1x8x128xf32> to vector<8x128xf32>
    %89 = vector.shape_cast %86 : vector<8x128xf32> to vector<1x8x128xf32>
    tpu.vector_store %arg7[%c1_136, %c0_137, %c0_138], %89 {strides = array<i32>} : memref<2x8x128xf32, #tpu.memory_space<vmem>>, vector<1x8x128xf32>,
    return
  }
  func.func @transform_0(%arg0: i32, %arg1: i32) -> (i32, i32, i32, i32) {
    %c0_i32 = arith.constant 0 : i32
    %c0_i32_0 = arith.constant 0 : i32
    %c0_i32_1 = arith.constant 0 : i32
    return %arg0, %arg1, %c0_i32, %c0_i32_0 : i32, i32, i32, i32
  }
  func.func @transform_1(%arg0: i32, %arg1: i32) -> (i32, i32, i32, i32) {
    %c1_i32 = arith.constant 1 : i32
    %0 = arith.addi %arg1, %c1_i32 : i32
    %c8_i32 = arith.constant 8 : i32
    %1 = arith.muli %0, %c8_i32 : i32
    %c0_i32 = arith.constant 0 : i32
    %c0_i32_0 = arith.constant 0 : i32
    %c0_i32_1 = arith.constant 0 : i32
    return %arg0, %1, %c0_i32, %c0_i32_0 : i32, i32, i32, i32
  }
  func.func @transform_2(%arg0: i32, %arg1: i32) -> (i32, i32, i32, i32) {
    %c1_i32 = arith.constant 1 : i32
    %0 = arith.addi %arg1, %c1_i32 : i32
    %c8_i32 = arith.constant 8 : i32
    %1 = arith.muli %0, %c8_i32 : i32
    %c1_i32_0 = arith.constant 1 : i32
    %2 = arith.addi %1, %c1_i32_0 : i32
    %c0_i32 = arith.constant 0 : i32
    %c0_i32_1 = arith.constant 0 : i32
    %c0_i32_2 = arith.constant 0 : i32
    return %arg0, %2, %c0_i32, %c0_i32_1 : i32, i32, i32, i32
  }
  func.func @transform_3(%arg0: i32, %arg1: i32) -> (i32, i32) {
    %c0_i32 = arith.constant 0 : i32
    %c0_i32_0 = arith.constant 0 : i32
    %c0_i32_1 = arith.constant 0 : i32
    return %c0_i32, %c0_i32_0 : i32, i32
  }
  func.func @transform_4(%arg0: i32, %arg1: i32) -> (i32, i32) {
    %c0_i32 = arith.constant 0 : i32
    %c0_i32_0 = arith.constant 0 : i32
    %c0_i32_1 = arith.constant 0 : i32
    return %c0_i32, %c0_i32_0 : i32, i32
  }
  func.func @transform_5(%arg0: i32, %arg1: i32) -> (i32, i32, i32) {
    %c0_i32 = arith.constant 0 : i32
    %c0_i32_0 = arith.constant 0 : i32
    return %arg0, %c0_i32, %arg1 : i32, i32, i32
  }
}

</mosaic_0001>

<bundles_post_ra>
// kernel: tpu_custom_call.1
= control target key start
LH: loop header
LB: loop body
LE: loop exit
PB: predicated region body
PF: predicated region fallthrough
CT: control target
= control target key end

     0   :  { %s5224_s0 = inlined_call_operand.vmem [shape: f32[2,18,18,4], index: 0, kind: input, shape index: {}]   ;;  %s5225_s1 = inlined_call_operand.vmem [shape: f32[2,18,18,4], index: 1, kind: input, shape index: {}]   ;;  %s5226_s2 = inlined_call_operand.vmem [shape: f32[2,18,18,4], index: 2, kind: input, shape index: {}]   ;;  %s5227_s3 = inlined_call_operand.vmem [shape: f32[8,36], index: 3, kind: input, shape index: {}]   ;;  %s5228_s4 = inlined_call_operand.vmem [shape: f32[8,1], index: 4, kind: input, shape index: {}]   ;;  %s5229_s5 = inlined_call_operand.hbm [shape: f32[2,8,256], index: 5, kind: output, shape index: {}]  }
   0x1   :  { %5234 = sst [smem:[#allocation17_spill]] %s5224_s0 }
   0x2   :  { %10 = vsyncpa [#allocation8], 0 }
   0x3   :  { %12 = vsyncpa [#allocation8 + $0x1], 0  ;;  %s3642_s18 = smov 0   ;;  %s3644_s19 = smov 0  }
   0x4   :  { %s3646_s20 = smov 0   ;;  %s3648_s21 = smov 0  }
   0x5   :  { %s3650_s22 = smov 0   ;;  %s3652_s23 = smov 0  }
   0x6   :  { %s3654_s24 = smov 0   ;;  %s3656_s25 = smov 0  }
   0x7   :  { %s3658_s26 = smov 0   ;;  %s3660_s27 = smov 0  }
   0x8 LB: > { %5235 = sst [smem:[#allocation10_spill]] %s3526_s18  ;;  %s2957_s28 = sadd.s32 4294967295, %s3562_s27   ;;  %s3562_s27 = sphi %s3660_s27, %s18_s27   ;;  %s3558_s26 = sphi %s3658_s26, %s5270_s26   ;;  %s3554_s25 = sphi %s3656_s25, %s5269_s25   ;;  %s3550_s24 = sphi %s3654_s24, %s5261_s24   ;;  %s3546_s23 = sphi %s3652_s23, %s5268_s23   ;;  %s3542_s22 = sphi %s3650_s22, %s5267_s22   ;;  %s3538_s21 = sphi %s3648_s21, %s5266_s21   ;;  %s3534_s20 = sphi %s3646_s20, %s5265_s20   ;;  %s3530_s19 = sphi %s3644_s19, %s5264_s19   ;;  %s3526_s18 = sphi %s3642_s18, %s5263_s18  }
   0x9   : > { %5236 = sst [smem:[#allocation11_spill]] %s3550_s24  ;;  %s27_s30 = sadd.s32 1, %s3558_s26 }
   0xa   : > { %s39_s6 = sadd.s32 1, %s3550_s24  ;;  %p28_p0 = scmp.ge.s32.totalorder %s27_s30, 2 }
   0xb   : > { %p46_p1 = scmp.ne.s32.totalorder %s3550_s24, %s3546_s23  ;;  %p47_p2 = scmp.eq.s32.totalorder %s3562_s27, 0 }
   0xc   : > { %s3065_s7 = sshll.u32 %s3558_s26, 3  ;;  %s5272_s30 = smov (%p28_p0, %s27_s30), 0 }
   0xd   : > { %5237 = sst [smem:[#allocation12_spill]] %s5272_s30  ;;  %p3707_p3 = por %p47_p2, %p46_p1 }
   0xe   : > { %s3066_s9 = sadd.s32 8, %s3065_s7  ;;  %s35_s10 = ssub.s32 %s3558_s26, %s5272_s30 }
   0xf   : > { %s3067_s11 = sshll.u32 %s5272_s30, 3  ;;  %p37_p4 = scmp.eq.s32.totalorder %s35_s10, 0 }
  0x10   : > { %s3068_s12 = sadd.s32 8, %s3067_s11  ;;  %s71_s14 = sadd.s32 1, %s3542_s22 }
  0x11   : > { %s67_s13 = ssub.s32 %s3066_s9, %s3068_s12  ;;  %p78_p6 = scmp.ne.s32.totalorder %s3542_s22, %s3538_s21 }
  0x12   : > { %s3716_s15 = scalar_select %p37_p4, %s3550_s24, %s39_s6  }
  0x13   : > { %p69_p5 = scmp.eq.s32.totalorder %s67_s13, 0  ;;  %s96_s16 = sadd.s32 1, %s3066_s9 }
  0x14   : > { %5239 = sst [smem:[#allocation13_spill]] %s3716_s15  ;;  %s99_s17 = sadd.s32 1, %s3068_s12 }
  0x15   : > { %s3721_s7 = scalar_select %p69_p5, %s3542_s22, %s71_s14  }
  0x16   : > { %p3725_p7 = por %p78_p6, %p47_p2  ;;  %s101_s11 = ssub.s32 %s96_s16, %s99_s17 }
  0x17   : > { %5240 = sst [smem:[#allocation14_spill]] %s3721_s7  ;;  %p103_p8 = scmp.eq.s32.totalorder %s101_s11, 0 }
  0x18   : > { %s105_s29 = sadd.s32 1, %s3534_s20  ;;  %p112_p9 = scmp.ne.s32.totalorder %s3534_s20, %s3530_s19 }
  0x19   : > { %p186_p10 = scmp.eq.s32.totalorder %s2957_s28, 1  ;;  %p191_p13 = scmp.ne.s32.totalorder %s3546_s23, %s3526_s18 }
  0x1a   : > { %s3733_s30 = scalar_select %p103_p8, %s3534_s20, %s105_s29  }
  0x1b   : > { %p3737_p11 = por %p112_p9, %p47_p2  ;;  %p3744_p12 = por %p186_p10, %p46_p1 }
  0x1c   : > { %5242 = sst [smem:[#allocation15_spill]] %s3733_s30  ;;  %s5245_s12 = sadd.s32 4294967294, %s3562_s27  }
  0x1d   : > { %p192_p0 = scmp.eq.s32.totalorder %s5245_s12, 1  ;;  %p2964_p5 = scmp.ge.s32.totalorder %s3562_s27, 2 }
  0x1f   : > { %p3752_p4 = por %p192_p0, %p191_p13  ;;  %214 = sbr.rel (%p2964_p5) target bundleno = 130 (0x82), region = 24 }
  0x21   : > { %s5246_s13 = scalar_select %p3752_p4, 1, 0 }
  0x23   : > { %5247 = sst [smem:[#allocation16_spill]] %s5246_s13 }
  0x26   : > { %217 = sbr.rel (!%p3707_p3) target bundleno = 114 (0x72), region = 28  ;;  %s219_s28 = sand.u32 (%p3707_p3), 1, %s3550_s24  }
  0x27   : > { %s3241_s29 = smul.u32 (%p3707_p3), 384, %s219_s28  ;;  %s5248_s0 = sld [smem:[#allocation17_spill]] (%p3707_p3) }
  0x28   : > { %s3242_s14 = smul.u32 (%p3707_p3), 192, %s3558_s26  ;;  %s3596_s15 = smov (%p3707_p3), 24  }
  0x29   : > { %s3768_s12 = scalar_lea.vmem (%p3707_p3), [#allocation4], %s3241_s29   ;;  %3414 = sdivrem.u32 (%p3707_p3), %s3596_s15, 24 }
  0x2d   : > { %s3766_s11 = scalar_lea.vmem %s5248_s0, %s3242_s14  }
  0x32   : > { %s3771_s7 = spop.drf %3414 }
  0x33   : > { %p2972_p1 = scmp.le.s32.totalorder %s3771_s7, 0 }
  0x34   : > { %s5249_s8 = smov (!%p2972_p1), %s3768_s12  ;;  %s5250_s28 = smov (!%p2972_p1), %s3766_s11 }
  0x35   : > { %2893 = sbr.rel (%p2972_p1) target bundleno = 85 (0x55), region = 234  ;;  %s3780_s24 = smov (!%p2972_p1), 0  }
  0x36   : > { %s3782_s14 = smov (!%p2972_p1), 0  }
  0x3c LB: >> { %v398_v0 = vld [vmem:[%s3570_s28] sm:$0xff]  ;;  %v400_v1 = vld [vmem:[%s3570_s28 + $0x8] sm:$0xff]  ;;  %v402_v2 = vld [vmem:[%s3570_s28 + $0x10] sm:$0xff]  ;;  %s494_s29 = sadd.s32 1, %s3574_s24  ;;  %s392_s14 = sadd.s32 1, %s3578_s14   ;;  %s3578_s14 = sphi %s3782_s14, %s392_s14   ;;  %s3574_s24 = sphi %s3780_s24, %s5253_s24   ;;  %s3570_s28 = sphi %s5250_s28, %s5252_s28   ;;  %s3566_s8 = sphi %s5249_s8, %s5251_s8  }
  0x3d   : >> { %399 = vst [vmem:[%s3566_s8] sm:$0xff] %v398_v0  ;;  %401 = vst [vmem:[%s3566_s8 + $0x8] sm:$0xff] %v400_v1  ;;  %v404_v3 = vld [vmem:[%s3570_s28 + $0x18] sm:$0xff]  ;;  %v406_v4 = vld [vmem:[%s3570_s28 + $0x20] sm:$0xff]  ;;  %p495_p2 = scmp.ge.s32.totalorder %s494_s29, %s3771_s7  ;;  %p391_p3 = scmp.ge.s32.totalorder %s392_s14, %s3771_s7 }
  0x3e   : >> { %403 = vst [vmem:[%s3566_s8 + $0x10] sm:$0xff] %v402_v2  ;;  %v408_v5 = vld [vmem:[%s3570_s28 + $0x28] sm:$0xff]  ;;  %405 = vst [vmem:[%s3566_s8 + $0x18] sm:$0xff] %v404_v3  ;;  %v410_v6 = vld [vmem:[%s3570_s28 + $0x30] sm:$0xff] }
  0x3f   : >> { %407 = vst [vmem:[%s3566_s8 + $0x20] sm:$0xff] %v406_v4  ;;  %409 = vst [vmem:[%s3566_s8 + $0x28] sm:$0xff] %v408_v5  ;;  %v412_v7 = vld [vmem:[%s3570_s28 + $0x38] sm:$0xff]  ;;  %v414_v8 = vld [vmem:[%s3570_s28 + $0x40] sm:$0xff]  ;;  %s5274_s29 = smov (%p495_p2, %s494_s29), 0 }
  0x40   : >> { %411 = vst [vmem:[%s3566_s8 + $0x30] sm:$0xff] %v410_v6  ;;  %413 = vst [vmem:[%s3566_s8 + $0x38] sm:$0xff] %v412_v7  ;;  %v416_v9 = vld [vmem:[%s3570_s28 + $0x48] sm:$0xff]  ;;  %v418_v10 = vld [vmem:[%s3570_s28 + $0x50] sm:$0xff]  ;;  %s497_s24 = smul.u32 192, %s5274_s29 }
  0x41   : >> { %415 = vst [vmem:[%s3566_s8 + $0x40] sm:$0xff] %v414_v8  ;;  %v420_v11 = vld [vmem:[%s3570_s28 + $0x58] sm:$0xff]  ;;  %417 = vst [vmem:[%s3566_s8 + $0x48] sm:$0xff] %v416_v9  ;;  %v422_v12 = vld [vmem:[%s3570_s28 + $0x60] sm:$0xff] }
  0x42   : >> { %419 = vst [vmem:[%s3566_s8 + $0x50] sm:$0xff] %v418_v10  ;;  %421 = vst [vmem:[%s3566_s8 + $0x58] sm:$0xff] %v420_v11  ;;  %v424_v13 = vld [vmem:[%s3570_s28 + $0x68] sm:$0xff]  ;;  %v426_v14 = vld [vmem:[%s3570_s28 + $0x70] sm:$0xff]  ;;  %s3844_s16 = scalar_lea.vmem %s3766_s11, %s497_s24   ;;  %s3847_s17 = scalar_lea.vmem %s3768_s12, %s497_s24 [#allocation4]  }
  0x43   : >> { %423 = vst [vmem:[%s3566_s8 + $0x60] sm:$0xff] %v422_v12  ;;  %425 = vst [vmem:[%s3566_s8 + $0x68] sm:$0xff] %v424_v13  ;;  %v428_v15 = vld [vmem:[%s3570_s28 + $0x78] sm:$0xff]  ;;  %v430_v16 = vld [vmem:[%s3570_s28 + $0x80] sm:$0xff]  ;;  %s5253_s24 = smov %s5274_s29 }
  0x44   : >> { %427 = vst [vmem:[%s3566_s8 + $0x70] sm:$0xff] %v426_v14  ;;  %v432_v17 = vld [vmem:[%s3570_s28 + $0x88] sm:$0xff]  ;;  %429 = vst [vmem:[%s3566_s8 + $0x78] sm:$0xff] %v428_v15  ;;  %v434_v18 = vld [vmem:[%s3570_s28 + $0x90] sm:$0xff] }
  0x45   : >> { %431 = vst [vmem:[%s3566_s8 + $0x80] sm:$0xff] %v430_v16  ;;  %433 = vst [vmem:[%s3566_s8 + $0x88] sm:$0xff] %v432_v17  ;;  %v436_v19 = vld [vmem:[%s3570_s28 + $0x98] sm:$0xff]  ;;  %v438_v20 = vld [vmem:[%s3570_s28 + $0xa0] sm:$0xff] }
  0x46   : >> { %435 = vst [vmem:[%s3566_s8 + $0x90] sm:$0xff] %v434_v18  ;;  %437 = vst [vmem:[%s3566_s8 + $0x98] sm:$0xff] %v436_v19  ;;  %v440_v21 = vld [vmem:[%s3570_s28 + $0xa8] sm:$0xff]  ;;  %v442_v22 = vld [vmem:[%s3570_s28 + $0xb0] sm:$0xff] }
  0x47   : >> { %439 = vst [vmem:[%s3566_s8 + $0xa0] sm:$0xff] %v438_v20  ;;  %v444_v23 = vld [vmem:[%s3570_s28 + $0xb8] sm:$0xff]  ;;  %441 = vst [vmem:[%s3566_s8 + $0xa8] sm:$0xff] %v440_v21  ;;  %v446_v24 = vld [vmem:[%s3570_s28 + $0x1b0] sm:$0xff] }
  0x48   : >> { %443 = vst [vmem:[%s3566_s8 + $0xb0] sm:$0xff] %v442_v22  ;;  %445 = vst [vmem:[%s3566_s8 + $0xb8] sm:$0xff] %v444_v23  ;;  %v448_v25 = vld [vmem:[%s3570_s28 + $0x1b8] sm:$0xff]  ;;  %v450_v26 = vld [vmem:[%s3570_s28 + $0x1c0] sm:$0xff] }
  0x49   : >> { %447 = vst [vmem:[%s3566_s8 + $0xc0] sm:$0xff] %v446_v24  ;;  %449 = vst [vmem:[%s3566_s8 + $0xc8] sm:$0xff] %v448_v25  ;;  %v452_v27 = vld [vmem:[%s3570_s28 + $0x1c8] sm:$0xff]  ;;  %v454_v28 = vld [vmem:[%s3570_s28 + $0x1d0] sm:$0xff] }
  0x4a   : >> { %451 = vst [vmem:[%s3566_s8 + $0xd0] sm:$0xff] %v450_v26  ;;  %v456_v29 = vld [vmem:[%s3570_s28 + $0x1d8] sm:$0xff]  ;;  %453 = vst [vmem:[%s3566_s8 + $0xd8] sm:$0xff] %v452_v27  ;;  %v458_v30 = vld [vmem:[%s3570_s28 + $0x1e0] sm:$0xff] }
  0x4b   : >> { %455 = vst [vmem:[%s3566_s8 + $0xe0] sm:$0xff] %v454_v28  ;;  %457 = vst [vmem:[%s3566_s8 + $0xe8] sm:$0xff] %v456_v29  ;;  %v460_v31 = vld [vmem:[%s3570_s28 + $0x1e8] sm:$0xff]  ;;  %v462_v32 = vld [vmem:[%s3570_s28 + $0x1f0] sm:$0xff] }
  0x4c   : >> { %459 = vst [vmem:[%s3566_s8 + $0xf0] sm:$0xff] %v458_v30  ;;  %461 = vst [vmem:[%s3566_s8 + $0xf8] sm:$0xff] %v460_v31  ;;  %v464_v33 = vld [vmem:[%s3570_s28 + $0x1f8] sm:$0xff]  ;;  %v466_v34 = vld [vmem:[%s3570_s28 + $0x200] sm:$0xff] }
  0x4d   : >> { %463 = vst [vmem:[%s3566_s8 + $0x100] sm:$0xff] %v462_v32  ;;  %v468_v35 = vld [vmem:[%s3570_s28 + $0x208] sm:$0xff]  ;;  %465 = vst [vmem:[%s3566_s8 + $0x108] sm:$0xff] %v464_v33  ;;  %v470_v36 = vld [vmem:[%s3570_s28 + $0x210] sm:$0xff] }
  0x4e   : >> { %467 = vst [vmem:[%s3566_s8 + $0x110] sm:$0xff] %v466_v34  ;;  %469 = vst [vmem:[%s3566_s8 + $0x118] sm:$0xff] %v468_v35  ;;  %v472_v37 = vld [vmem:[%s3570_s28 + $0x218] sm:$0xff]  ;;  %v474_v38 = vld [vmem:[%s3570_s28 + $0x220] sm:$0xff]  ;;  %394 = sbr.rel (!%p391_p3) target bundleno = 60 (0x3c), region = 240 }
  0x4f   : >> { %471 = vst [vmem:[%s3566_s8 + $0x120] sm:$0xff] %v470_v36  ;;  %473 = vst [vmem:[%s3566_s8 + $0x128] sm:$0xff] %v472_v37  ;;  %v476_v39 = vld [vmem:[%s3570_s28 + $0x228] sm:$0xff]  ;;  %v478_v40 = vld [vmem:[%s3570_s28 + $0x230] sm:$0xff] }
  0x50   : >> { %475 = vst [vmem:[%s3566_s8 + $0x130] sm:$0xff] %v474_v38  ;;  %v480_v41 = vld [vmem:[%s3570_s28 + $0x238] sm:$0xff]  ;;  %477 = vst [vmem:[%s3566_s8 + $0x138] sm:$0xff] %v476_v39  ;;  %v482_v42 = vld [vmem:[%s3570_s28 + $0x240] sm:$0xff] }
  0x51   : >> { %479 = vst [vmem:[%s3566_s8 + $0x140] sm:$0xff] %v478_v40  ;;  %481 = vst [vmem:[%s3566_s8 + $0x148] sm:$0xff] %v480_v41  ;;  %v484_v43 = vld [vmem:[%s3570_s28 + $0x248] sm:$0xff]  ;;  %v486_v44 = vld [vmem:[%s3570_s28 + $0x250] sm:$0xff] }
  0x52   : >> { %483 = vst [vmem:[%s3566_s8 + $0x150] sm:$0xff] %v482_v42  ;;  %485 = vst [vmem:[%s3566_s8 + $0x158] sm:$0xff] %v484_v43  ;;  %v488_v45 = vld [vmem:[%s3570_s28 + $0x258] sm:$0xff]  ;;  %v490_v46 = vld [vmem:[%s3570_s28 + $0x260] sm:$0xff] }
  0x53   : >> { %487 = vst [vmem:[%s3566_s8 + $0x160] sm:$0xff] %v486_v44  ;;  %v492_v47 = vld [vmem:[%s3570_s28 + $0x268] sm:$0xff]  ;;  %489 = vst [vmem:[%s3566_s8 + $0x168] sm:$0xff] %v488_v45  ;;  %s5252_s28 = smov %s3844_s16 }
  0x54   : >> { %491 = vst [vmem:[%s3566_s8 + $0x170] sm:$0xff] %v490_v46  ;;  %493 = vst [vmem:[%s3566_s8 + $0x178] sm:$0xff] %v492_v47  ;;  %s5251_s8 = smov %s3847_s17 }
  0x55 PF: > { %3416 = sdivrem.u32 %s3596_s15, 24 }
  0x56   : > { %s2973_s0 = smul.u32 192, %s3771_s7 }
  0x58   : > { %s3916_s30 = scalar_lea.vmem %s3766_s11, %s2973_s0   ;;  %s3919_s13 = scalar_lea.vmem %s3768_s12, %s2973_s0 [#allocation4]  }
  0x5e   : > { %s3417_s18 = spop.drf %3416 }
  0x5f   : > { %p2975_p6 = scmp.le.s32.totalorder %s3417_s18, 0 }
  0x60   : > { %s3580_s29 = smov (!%p2975_p6), %s3919_s13   ;;  %s3584_s16 = smov (!%p2975_p6), %s3916_s30  }
  0x61   : > { %2907 = sbr.rel (%p2975_p6) target bundleno = 114 (0x72), region = 245  ;;  %s3588_s14 = smov (!%p2975_p6), 0  }
  0x62   : > { %s3592_s17 = smov (!%p2975_p6), 0  }
  0x68 LB: >> { %v517_v48 = vld [vmem:[%s3586_s16] sm:$0xff]  ;;  %v519_v49 = vld [vmem:[%s3586_s16 + $0x1b0] sm:$0xff]  ;;  %s521_s0 = sadd.s32 1, %s3590_s14  ;;  %s511_s17 = sadd.s32 1, %s3594_s17   ;;  %s3594_s17 = sphi %s3592_s17, %s511_s17   ;;  %s3590_s14 = sphi %s3588_s14, %s3589_s14   ;;  %s3586_s16 = sphi %s3584_s16, %s526_s16   ;;  %s3582_s29 = sphi %s3580_s29, %s527_s29  }
  0x69   : >> { %518 = vst [vmem:[%s3582_s29] sm:$0xff] %v517_v48  ;;  %520 = vst [vmem:[%s3582_s29 + $0xc0] sm:$0xff] %v519_v49  ;;  %p522_p8 = scmp.ge.s32.totalorder %s521_s0, %s3417_s18  ;;  %p510_p9 = scmp.ge.s32.totalorder %s511_s17, %s3417_s18 }
  0x6b   : >> { %s5276_s0 = smov (%p522_p8, %s521_s0), 0  ;;  %513 = sbr.rel (!%p510_p9) target bundleno = 104 (0x68), region = 251 }
  0x6c   : >> { %s2976_s15 = sshll.u32 %s5276_s0, 3  ;;  %s3589_s14 = smov %s5276_s0  }
  0x6d   : >> { %s526_s16 = scalar_lea.vmem %s3916_s30, %s2976_s15   ;;  %s527_s29 = scalar_lea.vmem %s3919_s13, %s2976_s15 [#allocation4]  }
  0x72 PF: > { %533 = sbr.rel (!%p3725_p7) target bundleno = 122 (0x7a), region = 80  ;;  %s535_s7 = sand.u32 (%p3725_p7), 1, %s3542_s22  }
  0x73   : > { %s2978_s11 = smul.u32 (%p3725_p7), 192, %s3558_s26 }
  0x74   : > { %s3243_s12 = smul.u32 (%p3725_p7), 48, %s535_s7 }
  0x75   : > { %s2844_s24 = scalar_lea.vmem (%p3725_p7), %s5225_s1, %s2978_s11 }
  0x76   : > { %v2979_v50 = vld [vmem:[%s2844_s24 + $0xc0] sm:$0xff] (%p3725_p7)  ;;  %v2980_v51 = vld [vmem:[%s2844_s24 + $0xc8] sm:$0xff] (%p3725_p7)  ;;  %v2981_v52 = vld [vmem:[%s2844_s24 + $0xd0] sm:$0xff] (%p3725_p7)  ;;  %s537_s29 = scalar_lea.vmem (%p3725_p7), [#allocation5], %s3243_s12 }
  0x77   : > { %584 = vst [vmem:[%s537_s29] sm:$0xff] (%p3725_p7), %v2979_v50  ;;  %586 = vst [vmem:[%s537_s29 + $0x8] sm:$0xff] (%p3725_p7), %v2980_v51  ;;  %v2982_v53 = vld [vmem:[%s2844_s24 + $0x270] sm:$0xff] (%p3725_p7)  ;;  %v2983_v54 = vld [vmem:[%s2844_s24 + $0x278] sm:$0xff] (%p3725_p7) }
  0x78   : > { %588 = vst [vmem:[%s537_s29 + $0x10] sm:$0xff] (%p3725_p7), %v2981_v52  ;;  %v2984_v55 = vld [vmem:[%s2844_s24 + $0x280] sm:$0xff] (%p3725_p7)  ;;  %590 = vst [vmem:[%s537_s29 + $0x18] sm:$0xff] (%p3725_p7), %v2982_v53 }
  0x79   : > { %592 = vst [vmem:[%s537_s29 + $0x20] sm:$0xff] %v2983_v54  ;;  %594 = vst [vmem:[%s537_s29 + $0x28] sm:$0xff] %v2984_v55 }
  0x7a PF: > { %600 = sbr.rel (!%p3737_p11) target bundleno = 130 (0x82), region = 118  ;;  %s602_s18 = sand.u32 (%p3737_p11), 1, %s3534_s20  }
  0x7b   : > { %s2987_s30 = smul.u32 (%p3737_p11), 192, %s3558_s26 }
  0x7c   : > { %s3244_s10 = smul.u32 (%p3737_p11), 48, %s602_s18 }
  0x7d   : > { %s2853_s14 = scalar_lea.vmem (%p3737_p11), %s5226_s2, %s2987_s30 }
  0x7e   : > { %v2988_v56 = vld [vmem:[%s2853_s14 + $0xd8] sm:$0xff] (%p3737_p11)  ;;  %v2989_v57 = vld [vmem:[%s2853_s14 + $0xe0] sm:$0xff] (%p3737_p11)  ;;  %v2990_v58 = vld [vmem:[%s2853_s14 + $0xe8] sm:$0xff] (%p3737_p11)  ;;  %s604_s17 = scalar_lea.vmem (%p3737_p11), [#allocation6], %s3244_s10 }
  0x7f   : > { %652 = vst [vmem:[%s604_s17] sm:$0xff] (%p3737_p11), %v2988_v56  ;;  %654 = vst [vmem:[%s604_s17 + $0x8] sm:$0xff] (%p3737_p11), %v2989_v57  ;;  %v2991_v59 = vld [vmem:[%s2853_s14 + $0x288] sm:$0xff] (%p3737_p11)  ;;  %v2992_v60 = vld [vmem:[%s2853_s14 + $0x290] sm:$0xff] (%p3737_p11) }
  0x80   : > { %656 = vst [vmem:[%s604_s17 + $0x10] sm:$0xff] (%p3737_p11), %v2990_v58  ;;  %v2993_v61 = vld [vmem:[%s2853_s14 + $0x298] sm:$0xff] (%p3737_p11)  ;;  %658 = vst [vmem:[%s604_s17 + $0x18] sm:$0xff] (%p3737_p11), %v2991_v59 }
  0x81   : > { %660 = vst [vmem:[%s604_s17 + $0x20] sm:$0xff] %v2992_v60  ;;  %662 = vst [vmem:[%s604_s17 + $0x28] sm:$0xff] %v2993_v61 }
  0x82 PF: > { %p2994_p7 = scmp.ge.s32.totalorder %s3562_s27, 1  ;;  %p667_p10 = scmp.lt.s32.totalorder %s3562_s27, 3 }
  0x84   : > { %p668_p11 = pnand %p2994_p7, %p667_p10 }
  0x85   : > { %s3942_s6 = sand.u32 (!%p668_p11), 1, %s3546_s23   ;;  %vm762_vm0 = vcmask (!%p668_p11), 31744   ;;  %vm765_vm1 = vcmask (!%p668_p11), 25600   ;;  %s3597_s7 = smov (!%p668_p11), 4   ;;  %vm914_vm2 = vcmask (!%p668_p11), 64544   ;;  %vm1011_vm3 = vcmask (!%p668_p11), 97344  }
  0x86   : > { %671 = sbr.rel (%p668_p11) target bundleno = 1020 (0x3fc), region = 156  ;;  %s681_s11 = sand.u32 (!%p668_p11), 1, %s3538_s21   ;;  %vm1109_vm4 = vcmask (!%p668_p11), 130144   ;;  %vm1206_vm5 = vcmask (!%p668_p11), 162944   ;;  %vm1303_vm6 = vcmask (!%p668_p11), 195744   ;;  %vm1401_vm7 = vcmask (!%p668_p11), 228544  }
  0x87   : > { %s3245_s0 = smul.u32 (!%p668_p11), 384, %s3942_s6  ;;  %s3598_s8 = smov (!%p668_p11), 8   ;;  %vm1498_vm8 = vcmask (!%p668_p11), 261344   ;;  %vm1595_vm9 = vcmask (!%p668_p11), 294144   ;;  %vm1635_vm10 = vcmask (!%p668_p11), 293888   ;;  %vm3606_vm12 = vmmov (!%p668_p11), 0  }
  0x88   : > { %s4014_s12 = smul.u32 (!%p668_p11), 48, %s681_s11  ;;  %s3599_s28 = smov (!%p668_p11), 12   ;;  %vm4596_vm11 = vmpackc.low (!%p668_p11), %vm1635_vm10, %vm1635_vm10 }
  0x89   : > { %s3945_s15 = scalar_lea.vmem (!%p668_p11), [#allocation4], %s3245_s0  ;;  %s3600_s24 = smov (!%p668_p11), 16  }
  0x8a   : > { %v741_v62 = vld [vmem:[%s3945_s15 + $0x18] sm:$0xff] (!%p668_p11)  ;;  %v742_v63 = vld [vmem:[%s3945_s15 + $0x20] sm:$0xff] (!%p668_p11)  ;;  %v739_v1 = vld [vmem:[%s3945_s15 + $0x8] sm:$0xff] (!%p668_p11)  ;;  %s4079_s21 = scalar_lea.vmem (!%p668_p11), [#allocation5], %s4014_s12  ;;  %s3601_s29 = smov (!%p668_p11), 20  }
  0x8b   : > { %v738_v0 = vld [vmem:[%s3945_s15] sm:$0xff] (!%p668_p11)  ;;  %767 = vst.msk [vmem:[#allocation2 + $0x18] sm:$0xff] (!%p668_p11), %vm762_vm0, %v741_v62  ;;  %768 = vst.msk [vmem:[#allocation2 + $0x20] sm:$0xff] (!%p668_p11), %vm762_vm0, %v742_v63  ;;  %v743_v2 = vld [vmem:[%s3945_s15 + $0x28] sm:$0x3] (!%p668_p11)  ;;  %s3602_s18 = smov (!%p668_p11), 24  }
  0x8c   : > { %763 = vst.msk [vmem:[#allocation2] sm:$0xff] (!%p668_p11), %vm762_vm0, %v738_v0  ;;  %v740_v3 = vld [vmem:[%s3945_s15 + $0x10] sm:$0x3] (!%p668_p11)  ;;  %764 = vst.msk [vmem:[#allocation2 + $0x8] sm:$0xff] (!%p668_p11), %vm762_vm0, %v739_v1  ;;  %v745_v4 = vld [vmem:[%s3945_s15 + $0x38] sm:$0xff] (!%p668_p11)  ;;  %s3603_s30 = smov (!%p668_p11), 28  }
  0x8d   : > { %769 = vst.msk [vmem:[#allocation2 + $0x28] sm:$0x3] %vm765_vm1, %v743_v2  ;;  %766 = vst.msk [vmem:[#allocation2 + $0x10] sm:$0x3] %vm765_vm1, %v740_v3  ;;  %v746_v5 = vld [vmem:[%s3945_s15 + $0x40] sm:$0x3] }
  0x8e   : > { %v744_v6 = vld [vmem:[%s3945_s15 + $0x30] sm:$0xff]  ;;  %771 = vst.msk [vmem:[#allocation2 + $0x38] sm:$0xff] %vm762_vm0, %v745_v4  ;;  %v749_v8 = vld [vmem:[%s3945_s15 + $0x58] sm:$0x3]  ;;  %v747_v9 = vld [vmem:[%s3945_s15 + $0x48] sm:$0xff]  ;;  %s3605_s10 = smov 32  }
  0x8f   : > { %772 = vst.msk [vmem:[#allocation2 + $0x40] sm:$0x3] %vm765_vm1, %v746_v5  ;;  %v748_v7 = vld [vmem:[%s3945_s15 + $0x50] sm:$0xff]  ;;  %775 = vst.msk [vmem:[#allocation2 + $0x58] sm:$0x3] %vm765_vm1, %v749_v8  ;;  %v751_v10 = vld [vmem:[%s3945_s15 + $0x68] sm:$0xff] }
  0x90   : > { %770 = vst.msk [vmem:[#allocation2 + $0x30] sm:$0xff] %vm762_vm0, %v744_v6  ;;  %774 = vst.msk [vmem:[#allocation2 + $0x50] sm:$0xff] %vm762_vm0, %v748_v7  ;;  %v752_v11 = vld [vmem:[%s3945_s15 + $0x70] sm:$0x3]  ;;  %v750_v12 = vld [vmem:[%s3945_s15 + $0x60] sm:$0xff]  ;;  %s688_s13 = sand.u32 1, %s3530_s19  }
  0x91   : > { %773 = vst.msk [vmem:[#allocation2 + $0x48] sm:$0xff] %vm762_vm0, %v747_v9  ;;  %777 = vst.msk [vmem:[#allocation2 + $0x68] sm:$0xff] %vm762_vm0, %v751_v10  ;;  %v754_v13 = vld [vmem:[%s3945_s15 + $0x80] sm:$0xff]  ;;  %v755_v14 = vld [vmem:[%s3945_s15 + $0x88] sm:$0x3]  ;;  %s3247_s16 = smul.u32 48, %s688_s13 }
  0x92   : > { %778 = vst.msk [vmem:[#allocation2 + $0x70] sm:$0x3] %vm765_vm1, %v752_v11  ;;  %v753_v15 = vld [vmem:[%s3945_s15 + $0x78] sm:$0xff]  ;;  %781 = vst.msk [vmem:[#allocation2 + $0x88] sm:$0x3] %vm765_vm1, %v755_v14  ;;  %v756_v18 = vld [vmem:[%s3945_s15 + $0x90] sm:$0xff] }
  0x93   : > { %776 = vst.msk [vmem:[#allocation2 + $0x60] sm:$0xff] %vm762_vm0, %v750_v12  ;;  %780 = vst.msk [vmem:[#allocation2 + $0x80] sm:$0xff] %vm762_vm0, %v754_v13  ;;  %v757_v16 = vld [vmem:[%s3945_s15 + $0x98] sm:$0xff]  ;;  %v758_v17 = vld [vmem:[%s3945_s15 + $0xa0] sm:$0x3]  ;;  %s4609_s19 = scalar_lea.vmem [#allocation6], %s3247_s16 }
  0x94   : > { %779 = vst.msk [vmem:[#allocation2 + $0x78] sm:$0xff] %vm762_vm0, %v753_v15  ;;  %783 = vst.msk [vmem:[#allocation2 + $0x98] sm:$0xff] %vm762_vm0, %v757_v16  ;;  %v760_v19 = vld [vmem:[%s3945_s15 + $0xb0] sm:$0xff]  ;;  %v761_v20 = vld [vmem:[%s3945_s15 + $0xb8] sm:$0x3] }
  0x95   : > { %784 = vst.msk [vmem:[#allocation2 + $0xa0] sm:$0x3] %vm765_vm1, %v758_v17  ;;  %v759_v21 = vld [vmem:[%s3945_s15 + $0xa8] sm:$0xff]  ;;  %787 = vst.msk [vmem:[#allocation2 + $0xb8] sm:$0x3] %vm765_vm1, %v761_v20  ;;  %v834_v24 = vld [vmem:[#allocation2 + $0x1] sm:$0xff] }
  0x96   : > { %782 = vst.msk [vmem:[#allocation2 + $0x90] sm:$0xff] %vm762_vm0, %v756_v18  ;;  %v3992_v22 = vld [vmem:[#allocation2 + $0x19] sm:$0xff]  ;;  %786 = vst.msk [vmem:[#allocation2 + $0xb0] sm:$0xff] %vm762_vm0, %v760_v19  ;;  %866 = vrot.lane.b32.xlu0 %v834_v24, %s3597_s7  ;;  %v4001_v25 = vld [vmem:[#allocation2 + $0x21] sm:$0xff] }
  0x97   : > { %785 = vst.msk [vmem:[#allocation2 + $0xa8] sm:$0xff] %vm762_vm0, %v759_v21  ;;  %v3015_v23 = vld [vmem:[%s3945_s15 + $0xd0] sm:$0x3]  ;;  %870 = vrot.lane.b32.xlu1 %v3992_v22, %s3597_s7  ;;  %v835_v26 = vld [vmem:[#allocation2 + $0x9] sm:$0xff]  ;;  %v4012_v29 = vld [vmem:[#allocation2 + $0x31] sm:$0xff] }
  0x98   : > { %v4003_v27 = vld [vmem:[#allocation2 + $0xa] sm:$0xff]  ;;  %v4010_v28 = vld [vmem:[#allocation2 + $0x39] sm:$0xff]  ;;  %v931_v46 = vld [vmem:[#allocation2 + $0x2] sm:$0xff] }
  0x99   : > { %1785 = vst.msk [vmem:[#allocation2 + $0x10] sm:$0x3] %vm765_vm1, %v3015_v23  ;;  %v4020_v30 = vld [vmem:[#allocation2 + $0x51] sm:$0xff]  ;;  %v4022_v31 = vld [vmem:[#allocation2 + $0x49] sm:$0xff]  ;;  %v4024_v32 = vld [vmem:[#allocation2 + $0x20] sm:$0xff] }
  0x9a   : > { %868 = vrot.lane.b32.xlu0 %v835_v26, %s3597_s7  ;;  %v4026_v33 = vld [vmem:[#allocation2 + $0x18] sm:$0xff]  ;;  %v4030_v35 = vld [vmem:[#allocation2 + $0x69] sm:$0xff]  ;;  %821 = vst.msk [vmem:[#allocation3 + $0x18] sm:$0xff] %vm762_vm0, %v4024_v32  ;;  %v4046_v39 = vld [vmem:[#allocation2 + $0x61] sm:$0xff] }
  0x9b   : > { %872 = vrot.lane.b32.xlu1 %v4001_v25, %s3597_s7  ;;  %v4028_v34 = vld [vmem:[#allocation2 + $0x38] sm:$0xff]  ;;  %v4032_v36 = vld [vmem:[#allocation2 + $0x30] sm:$0xff]  ;;  %v4036_v38 = vld [vmem:[#allocation2 + $0x48] sm:$0xff]  ;;  %820 = vst.msk [vmem:[#allocation3 + $0x10] sm:$0xff] %vm762_vm0, %v4026_v33 }
  0x9c   : > { %v4034_v37 = vld [vmem:[#allocation2 + $0x50] sm:$0xff]  ;;  %823 = vst.msk [vmem:[#allocation3 + $0x28] sm:$0xff] %vm762_vm0, %v4028_v34  ;;  %v4048_v40 = vld [vmem:[#allocation2 + $0x68] sm:$0xff]  ;;  %v4050_v41 = vld [vmem:[#allocation2 + $0x60] sm:$0xff] }
  0x9d   : > { %v4052_v42 = vld [vmem:[#allocation2 + $0x80] sm:$0xff]  ;;  %822 = vst.msk [vmem:[#allocation3 + $0x20] sm:$0xff] %vm762_vm0, %v4032_v36  ;;  %825 = vst.msk [vmem:[#allocation3 + $0x38] sm:$0xff] %vm762_vm0, %v4034_v37  ;;  %v4062_v43 = vld [vmem:[#allocation2 + $0x78] sm:$0xff] }
  0x9e   : > { %874 = vrot.lane.b32.xlu0 %v4012_v29, %s3597_s7  ;;  %824 = vst.msk [vmem:[#allocation3 + $0x30] sm:$0xff] %vm762_vm0, %v4036_v38  ;;  %v4064_v44 = vld [vmem:[#allocation2 + $0x98] sm:$0xff]  ;;  %v4066_v45 = vld [vmem:[#allocation2 + $0x90] sm:$0xff]  ;;  %827 = vst.msk [vmem:[#allocation3 + $0x48] sm:$0xff] %vm762_vm0, %v4048_v40 }
  0x9f   : > { %876 = vrot.lane.b32.xlu1 %v4010_v28, %s3597_s7  ;;  %826 = vst.msk [vmem:[#allocation3 + $0x40] sm:$0xff] %vm762_vm0, %v4050_v41  ;;  %829 = vst.msk [vmem:[#allocation3 + $0x58] sm:$0xff] %vm762_vm0, %v4052_v42  ;;  %v4074_v47 = vld [vmem:[#allocation2 + $0xb0] sm:$0xff]  ;;  %v4076_v48 = vld [vmem:[#allocation2 + $0xa8] sm:$0xff] }
  0xa0   : > { %v789_v49 = vld [vmem:[%s4079_s21 + $0x8] sm:$0xff]  ;;  %828 = vst.msk [vmem:[#allocation3 + $0x50] sm:$0xff] %vm762_vm0, %v4062_v43  ;;  %831 = vst.msk [vmem:[#allocation3 + $0x68] sm:$0xff] %vm762_vm0, %v4064_v44  ;;  %v788_v53 = vld [vmem:[%s4079_s21] sm:$0xff] }
  0xa1   : > { %830 = vst.msk [vmem:[#allocation3 + $0x60] sm:$0xff] %vm762_vm0, %v4066_v45  ;;  %v4088_v50 = vld [vmem:[#allocation2 + $0x81] sm:$0xff]  ;;  %793 = vst.msk [vmem:[#allocation2 + $0xc8] sm:$0xff] %vm762_vm0, %v789_v49  ;;  %v3013_v54 = vld [vmem:[%s3945_s15 + $0xc0] sm:$0xff] }
  0xa2   : > { %878 = vrot.lane.b32.xlu0 %v4022_v31, %s3597_s7  ;;  %v4090_v51 = vld [vmem:[#allocation2 + $0x22] sm:$0xff]  ;;  %v4092_v52 = vld [vmem:[#allocation2 + $0x1a] sm:$0xff]  ;;  %833 = vst.msk [vmem:[#allocation3 + $0x78] sm:$0xff] %vm762_vm0, %v4074_v47  ;;  %832 = vst.msk [vmem:[#allocation3 + $0x70] sm:$0xff] %vm762_vm0, %v4076_v48 }
  0xa3   : > { %880 = vrot.lane.b32.xlu1 %v4020_v30, %s3597_s7  ;;  %792 = vst.msk [vmem:[#allocation2 + $0xc0] sm:$0xff] %vm762_vm0, %v788_v53  ;;  %v802_v55 = vld [vmem:[#allocation2] sm:$0xff]  ;;  %v803_v56 = vld [vmem:[#allocation2 + $0x8] sm:$0xff]  ;;  %v3014_v57 = vld [vmem:[%s3945_s15 + $0xc8] sm:$0xff] }
  0xa4   : > { %818 = vst.msk [vmem:[#allocation3] sm:$0xff] %vm762_vm0, %v802_v55  ;;  %1783 = vst.msk [vmem:[#allocation2] sm:$0xff] %vm762_vm0, %v3013_v54  ;;  %v790_v58 = vld [vmem:[%s4079_s21 + $0x10] sm:$0x3]  ;;  %v3018_v59 = vld [vmem:[%s3945_s15 + $0xe8] sm:$0x3] }
  0xa5   : > { %819 = vst.msk [vmem:[#allocation3 + $0x8] sm:$0xff] %vm762_vm0, %v803_v56  ;;  %1784 = vst.msk [vmem:[#allocation2 + $0x8] sm:$0xff] %vm762_vm0, %v3014_v57  ;;  %v3016_v60 = vld [vmem:[%s3945_s15 + $0xd8] sm:$0xff]  ;;  %v4114_v61 = vld [vmem:[#allocation2 + $0x79] sm:$0xff] }
  0xa6   : > { %882 = vrot.lane.b32.xlu0 %v4046_v39, %s3597_s7  ;;  %794 = vst.msk [vmem:[#allocation2 + $0xd0] sm:$0x3] %vm765_vm1, %v790_v58  ;;  %1788 = vst.msk [vmem:[#allocation2 + $0x28] sm:$0x3] %vm765_vm1, %v3018_v59  ;;  %v4123_v62 = vld [vmem:[#allocation2 + $0x99] sm:$0xff]  ;;  %v4125_v63 = vld [vmem:[#allocation2 + $0x91] sm:$0xff] }
  0xa7   : > { %884 = vrot.lane.b32.xlu1 %v4030_v35, %s3597_s7  ;;  %1786 = vst.msk [vmem:[#allocation2 + $0x18] sm:$0xff] %vm762_vm0, %v3016_v60  ;;  %v4131_v0 = vld [vmem:[#allocation2 + $0xb1] sm:$0xff]  ;;  %v4133_v1 = vld [vmem:[#allocation2 + $0xa9] sm:$0xff]  ;;  %v4144_v2 = vld [vmem:[#allocation2 + $0x3a] sm:$0xff] }
  0xa8   : > { %v3021_v3 = vld [vmem:[%s3945_s15 + $0x100] sm:$0x3]  ;;  %v4150_v4 = vld [vmem:[#allocation2 + $0x32] sm:$0xff]  ;;  %v4166_v8 = vld [vmem:[#allocation2 + $0x62] sm:$0xff] }
  0xa9   : > { %1791 = vst.msk [vmem:[#allocation2 + $0x40] sm:$0x3] %vm765_vm1, %v3021_v3  ;;  %v4156_v5 = vld [vmem:[#allocation2 + $0x52] sm:$0xff]  ;;  %v4158_v6 = vld [vmem:[#allocation2 + $0x4a] sm:$0xff]  ;;  %v3024_v9 = vld [vmem:[%s3945_s15 + $0x118] sm:$0x3] }
  0xaa   : > { %886 = vrot.lane.b32.xlu0 %v4114_v61, %s3597_s7  ;;  %v4164_v7 = vld [vmem:[#allocation2 + $0x6a] sm:$0xff]  ;;  %v4173_v10 = vld [vmem:[#allocation2 + $0x82] sm:$0xff]  ;;  %1794 = vst.msk [vmem:[#allocation2 + $0x58] sm:$0x3] %vm765_vm1, %v3024_v9  ;;  %v4176_v11 = vld [vmem:[#allocation2 + $0x7a] sm:$0xff] }
  0xab   : > { %888 = vrot.lane.b32.xlu1 %v4088_v50, %s3597_s7  ;;  %v3017_v12 = vld [vmem:[%s3945_s15 + $0xe0] sm:$0xff]  ;;  %v4183_v13 = vld [vmem:[#allocation2 + $0x9a] sm:$0xff]  ;;  %v3020_v17 = vld [vmem:[%s3945_s15 + $0xf8] sm:$0xff] }
  0xac   : > { %1787 = vst.msk [vmem:[#allocation2 + $0x20] sm:$0xff] %vm762_vm0, %v3017_v12  ;;  %v4186_v14 = vld [vmem:[#allocation2 + $0x92] sm:$0xff]  ;;  %v4194_v16 = vld [vmem:[#allocation2 + $0xaa] sm:$0xff]  ;;  %1790 = vst.msk [vmem:[#allocation2 + $0x38] sm:$0xff] %vm762_vm0, %v3020_v17 }
  0xad   : > { %v4192_v15 = vld [vmem:[#allocation2 + $0xb2] sm:$0xff]  ;;  %v3019_v18 = vld [vmem:[%s3945_s15 + $0xf0] sm:$0xff]  ;;  %v1044_v20 = vld [vmem:[#allocation2 + $0xc8] sm:$0xff] }
  0xae   : > { %890 = vrot.lane.b32.xlu0 %v4125_v63, %s3597_s7  ;;  %1789 = vst.msk [vmem:[#allocation2 + $0x30] sm:$0xff] %vm762_vm0, %v3019_v18  ;;  %v3027_v19 = vld [vmem:[%s3945_s15 + $0x130] sm:$0x3]  ;;  %v3022_v23 = vld [vmem:[%s3945_s15 + $0x108] sm:$0xff]  ;;  %v3025_v12 = vld [vmem:[%s3945_s15 + $0x120] sm:$0xff] }
  0xaf   : > { %892 = vrot.lane.b32.xlu1 %v4123_v62, %s3597_s7  ;;  %1797 = vst.msk [vmem:[#allocation2 + $0x70] sm:$0x3] %vm765_vm1, %v3027_v19  ;;  %v1043_v21 = vld [vmem:[#allocation2 + $0xc0] sm:$0xff]  ;;  %v3030_v55 = vld [vmem:[%s3945_s15 + $0x148] sm:$0x3] }
  0xb0   : > { %1792 = vst.msk [vmem:[#allocation2 + $0x48] sm:$0xff] %vm762_vm0, %v3022_v23  ;;  %v3026_v9 = vld [vmem:[%s3945_s15 + $0x128] sm:$0xff]  ;;  %1795 = vst.msk [vmem:[#allocation2 + $0x60] sm:$0xff] %vm762_vm0, %v3025_v12  ;;  %v3033_v18 = vld [vmem:[%s3945_s15 + $0x160] sm:$0x3] }
  0xb1   : > { %1800 = vst.msk [vmem:[#allocation2 + $0x88] sm:$0x3] %vm765_vm1, %v3030_v55  ;;  %v4362_v17 = vld [vmem:[#allocation2 + $0x9a] sm:$0xff] }
  0xb2   : > { %894 = vrot.lane.b32.xlu0 %v4133_v1, %s3597_s7  ;;  %1796 = vst.msk [vmem:[#allocation2 + $0x68] sm:$0xff] %vm762_vm0, %v3026_v9  ;;  %v1853_v19 = vld [vmem:[#allocation2 + $0x1] sm:$0xff] }
  0xb3   : > { %896 = vrot.lane.b32.xlu1 %v4131_v0, %s3597_s7  ;;  %v4376_v23 = vld [vmem:[#allocation2 + $0x20] sm:$0xff] }
  0xb5   : > { %v4450_v9 = vld [vmem:[#allocation2 + $0x32] sm:$0xff] }
  0xb6   : > { %963 = vrot.lane.b32.xlu0 %v931_v46, %s3598_s8  ;;  %v1140_v46 = vld [vmem:[#allocation2 + $0xc1] sm:$0xff] }
  0xb7   : > { %965 = vrot.lane.b32.xlu1 %v4003_v27, %s3598_s8 }
  0xba   : > { %967 = vrot.lane.b32.xlu0 %v4092_v52, %s3598_s8 }
  0xbb   : > { %969 = vrot.lane.b32.xlu1 %v4090_v51, %s3598_s8 }
  0xbe   : > { %971 = vrot.lane.b32.xlu0 %v4150_v4, %s3598_s8 }
  0xbf   : > { %973 = vrot.lane.b32.xlu1 %v4144_v2, %s3598_s8 }
  0xc2   : > { %975 = vrot.lane.b32.xlu0 %v4158_v6, %s3598_s8 }
  0xc3   : > { %977 = vrot.lane.b32.xlu1 %v4156_v5, %s3598_s8 }
  0xc6   : > { %979 = vrot.lane.b32.xlu0 %v4166_v8, %s3598_s8 }
  0xc7   : > { %981 = vrot.lane.b32.xlu1 %v4164_v7, %s3598_s8 }
  0xca   : > { %983 = vrot.lane.b32.xlu0 %v4176_v11, %s3598_s8 }
  0xcb   : > { %985 = vrot.lane.b32.xlu1 %v4173_v10, %s3598_s8 }
  0xce   : > { %987 = vrot.lane.b32.xlu0 %v4186_v14, %s3598_s8 }
  0xcf   : > { %989 = vrot.lane.b32.xlu1 %v4183_v13, %s3598_s8 }
  0xd2   : > { %991 = vrot.lane.b32.xlu0 %v4194_v16, %s3598_s8 }
  0xd3   : > { %993 = vrot.lane.b32.xlu1 %v4192_v15, %s3598_s8 }
  0xd6   : > { %1061 = vrot.lane.b32.xlu0 %v4026_v33, %s3599_s28 }
  0xd7   : > { %1063 = vrot.lane.b32.xlu1 %v4024_v32, %s3599_s28  ;;  %v1141_v32 = vld [vmem:[#allocation2 + $0xc9] sm:$0xff] }
  0xda   : > { %1065 = vrot.lane.b32.xlu0 %v4032_v36, %s3599_s28 }
  0xdb   : > { %1067 = vrot.lane.b32.xlu1 %v4028_v34, %s3599_s28 }
  0xde   : > { %1069 = vrot.lane.b32.xlu0 %v4036_v38, %s3599_s28 }
  0xdf   : > { %1071 = vrot.lane.b32.xlu1 %v4034_v37, %s3599_s28 }
  0xe2   : > { %1073 = vrot.lane.b32.xlu0 %v4050_v41, %s3599_s28 }
  0xe3   : > { %1075 = vrot.lane.b32.xlu1 %v4048_v40, %s3599_s28 }
  0xe6   : > { %1077 = vrot.lane.b32.xlu0 %v4062_v43, %s3599_s28 }
  0xe7   : > { %1079 = vrot.lane.b32.xlu1 %v4052_v42, %s3599_s28 }
  0xea   : > { %1081 = vrot.lane.b32.xlu0 %v4066_v45, %s3599_s28 }
  0xeb   : > { %1083 = vrot.lane.b32.xlu1 %v4064_v44, %s3599_s28 }
  0xee   : > { %1085 = vrot.lane.b32.xlu0 %v4076_v48, %s3599_s28 }
  0xef   : > { %1087 = vrot.lane.b32.xlu1 %v4074_v47, %s3599_s28 }
  0xf2   : > { %1089 = vrot.lane.b32.xlu0 %v1043_v21, %s3599_s28 }
  0xf3   : > { %1091 = vrot.lane.b32.xlu1 %v1044_v20, %s3599_s28 }
  0xf6   : > { %1158 = vrot.lane.b32.xlu0 %v3992_v22, %s3600_s24  ;;  %v3023_v22 = vld [vmem:[%s3945_s15 + $0x110] sm:$0xff] }
  0xf7   : > { %1160 = vrot.lane.b32.xlu1 %v4001_v25, %s3600_s24  ;;  %1793 = vst.msk [vmem:[#allocation2 + $0x50] sm:$0xff] %vm762_vm0, %v3023_v22  ;;  %v1949_v22 = vld [vmem:[#allocation2 + $0x2] sm:$0xff] }
  0xfa   : > { %1162 = vrot.lane.b32.xlu0 %v4012_v29, %s3600_s24 }
  0xfb   : > { %1164 = vrot.lane.b32.xlu1 %v4010_v28, %s3600_s24 }
  0xfe   : > { %1166 = vrot.lane.b32.xlu0 %v4022_v31, %s3600_s24 }
  0xff   : > { %1168 = vrot.lane.b32.xlu1 %v4020_v30, %s3600_s24 }
 0x102   : > { %1170 = vrot.lane.b32.xlu0 %v4046_v39, %s3600_s24 }
 0x103   : > { %1172 = vrot.lane.b32.xlu1 %v4030_v35, %s3600_s24 }
 0x106   : > { %1174 = vrot.lane.b32.xlu0 %v4114_v61, %s3600_s24 }
 0x107   : > { %1176 = vrot.lane.b32.xlu1 %v4088_v50, %s3600_s24 }
 0x108   : > { %v867_v25 = vpop.permute.xlu0 %866 }
 0x109   : > { %v871_v24 = vpop.permute.xlu1 %870  ;;  %915 = vst.msk [vmem:[#allocation3] sm:$0xff] %vm914_vm2, %v867_v25  ;;  %v4378_v25 = vld [vmem:[#allocation2 + $0x18] sm:$0xff] }
 0x10a   : > { %917 = vst.msk [vmem:[#allocation3 + $0x10] sm:$0xff] %vm914_vm2, %v871_v24  ;;  %1178 = vrot.lane.b32.xlu0 %v4125_v63, %s3600_s24 }
 0x10b   : > { %1180 = vrot.lane.b32.xlu1 %v4123_v62, %s3600_s24 }
 0x10c   : > { %v869_v27 = vpop.permute.xlu0 %868 }
 0x10d   : > { %v873_v26 = vpop.permute.xlu1 %872  ;;  %916 = vst.msk [vmem:[#allocation3 + $0x8] sm:$0xff] %vm914_vm2, %v869_v27  ;;  %v4386_v27 = vld [vmem:[#allocation2 + $0x21] sm:$0xff] }
 0x10e   : > { %918 = vst.msk [vmem:[#allocation3 + $0x18] sm:$0xff] %vm914_vm2, %v873_v26  ;;  %1182 = vrot.lane.b32.xlu0 %v4133_v1, %s3600_s24 }
 0x10f   : > { %1184 = vrot.lane.b32.xlu1 %v4131_v0, %s3600_s24 }
 0x110   : > { %v875_v47 = vpop.permute.xlu0 %874 }
 0x111   : > { %v877_v33 = vpop.permute.xlu1 %876  ;;  %919 = vst.msk [vmem:[#allocation3 + $0x20] sm:$0xff] %vm914_vm2, %v875_v47  ;;  %v4396_v47 = vld [vmem:[#allocation2 + $0x22] sm:$0xff] }
 0x112   : > { %920 = vst.msk [vmem:[#allocation3 + $0x28] sm:$0xff] %vm914_vm2, %v877_v33  ;;  %1186 = vrot.lane.b32.xlu0 %v1140_v46, %s3600_s24  ;;  %v4388_v33 = vld [vmem:[#allocation2 + $0x19] sm:$0xff] }
 0x113   : > { %1188 = vrot.lane.b32.xlu1 %v1141_v32, %s3600_s24 }
 0x114   : > { %v879_v49 = vpop.permute.xlu0 %878 }
 0x115   : > { %v881_v48 = vpop.permute.xlu1 %880  ;;  %921 = vst.msk [vmem:[#allocation3 + $0x30] sm:$0xff] %vm914_vm2, %v879_v49  ;;  %v4398_v49 = vld [vmem:[#allocation2 + $0x1a] sm:$0xff] }
 0x116   : > { %922 = vst.msk [vmem:[#allocation3 + $0x38] sm:$0xff] %vm914_vm2, %v881_v48  ;;  %1255 = vrot.lane.b32.xlu0 %v4092_v52, %s3601_s29 }
 0x117   : > { %1257 = vrot.lane.b32.xlu1 %v4090_v51, %s3601_s29 }
 0x118   : > { %v883_v54 = vpop.permute.xlu0 %882 }
 0x119   : > { %v885_v53 = vpop.permute.xlu1 %884  ;;  %923 = vst.msk [vmem:[#allocation3 + $0x40] sm:$0xff] %vm914_vm2, %v883_v54 }
 0x11a   : > { %924 = vst.msk [vmem:[#allocation3 + $0x48] sm:$0xff] %vm914_vm2, %v885_v53  ;;  %1259 = vrot.lane.b32.xlu0 %v4150_v4, %s3601_s29 }
 0x11b   : > { %1261 = vrot.lane.b32.xlu1 %v4144_v2, %s3601_s29 }
 0x11c   : > { %v887_v51 = vpop.permute.xlu0 %886 }
 0x11d   : > { %v889_v56 = vpop.permute.xlu1 %888  ;;  %925 = vst.msk [vmem:[#allocation3 + $0x50] sm:$0xff] %vm914_vm2, %v887_v51  ;;  %v3028_v51 = vld [vmem:[%s3945_s15 + $0x138] sm:$0xff] }
 0x11e   : > { %926 = vst.msk [vmem:[#allocation3 + $0x58] sm:$0xff] %vm914_vm2, %v889_v56  ;;  %1263 = vrot.lane.b32.xlu0 %v4158_v6, %s3601_s29  ;;  %v3029_v56 = vld [vmem:[%s3945_s15 + $0x140] sm:$0xff] }
 0x11f   : > { %1265 = vrot.lane.b32.xlu1 %v4156_v5, %s3601_s29  ;;  %1799 = vst.msk [vmem:[#allocation2 + $0x80] sm:$0xff] %vm762_vm0, %v3029_v56  ;;  %1798 = vst.msk [vmem:[#allocation2 + $0x78] sm:$0xff] %vm762_vm0, %v3028_v51  ;;  %v4548_v56 = vld [vmem:[#allocation2 + $0xc9] sm:$0xff] }
 0x120   : > { %v891_v57 = vpop.permute.xlu0 %890  ;;  %v4557_v51 = vld [vmem:[#allocation2 + $0xc2] sm:$0xff] }
 0x121   : > { %v893_v52 = vpop.permute.xlu1 %892  ;;  %927 = vst.msk [vmem:[#allocation3 + $0x60] sm:$0xff] %vm914_vm2, %v891_v57 }
 0x122   : > { %928 = vst.msk [vmem:[#allocation3 + $0x68] sm:$0xff] %vm914_vm2, %v893_v52  ;;  %1267 = vrot.lane.b32.xlu0 %v4166_v8, %s3601_s29  ;;  %v4414_v52 = vld [vmem:[#allocation2 + $0x38] sm:$0xff] }
 0x123   : > { %1269 = vrot.lane.b32.xlu1 %v4164_v7, %s3601_s29 }
 0x124   : > { %v895_v59 = vpop.permute.xlu0 %894 }
 0x125   : > { %v897_v58 = vpop.permute.xlu1 %896  ;;  %929 = vst.msk [vmem:[#allocation3 + $0x70] sm:$0xff] %vm914_vm2, %v895_v59 }
 0x126   : > { %930 = vst.msk [vmem:[#allocation3 + $0x78] sm:$0xff] %vm914_vm2, %v897_v58  ;;  %1271 = vrot.lane.b32.xlu0 %v4176_v11, %s3601_s29  ;;  %v4418_v58 = vld [vmem:[#allocation2 + $0x30] sm:$0xff] }
 0x127   : > { %1273 = vrot.lane.b32.xlu1 %v4173_v10, %s3601_s29 }
 0x128   : > { %v964_v62 = vpop.permute.xlu0 %963 }
 0x129   : > { %v966_v60 = vpop.permute.xlu1 %965  ;;  %1012 = vst.msk [vmem:[#allocation3] sm:$0xff] %vm1011_vm3, %v964_v62 }
 0x12a   : > { %1013 = vst.msk [vmem:[#allocation3 + $0x8] sm:$0xff] %vm1011_vm3, %v966_v60  ;;  %1275 = vrot.lane.b32.xlu0 %v4186_v14, %s3601_s29  ;;  %v4432_v60 = vld [vmem:[#allocation2 + $0x39] sm:$0xff] }
 0x12b   : > { %1277 = vrot.lane.b32.xlu1 %v4183_v13, %s3601_s29 }
 0x12c   : > { %v968_v0 = vpop.permute.xlu0 %967 }
 0x12d   : > { %v970_v63 = vpop.permute.xlu1 %969  ;;  %1014 = vst.msk [vmem:[#allocation3 + $0x10] sm:$0xff] %vm1011_vm3, %v968_v0 }
 0x12e   : > { %1015 = vst.msk [vmem:[#allocation3 + $0x18] sm:$0xff] %vm1011_vm3, %v970_v63  ;;  %1279 = vrot.lane.b32.xlu0 %v4194_v16, %s3601_s29  ;;  %v4434_v63 = vld [vmem:[#allocation2 + $0x31] sm:$0xff] }
 0x12f   : > { %1281 = vrot.lane.b32.xlu1 %v4192_v15, %s3601_s29 }
 0x130   : > { %v972_v3 = vpop.permute.xlu0 %971 }
 0x131   : > { %v974_v1 = vpop.permute.xlu1 %973  ;;  %1016 = vst.msk [vmem:[#allocation3 + $0x20] sm:$0xff] %vm1011_vm3, %v972_v3 }
 0x132   : > { %1017 = vst.msk [vmem:[#allocation3 + $0x28] sm:$0xff] %vm1011_vm3, %v974_v1  ;;  %1353 = vrot.lane.b32.xlu0 %v4032_v36, %s3602_s18  ;;  %v4448_v1 = vld [vmem:[#allocation2 + $0x3a] sm:$0xff] }
 0x133   : > { %1355 = vrot.lane.b32.xlu1 %v4028_v34, %s3602_s18  ;;  %v3604_v34 = vmov 0.0|0.0  }
 0x134   : > { %v976_v14 = vpop.permute.xlu0 %975  ;;  %3177 = vmatprep.subr.bf16.mxu0 %v3604_v34  ;;  %3209 = vmatprep.subr.bf16.mxu1 %v3604_v34 }
 0x135   : > { %v978_v13 = vpop.permute.xlu1 %977  ;;  %1018 = vst.msk [vmem:[#allocation3 + $0x30] sm:$0xff] %vm1011_vm3, %v976_v14  ;;  %v4458_v14 = vld [vmem:[#allocation2 + $0xb2] sm:$0xff] }
 0x136   : > { %1019 = vst.msk [vmem:[#allocation3 + $0x38] sm:$0xff] %vm1011_vm3, %v978_v13  ;;  %1450 = vrot.lane.b32.xlu0 %v4012_v29, %s3603_s30  ;;  %v4456_v13 = vld [vmem:[#allocation2 + $0xb1] sm:$0xff] }
 0x137   : > { %1452 = vrot.lane.b32.xlu1 %v4010_v28, %s3603_s30 }
 0x138   : > { %v980_v15 = vpop.permute.xlu0 %979 }
 0x139   : > { %v982_v36 = vpop.permute.xlu1 %981  ;;  %1020 = vst.msk [vmem:[#allocation3 + $0x40] sm:$0xff] %vm1011_vm3, %v980_v15 }
 0x13a   : > { %1021 = vst.msk [vmem:[#allocation3 + $0x48] sm:$0xff] %vm1011_vm3, %v982_v36  ;;  %1547 = vrot.lane.b32.xlu0 %v4150_v4, %s3605_s10 }
 0x13b   : > { %1549 = vrot.lane.b32.xlu1 %v4144_v2, %s3605_s10 }
 0x13c   : > { %v984_v29 = vpop.permute.xlu0 %983 }
 0x13d   : > { %v986_v28 = vpop.permute.xlu1 %985  ;;  %1022 = vst.msk [vmem:[#allocation3 + $0x50] sm:$0xff] %vm1011_vm3, %v984_v29 }
 0x13e   : > { %1023 = vst.msk [vmem:[#allocation3 + $0x58] sm:$0xff] %vm1011_vm3, %v986_v28  ;;  %1357 = vrot.lane.b32.xlu0 %v4036_v38, %s3602_s18  ;;  %v4360_v38 = vld [vmem:[#allocation2 + $0x99] sm:$0xff] }
 0x13f   : > { %1359 = vrot.lane.b32.xlu1 %v4034_v37, %s3602_s18  ;;  %1803 = vst.msk [vmem:[#allocation2 + $0xa0] sm:$0x3] %vm765_vm1, %v3033_v18 }
 0x140   : > { %v988_v2 = vpop.permute.xlu0 %987 }
 0x141   : > { %v990_v16 = vpop.permute.xlu1 %989  ;;  %1024 = vst.msk [vmem:[#allocation3 + $0x60] sm:$0xff] %vm1011_vm3, %v988_v2 }
 0x142   : > { %1025 = vst.msk [vmem:[#allocation3 + $0x68] sm:$0xff] %vm1011_vm3, %v990_v16  ;;  %1454 = vrot.lane.b32.xlu0 %v4022_v31, %s3603_s30 }
 0x143   : > { %1456 = vrot.lane.b32.xlu1 %v4020_v30, %s3603_s30  ;;  %v1854_v30 = vld [vmem:[#allocation2 + $0x9] sm:$0xff] }
 0x144   : > { %v992_v37 = vpop.permute.xlu0 %991 }
 0x145   : > { %v994_v4 = vpop.permute.xlu1 %993  ;;  %1026 = vst.msk [vmem:[#allocation3 + $0x70] sm:$0xff] %vm1011_vm3, %v992_v37 }
 0x146   : > { %1027 = vst.msk [vmem:[#allocation3 + $0x78] sm:$0xff] %vm1011_vm3, %v994_v4  ;;  %1551 = vrot.lane.b32.xlu0 %v4158_v6, %s3605_s10 }
 0x147   : > { %1553 = vrot.lane.b32.xlu1 %v4156_v5, %s3605_s10  ;;  %v1950_v5 = vld [vmem:[#allocation2 + $0xa] sm:$0xff] }
 0x148   : > { %v1062_v20 = vpop.permute.xlu0 %1061 }
 0x149   : > { %v1064_v31 = vpop.permute.xlu1 %1063  ;;  %1110 = vst.msk [vmem:[#allocation3] sm:$0xff] %vm1109_vm4, %v1062_v20  ;;  %v4500_v20 = vld [vmem:[#allocation2 + $0x92] sm:$0xff] }
 0x14a   : > { %1111 = vst.msk [vmem:[#allocation3 + $0x8] sm:$0xff] %vm1109_vm4, %v1064_v31  ;;  %1885 = vrot.lane.b32.xlu0 %v1853_v19, %s3597_s7  ;;  %v4495_v19 = vld [vmem:[#allocation2 + $0x91] sm:$0xff] }
 0x14b   : > { %1887 = vrot.lane.b32.xlu1 %v1854_v30, %s3597_s7 }
 0x14c   : > { %v1066_v6 = vpop.permute.xlu0 %1065 }
 0x14d   : > { %v1068_v21 = vpop.permute.xlu1 %1067  ;;  %1112 = vst.msk [vmem:[#allocation3 + $0x10] sm:$0xff] %vm1109_vm4, %v1066_v6 }
 0x14e   : > { %1113 = vst.msk [vmem:[#allocation3 + $0x18] sm:$0xff] %vm1109_vm4, %v1068_v21  ;;  %1981 = vrot.lane.b32.xlu0 %v1949_v22, %s3598_s8  ;;  %v3031_v21 = vld [vmem:[%s3945_s15 + $0x150] sm:$0xff]  ;;  %v4506_v22 = vld [vmem:[#allocation2 + $0x50] sm:$0xff] }
 0x14f   : > { %1983 = vrot.lane.b32.xlu1 %v1950_v5, %s3598_s8  ;;  %v3032_v5 = vld [vmem:[%s3945_s15 + $0x158] sm:$0xff]  ;;  %1801 = vst.msk [vmem:[#allocation2 + $0x90] sm:$0xff] %vm762_vm0, %v3031_v21 }
 0x150   : > { %v1070_v26 = vpop.permute.xlu0 %1069  ;;  %1802 = vst.msk [vmem:[#allocation2 + $0x98] sm:$0xff] %vm762_vm0, %v3032_v5  ;;  %v4631_v5 = vld [vmem:[#allocation2 + $0xa9] sm:$0xff] }
 0x151   : > { %v1072_v24 = vpop.permute.xlu1 %1071  ;;  %1114 = vst.msk [vmem:[#allocation3 + $0x20] sm:$0xff] %vm1109_vm4, %v1070_v26  ;;  %v4636_v21 = vld [vmem:[#allocation2 + $0xaa] sm:$0xff] }
 0x152   : > { %1115 = vst.msk [vmem:[#allocation3 + $0x28] sm:$0xff] %vm1109_vm4, %v1072_v24  ;;  %2077 = vrot.lane.b32.xlu0 %v4378_v25, %s3599_s28  ;;  %v4510_v24 = vld [vmem:[#allocation2 + $0x48] sm:$0xff] }
 0x153   : > { %2079 = vrot.lane.b32.xlu1 %v4376_v23, %s3599_s28 }
 0x154   : > { %v1074_v46 = vpop.permute.xlu0 %1073 }
 0x155   : > { %v1076_v32 = vpop.permute.xlu1 %1075  ;;  %1116 = vst.msk [vmem:[#allocation3 + $0x30] sm:$0xff] %vm1109_vm4, %v1074_v46 }
 0x156   : > { %1117 = vst.msk [vmem:[#allocation3 + $0x38] sm:$0xff] %vm1109_vm4, %v1076_v32  ;;  %2173 = vrot.lane.b32.xlu0 %v4388_v33, %s3600_s24 }
 0x157   : > { %2175 = vrot.lane.b32.xlu1 %v4386_v27, %s3600_s24 }
 0x158   : > { %v1078_v53 = vpop.permute.xlu0 %1077 }
 0x159   : > { %v1080_v48 = vpop.permute.xlu1 %1079  ;;  %1118 = vst.msk [vmem:[#allocation3 + $0x40] sm:$0xff] %vm1109_vm4, %v1078_v53  ;;  %v4543_v53 = vld [vmem:[#allocation2 + $0x4a] sm:$0xff] }
 0x15a   : > { %1119 = vst.msk [vmem:[#allocation3 + $0x48] sm:$0xff] %vm1109_vm4, %v1080_v48  ;;  %2269 = vrot.lane.b32.xlu0 %v4398_v49, %s3601_s29  ;;  %v3038_v48 = vld [vmem:[%s4079_s21 + $0x20] sm:$0xff] }
 0x15b   : > { %2271 = vrot.lane.b32.xlu1 %v4396_v47, %s3601_s29 }
 0x15c   : > { %v1082_v55 = vpop.permute.xlu0 %1081 }
 0x15d   : > { %v1084_v54 = vpop.permute.xlu1 %1083  ;;  %1120 = vst.msk [vmem:[#allocation3 + $0x50] sm:$0xff] %vm1109_vm4, %v1082_v55  ;;  %v4546_v55 = vld [vmem:[#allocation2 + $0xc8] sm:$0xff] }
 0x15e   : > { %1121 = vst.msk [vmem:[#allocation3 + $0x58] sm:$0xff] %vm1109_vm4, %v1084_v54  ;;  %1361 = vrot.lane.b32.xlu0 %v4050_v41, %s3602_s18 }
 0x15f   : > { %1363 = vrot.lane.b32.xlu1 %v4048_v40, %s3602_s18 }
 0x160   : > { %v1086_v59 = vpop.permute.xlu0 %1085 }
 0x161   : > { %v1088_v57 = vpop.permute.xlu1 %1087  ;;  %1122 = vst.msk [vmem:[#allocation3 + $0x60] sm:$0xff] %vm1109_vm4, %v1086_v59 }
 0x162   : > { %1123 = vst.msk [vmem:[#allocation3 + $0x68] sm:$0xff] %vm1109_vm4, %v1088_v57  ;;  %2365 = vrot.lane.b32.xlu0 %v4418_v58, %s3602_s18 }
 0x163   : > { %2367 = vrot.lane.b32.xlu1 %v4414_v52, %s3602_s18 }
 0x164   : > { %v1090_v41 = vpop.permute.xlu0 %1089 }
 0x165   : > { %v1092_v40 = vpop.permute.xlu1 %1091  ;;  %1124 = vst.msk [vmem:[#allocation3 + $0x70] sm:$0xff] %vm1109_vm4, %v1090_v41 }
 0x166   : > { %1125 = vst.msk [vmem:[#allocation3 + $0x78] sm:$0xff] %vm1109_vm4, %v1092_v40  ;;  %1458 = vrot.lane.b32.xlu0 %v4046_v39, %s3603_s30 }
 0x167   : > { %1460 = vrot.lane.b32.xlu1 %v4030_v35, %s3603_s30 }
 0x168   : > { %v1159_v0 = vpop.permute.xlu0 %1158 }
 0x169   : > { %v1161_v62 = vpop.permute.xlu1 %1160  ;;  %1207 = vst.msk [vmem:[#allocation3] sm:$0xff] %vm1206_vm5, %v1159_v0 }
 0x16a   : > { %1208 = vst.msk [vmem:[#allocation3 + $0x8] sm:$0xff] %vm1206_vm5, %v1161_v62  ;;  %2461 = vrot.lane.b32.xlu0 %v4434_v63, %s3603_s30 }
 0x16b   : > { %2463 = vrot.lane.b32.xlu1 %v4432_v60, %s3603_s30 }
 0x16c   : > { %v1163_v39 = vpop.permute.xlu0 %1162 }
 0x16d   : > { %v1165_v35 = vpop.permute.xlu1 %1164  ;;  %1209 = vst.msk [vmem:[#allocation3 + $0x10] sm:$0xff] %vm1206_vm5, %v1163_v39 }
 0x16e   : > { %1210 = vst.msk [vmem:[#allocation3 + $0x18] sm:$0xff] %vm1206_vm5, %v1165_v35  ;;  %1555 = vrot.lane.b32.xlu0 %v4166_v8, %s3605_s10 }
 0x16f   : > { %1557 = vrot.lane.b32.xlu1 %v4164_v7, %s3605_s10  ;;  %v3036_v7 = vld [vmem:[%s3945_s15 + $0x178] sm:$0x3] }
 0x170   : > { %v1167_v12 = vpop.permute.xlu0 %1166  ;;  %1806 = vst.msk [vmem:[#allocation2 + $0xb8] sm:$0x3] %vm765_vm1, %v3036_v7 }
 0x171   : > { %v1169_v3 = vpop.permute.xlu1 %1168  ;;  %1211 = vst.msk [vmem:[#allocation3 + $0x20] sm:$0xff] %vm1206_vm5, %v1167_v12 }
 0x172   : > { %1212 = vst.msk [vmem:[#allocation3 + $0x28] sm:$0xff] %vm1206_vm5, %v1169_v3  ;;  %2557 = vrot.lane.b32.xlu0 %v4450_v9, %s3605_s10  ;;  %v1821_v3 = vld [vmem:[#allocation2] sm:$0xff] }
 0x173   : > { %2559 = vrot.lane.b32.xlu1 %v4448_v1, %s3605_s10 }
 0x174   : > { %v1171_v36 = vpop.permute.xlu0 %1170 }
 0x175   : > { %v1173_v8 = vpop.permute.xlu1 %1172  ;;  %1213 = vst.msk [vmem:[#allocation3 + $0x30] sm:$0xff] %vm1206_vm5, %v1171_v36 }
 0x176   : > { %1214 = vst.msk [vmem:[#allocation3 + $0x38] sm:$0xff] %vm1206_vm5, %v1173_v8  ;;  %1889 = vrot.lane.b32.xlu0 %v4388_v33, %s3597_s7  ;;  %v4526_v33 = vld [vmem:[#allocation2 + $0x49] sm:$0xff] }
 0x177   : > { %1891 = vrot.lane.b32.xlu1 %v4386_v27, %s3597_s7  ;;  %v4524_v27 = vld [vmem:[#allocation2 + $0x51] sm:$0xff] }
 0x178   : > { %v1175_v28 = vpop.permute.xlu0 %1174 }
 0x179   : > { %v1177_v15 = vpop.permute.xlu1 %1176  ;;  %1215 = vst.msk [vmem:[#allocation3 + $0x40] sm:$0xff] %vm1206_vm5, %v1175_v28 }
 0x17a   : > { %1216 = vst.msk [vmem:[#allocation3 + $0x48] sm:$0xff] %vm1206_vm5, %v1177_v15  ;;  %1985 = vrot.lane.b32.xlu0 %v4398_v49, %s3598_s8  ;;  %v4601_v15 = vld [vmem:[#allocation2 + $0xc0] sm:$0xff] }
 0x17b   : > { %1987 = vrot.lane.b32.xlu1 %v4396_v47, %s3598_s8  ;;  %v4540_v47 = vld [vmem:[#allocation2 + $0x52] sm:$0xff] }
 0x17c   : > { %v1179_v16 = vpop.permute.xlu0 %1178 }
 0x17d   : > { %v1181_v29 = vpop.permute.xlu1 %1180  ;;  %1217 = vst.msk [vmem:[#allocation3 + $0x50] sm:$0xff] %vm1206_vm5, %v1179_v16  ;;  %v3037_v16 = vld [vmem:[%s4079_s21 + $0x18] sm:$0xff] }
 0x17e   : > { %1218 = vst.msk [vmem:[#allocation3 + $0x58] sm:$0xff] %vm1206_vm5, %v1181_v29  ;;  %2081 = vrot.lane.b32.xlu0 %v4418_v58, %s3599_s28  ;;  %v3039_v29 = vld [vmem:[%s4079_s21 + $0x28] sm:$0x3]  ;;  %s3062_s21 = sshll.u32 %s3554_s25, 7  ;;  %s3609_s25 = smov [#allocation7]  }
 0x17f   : > { %2083 = vrot.lane.b32.xlu1 %v4414_v52, %s3599_s28 }
 0x180   : > { %v1183_v4 = vpop.permute.xlu0 %1182 }
 0x181   : > { %v1185_v2 = vpop.permute.xlu1 %1184  ;;  %1219 = vst.msk [vmem:[#allocation3 + $0x60] sm:$0xff] %vm1206_vm5, %v1183_v4  ;;  %v4614_v4 = vld [vmem:[#allocation2 + $0x68] sm:$0xff] }
 0x182   : > { %1220 = vst.msk [vmem:[#allocation3 + $0x68] sm:$0xff] %vm1206_vm5, %v1185_v2  ;;  %2177 = vrot.lane.b32.xlu0 %v4434_v63, %s3600_s24  ;;  %v796_v2 = vld [vmem:[%s4609_s19 + $0x8] sm:$0xff] }
 0x183   : > { %2179 = vrot.lane.b32.xlu1 %v4432_v60, %s3600_s24  ;;  %800 = vst.msk [vmem:[#allocation2 + $0xe0] sm:$0xff] %vm762_vm0, %v796_v2 }
 0x184   : > { %v1187_v18 = vpop.permute.xlu0 %1186 }
 0x185   : > { %v1189_v37 = vpop.permute.xlu1 %1188  ;;  %1221 = vst.msk [vmem:[#allocation3 + $0x70] sm:$0xff] %vm1206_vm5, %v1187_v18  ;;  %v4622_v18 = vld [vmem:[#allocation2 + $0x60] sm:$0xff] }
 0x186   : > { %1222 = vst.msk [vmem:[#allocation3 + $0x78] sm:$0xff] %vm1206_vm5, %v1189_v37  ;;  %2273 = vrot.lane.b32.xlu0 %v4450_v9, %s3601_s29 }
 0x187   : > { %2275 = vrot.lane.b32.xlu1 %v4448_v1, %s3601_s29 }
 0x188   : > { %v1256_v31 = vpop.permute.xlu0 %1255 }
 0x189   : > { %v1258_v30 = vpop.permute.xlu1 %1257  ;;  %1304 = vst.msk [vmem:[#allocation3] sm:$0xff] %vm1303_vm6, %v1256_v31  ;;  %v4629_v31 = vld [vmem:[#allocation2 + $0xa8] sm:$0xff] }
 0x18a   : > { %1305 = vst.msk [vmem:[#allocation3 + $0x8] sm:$0xff] %vm1303_vm6, %v1258_v30  ;;  %1365 = vrot.lane.b32.xlu0 %v4062_v43, %s3602_s18  ;;  %v4627_v30 = vld [vmem:[#allocation2 + $0xb0] sm:$0xff] }
 0x18b   : > { %1367 = vrot.lane.b32.xlu1 %v4052_v42, %s3602_s18 }
 0x18c   : > { %v1260_v26 = vpop.permute.xlu0 %1259 }
 0x18d   : > { %v1262_v6 = vpop.permute.xlu1 %1261  ;;  %1306 = vst.msk [vmem:[#allocation3 + $0x10] sm:$0xff] %vm1303_vm6, %v1260_v26  ;;  %v3034_v26 = vld [vmem:[%s3945_s15 + $0x168] sm:$0xff] }
 0x18e   : > { %1307 = vst.msk [vmem:[#allocation3 + $0x18] sm:$0xff] %vm1303_vm6, %v1262_v6  ;;  %2369 = vrot.lane.b32.xlu0 %v4510_v24, %s3602_s18  ;;  %v3035_v6 = vld [vmem:[%s3945_s15 + $0x170] sm:$0xff] }
 0x18f   : > { %2371 = vrot.lane.b32.xlu1 %v4506_v22, %s3602_s18  ;;  %1805 = vst.msk [vmem:[#allocation2 + $0xb0] sm:$0xff] %vm762_vm0, %v3035_v6  ;;  %1804 = vst.msk [vmem:[#allocation2 + $0xa8] sm:$0xff] %vm762_vm0, %v3034_v26 }
 0x190   : > { %v1264_v43 = vpop.permute.xlu0 %1263 }
 0x191   : > { %v1266_v42 = vpop.permute.xlu1 %1265  ;;  %1308 = vst.msk [vmem:[#allocation3 + $0x20] sm:$0xff] %vm1303_vm6, %v1264_v43 }
 0x192   : > { %1309 = vst.msk [vmem:[#allocation3 + $0x28] sm:$0xff] %vm1303_vm6, %v1266_v42  ;;  %1462 = vrot.lane.b32.xlu0 %v4114_v61, %s3603_s30 }
 0x193   : > { %1464 = vrot.lane.b32.xlu1 %v4088_v50, %s3603_s30 }
 0x194   : > { %v1268_v46 = vpop.permute.xlu0 %1267 }
 0x195   : > { %v1270_v32 = vpop.permute.xlu1 %1269  ;;  %1310 = vst.msk [vmem:[#allocation3 + $0x30] sm:$0xff] %vm1303_vm6, %v1268_v46  ;;  %v4651_v46 = vld [vmem:[#allocation2 + $0x69] sm:$0xff] }
 0x196   : > { %1311 = vst.msk [vmem:[#allocation3 + $0x38] sm:$0xff] %vm1303_vm6, %v1270_v32  ;;  %2465 = vrot.lane.b32.xlu0 %v4526_v33, %s3603_s30  ;;  %v797_v32 = vld [vmem:[%s4609_s19 + $0x10] sm:$0x3] }
 0x197   : > { %2467 = vrot.lane.b32.xlu1 %v4524_v27, %s3603_s30  ;;  %801 = vst.msk [vmem:[#allocation2 + $0xe8] sm:$0x3] %vm765_vm1, %v797_v32  ;;  %v4763_v32 = vld [vmem:[#allocation2 + $0x79] sm:$0xff] }
 0x198   : > { %v1272_v61 = vpop.permute.xlu0 %1271 }
 0x199   : > { %v1274_v50 = vpop.permute.xlu1 %1273  ;;  %1312 = vst.msk [vmem:[#allocation3 + $0x40] sm:$0xff] %vm1303_vm6, %v1272_v61  ;;  %v4654_v61 = vld [vmem:[#allocation2 + $0x61] sm:$0xff] }
 0x19a   : > { %1313 = vst.msk [vmem:[#allocation3 + $0x48] sm:$0xff] %vm1303_vm6, %v1274_v50  ;;  %1559 = vrot.lane.b32.xlu0 %v4176_v11, %s3605_s10  ;;  %v4555_v11 = vld [vmem:[#allocation2 + $0xca] sm:$0xff] }
 0x19b   : > { %1561 = vrot.lane.b32.xlu1 %v4173_v10, %s3605_s10  ;;  %v4553_v10 = vld [vmem:[#allocation2 + $0xc1] sm:$0xff]  ;;  %1813 = vst.msk [vmem:[#allocation2 + $0xd0] sm:$0x3] %vm765_vm1, %v3039_v29 }
 0x19c   : > { %v1276_v54 = vpop.permute.xlu0 %1275  ;;  %1812 = vst.msk [vmem:[#allocation2 + $0xc8] sm:$0xff] %vm762_vm0, %v3038_v48  ;;  %1811 = vst.msk [vmem:[#allocation2 + $0xc0] sm:$0xff] %vm762_vm0, %v3037_v16  ;;  %v4739_v16 = vld [vmem:[#allocation2 + $0x80] sm:$0xff] }
 0x19d   : > { %v1278_v49 = vpop.permute.xlu1 %1277  ;;  %1314 = vst.msk [vmem:[#allocation3 + $0x50] sm:$0xff] %vm1303_vm6, %v1276_v54 }
 0x19e   : > { %1315 = vst.msk [vmem:[#allocation3 + $0x58] sm:$0xff] %vm1303_vm6, %v1278_v49  ;;  %2561 = vrot.lane.b32.xlu0 %v4543_v53, %s3605_s10 }
 0x19f   : > { %2563 = vrot.lane.b32.xlu1 %v4540_v47, %s3605_s10 }
 0x1a0   : > { %v1280_v59 = vpop.permute.xlu0 %1279 }
 0x1a1   : > { %v1282_v57 = vpop.permute.xlu1 %1281  ;;  %1316 = vst.msk [vmem:[#allocation3 + $0x60] sm:$0xff] %vm1303_vm6, %v1280_v59  ;;  %v4677_v59 = vld [vmem:[#allocation2 + $0x62] sm:$0xff] }
 0x1a2   : > { %1317 = vst.msk [vmem:[#allocation3 + $0x68] sm:$0xff] %vm1303_vm6, %v1282_v57  ;;  %1893 = vrot.lane.b32.xlu0 %v4434_v63, %s3597_s7 }
 0x1a3   : > { %1895 = vrot.lane.b32.xlu1 %v4432_v60, %s3597_s7 }
 0x1a4   : > { %v1354_v41 = vpop.permute.xlu0 %1353 }
 0x1a5   : > { %v1356_v40 = vpop.permute.xlu1 %1355  ;;  %1402 = vst.msk [vmem:[#allocation3] sm:$0xff] %vm1401_vm7, %v1354_v41  ;;  %v4686_v41 = vld [vmem:[#allocation2 + $0xe0] sm:$0xff] }
 0x1a6   : > { %1403 = vst.msk [vmem:[#allocation3 + $0x8] sm:$0xff] %vm1401_vm7, %v1356_v40  ;;  %1989 = vrot.lane.b32.xlu0 %v4450_v9, %s3598_s8 }
 0x1a7   : > { %1991 = vrot.lane.b32.xlu1 %v4448_v1, %s3598_s8  ;;  %v1822_v1 = vld [vmem:[#allocation2 + $0x8] sm:$0xff] }
 0x1a8   : > { %v1451_v60 = vpop.permute.xlu0 %1450 }
 0x1a9   : > { %v1453_v62 = vpop.permute.xlu1 %1452  ;;  %1499 = vst.msk [vmem:[#allocation3] sm:$0xff] %vm1498_vm8, %v1451_v60  ;;  %v4690_v60 = vld [vmem:[#allocation2 + $0xe1] sm:$0xff] }
 0x1aa   : > { %1500 = vst.msk [vmem:[#allocation3 + $0x8] sm:$0xff] %vm1498_vm8, %v1453_v62  ;;  %2085 = vrot.lane.b32.xlu0 %v4510_v24, %s3599_s28 }
 0x1ab   : > { %2087 = vrot.lane.b32.xlu1 %v4506_v22, %s3599_s28 }
 0x1ac   : > { %v1548_v0 = vpop.permute.xlu0 %1547 }
 0x1ad   : > { %v1550_v63 = vpop.permute.xlu1 %1549  ;;  %1596 = vst.msk [vmem:[#allocation3] sm:$0xff] %vm1595_vm9, %v1548_v0  ;;  %v4697_v0 = vld [vmem:[#allocation2 + $0xe2] sm:$0xff] }
 0x1ae   : > { %1597 = vst.msk [vmem:[#allocation3 + $0x8] sm:$0xff] %vm1595_vm9, %v1550_v63  ;;  %2181 = vrot.lane.b32.xlu0 %v4526_v33, %s3600_s24 }
 0x1af   : > { %2183 = vrot.lane.b32.xlu1 %v4524_v27, %s3600_s24 }
 0x1b0   : > { %v1358_v39 = vpop.permute.xlu0 %1357 }
 0x1b1   : > { %v1360_v35 = vpop.permute.xlu1 %1359  ;;  %1404 = vst.msk [vmem:[#allocation3 + $0x10] sm:$0xff] %vm1401_vm7, %v1358_v39 }
 0x1b2   : > { %1405 = vst.msk [vmem:[#allocation3 + $0x18] sm:$0xff] %vm1401_vm7, %v1360_v35  ;;  %2277 = vrot.lane.b32.xlu0 %v4543_v53, %s3601_s29  ;;  %v3042_v35 = vld [vmem:[%s4609_s19 + $0x28] sm:$0x3] }
 0x1b3   : > { %2279 = vrot.lane.b32.xlu1 %v4540_v47, %s3601_s29  ;;  %1820 = vst.msk [vmem:[#allocation2 + $0xe8] sm:$0x3] %vm765_vm1, %v3042_v35 }
 0x1b4   : > { %v1455_v7 = vpop.permute.xlu0 %1454  ;;  %v1613_v8 = vld [vmem:[#allocation3] sm:$0xff] }
 0x1b5   : > { %v1457_v9 = vpop.permute.xlu1 %1456  ;;  %v1614_v12 = vld [vmem:[#allocation3 + $0x8] sm:$0xff]  ;;  %1501 = vst.msk [vmem:[#allocation3 + $0x10] sm:$0xff] %vm1498_vm8, %v1455_v7 }
 0x1b6   : > { %1502 = vst.msk [vmem:[#allocation3 + $0x18] sm:$0xff] %vm1498_vm8, %v1457_v9  ;;  %v3178_v28 = vpack.c.bf16 %v1614_v12, %v1613_v8  ;;  %1369 = vrot.lane.b32.xlu0 %v4066_v45, %s3602_s18 }
 0x1b7   : > { %1838 = vst.msk [vmem:[#allocation3 + $0x8] sm:$0xff] %vm762_vm0, %v1822_v1  ;;  %1371 = vrot.lane.b32.xlu1 %v4064_v44, %s3602_s18  ;;  %1837 = vst.msk [vmem:[#allocation3] sm:$0xff] %vm762_vm0, %v1821_v3  ;;  %v795_v44 = vld [vmem:[%s4609_s19] sm:$0xff]  ;;  %v3040_v1 = vld [vmem:[%s4609_s19 + $0x18] sm:$0xff] }
 0x1b8   : > { %3180 = vmatpush3.bf16.xpose.msk.msra.mxu0 %vm4596_vm11, %v3178_v28  ;;  %799 = vst.msk [vmem:[#allocation2 + $0xd8] sm:$0xff] %vm762_vm0, %v795_v44  ;;  %v1552_v45 = vpop.permute.xlu0 %1551  ;;  %v3041_v3 = vld [vmem:[%s4609_s19 + $0x20] sm:$0xff]  ;;  %v4741_v44 = vld [vmem:[#allocation2 + $0x78] sm:$0xff] }
 0x1b9   : > { %v1554_v37 = vpop.permute.xlu1 %1553  ;;  %3181 = vmatprep.subr.bf16.mxu0 %v3604_v34  ;;  %1598 = vst.msk [vmem:[#allocation3 + $0x10] sm:$0xff] %vm1595_vm9, %v1552_v45 }
 0x1ba   : > { %1599 = vst.msk [vmem:[#allocation3 + $0x18] sm:$0xff] %vm1595_vm9, %v1554_v37  ;;  %2373 = vrot.lane.b32.xlu0 %v4622_v18, %s3602_s18 }
 0x1bb   : > { %2375 = vrot.lane.b32.xlu1 %v4614_v4, %s3602_s18 }
 0x1bc   : > { %v1886_v43 = vpop.permute.xlu0 %1885 }
 0x1bd   : > { %v1888_v42 = vpop.permute.xlu1 %1887  ;;  %1933 = vst.msk [vmem:[#allocation3] sm:$0xff] %vm914_vm2, %v1886_v43 }
 0x1be   : > { %1934 = vst.msk [vmem:[#allocation3 + $0x8] sm:$0xff] %vm914_vm2, %v1888_v42  ;;  %1466 = vrot.lane.b32.xlu0 %v4495_v19, %s3603_s30  ;;  %v4759_v42 = vld [vmem:[#allocation2 + $0x81] sm:$0xff] }
 0x1bf   : > { %1468 = vrot.lane.b32.xlu1 %v4360_v38, %s3603_s30  ;;  %v4688_v62 = vld [vmem:[#allocation2 + $0xd8] sm:$0xff] }
 0x1c0   : > { %v1982_v49 = vpop.permute.xlu0 %1981  ;;  %v1615_v54 = vld [vmem:[#allocation3 + $0x10] sm:$0xff] }
 0x1c1   : > { %v1984_v50 = vpop.permute.xlu1 %1983  ;;  %v1616_v48 = vld [vmem:[#allocation3 + $0x18] sm:$0xff]  ;;  %2029 = vst.msk [vmem:[#allocation3] sm:$0xff] %vm1011_vm3, %v1982_v49  ;;  %v4695_v63 = vld [vmem:[#allocation2 + $0xd9] sm:$0xff] }
 0x1c2   : > { %2030 = vst.msk [vmem:[#allocation3 + $0x8] sm:$0xff] %vm1011_vm3, %v1984_v50  ;;  %v3182_v38 = vpack.c.bf16 %v1616_v48, %v1615_v54  ;;  %2469 = vrot.lane.b32.xlu0 %v4654_v61, %s3603_s30  ;;  %v4703_v39 = vld [vmem:[#allocation2 + $0xda] sm:$0xff]  ;;  %v4781_v49 = vld [vmem:[#allocation2 + $0x82] sm:$0xff] }
 0x1c3   : > { %1840 = vst.msk [vmem:[#allocation3 + $0x18] sm:$0xff] %vm762_vm0, %v4376_v23  ;;  %2471 = vrot.lane.b32.xlu1 %v4651_v46, %s3603_s30  ;;  %1839 = vst.msk [vmem:[#allocation3 + $0x10] sm:$0xff] %vm762_vm0, %v4378_v25  ;;  %v4675_v23 = vld [vmem:[#allocation2 + $0x6a] sm:$0xff] }
 0x1c4   : > { %3184 = vmatpush3.bf16.xpose.msk.msra.mxu0 %vm4596_vm11, %v3182_v38  ;;  %v2078_v57 = vpop.permute.xlu0 %2077  ;;  %1818 = vst.msk [vmem:[#allocation2 + $0xd8] sm:$0xff] %vm762_vm0, %v3040_v1  ;;  %1819 = vst.msk [vmem:[#allocation2 + $0xe0] sm:$0xff] %vm762_vm0, %v3041_v3  ;;  %v4783_v38 = vld [vmem:[#allocation2 + $0x7a] sm:$0xff] }
 0x1c5   : > { %v2080_v19 = vpop.permute.xlu1 %2079  ;;  %3185 = vmatprep.subr.bf16.mxu0 %v3604_v34  ;;  %2125 = vst.msk [vmem:[#allocation3] sm:$0xff] %vm1109_vm4, %v2078_v57  ;;  %v4827_v1 = vld [vmem:[#allocation2 + $0x98] sm:$0xff] }
 0x1c6   : > { %2126 = vst.msk [vmem:[#allocation3 + $0x8] sm:$0xff] %vm1109_vm4, %v2080_v19  ;;  %1563 = vrot.lane.b32.xlu0 %v4500_v20, %s3605_s10 }
 0x1c7   : > { %1565 = vrot.lane.b32.xlu1 %v4362_v17, %s3605_s10 }
 0x1c8   : > { %v2174_v40 = vpop.permute.xlu0 %2173 }
 0x1c9   : > { %v2176_v25 = vpop.permute.xlu1 %2175  ;;  %2221 = vst.msk [vmem:[#allocation3] sm:$0xff] %vm1206_vm5, %v2174_v40 }
 0x1ca   : > { %2222 = vst.msk [vmem:[#allocation3 + $0x8] sm:$0xff] %vm1206_vm5, %v2176_v25  ;;  %2565 = vrot.lane.b32.xlu0 %v4677_v59, %s3605_s10 }
 0x1cb   : > { %2567 = vrot.lane.b32.xlu1 %v4675_v23, %s3605_s10 }
 0x1cc   : > { %v2270_v20 = vpop.permute.xlu0 %2269 }
 0x1cd   : > { %v2272_v17 = vpop.permute.xlu1 %2271  ;;  %2317 = vst.msk [vmem:[#allocation3] sm:$0xff] %vm1303_vm6, %v2270_v20 }
 0x1ce   : > { %2318 = vst.msk [vmem:[#allocation3 + $0x8] sm:$0xff] %vm1303_vm6, %v2272_v17  ;;  %1897 = vrot.lane.b32.xlu0 %v4526_v33, %s3597_s7 }
 0x1cf   : > { %1899 = vrot.lane.b32.xlu1 %v4524_v27, %s3597_s7 }
 0x1d0   : > { %v1362_v27 = vpop.permute.xlu0 %1361 }
 0x1d1   : > { %v1364_v9 = vpop.permute.xlu1 %1363  ;;  %1406 = vst.msk [vmem:[#allocation3 + $0x20] sm:$0xff] %vm1401_vm7, %v1362_v27 }
 0x1d2   : > { %1407 = vst.msk [vmem:[#allocation3 + $0x28] sm:$0xff] %vm1401_vm7, %v1364_v9  ;;  %1993 = vrot.lane.b32.xlu0 %v4543_v53, %s3598_s8  ;;  %v4829_v9 = vld [vmem:[#allocation2 + $0x90] sm:$0xff] }
 0x1d3   : > { %1995 = vrot.lane.b32.xlu1 %v4540_v47, %s3598_s8 }
 0x1d4   : > { %v2366_v12 = vpop.permute.xlu0 %2365 }
 0x1d5   : > { %v2368_v33 = vpop.permute.xlu1 %2367  ;;  %2413 = vst.msk [vmem:[#allocation3] sm:$0xff] %vm1401_vm7, %v2366_v12 }
 0x1d6   : > { %2414 = vst.msk [vmem:[#allocation3 + $0x8] sm:$0xff] %vm1401_vm7, %v2368_v33  ;;  %2089 = vrot.lane.b32.xlu0 %v4622_v18, %s3599_s28 }
 0x1d7   : > { %2091 = vrot.lane.b32.xlu1 %v4614_v4, %s3599_s28 }
 0x1d8   : > { %v1459_v8 = vpop.permute.xlu0 %1458 }
 0x1d9   : > { %v1461_v7 = vpop.permute.xlu1 %1460  ;;  %1503 = vst.msk [vmem:[#allocation3 + $0x20] sm:$0xff] %vm1498_vm8, %v1459_v8  ;;  %v4847_v8 = vld [vmem:[#allocation2 + $0x99] sm:$0xff] }
 0x1da   : > { %1504 = vst.msk [vmem:[#allocation3 + $0x28] sm:$0xff] %vm1498_vm8, %v1461_v7  ;;  %2185 = vrot.lane.b32.xlu0 %v4654_v61, %s3600_s24 }
 0x1db   : > { %2187 = vrot.lane.b32.xlu1 %v4651_v46, %s3600_s24 }
 0x1dc   : > { %v2462_v53 = vpop.permute.xlu0 %2461 }
 0x1dd   : > { %v2464_v47 = vpop.permute.xlu1 %2463  ;;  %2509 = vst.msk [vmem:[#allocation3] sm:$0xff] %vm1498_vm8, %v2462_v53  ;;  %v4851_v53 = vld [vmem:[#allocation2 + $0x91] sm:$0xff] }
 0x1de   : > { %2510 = vst.msk [vmem:[#allocation3 + $0x8] sm:$0xff] %vm1498_vm8, %v2464_v47  ;;  %2281 = vrot.lane.b32.xlu0 %v4677_v59, %s3601_s29 }
 0x1df   : > { %2283 = vrot.lane.b32.xlu1 %v4675_v23, %s3601_s29 }
 0x1e0   : > { %v1556_v29 = vpop.permute.xlu0 %1555 }
 0x1e1   : > { %v1558_v28 = vpop.permute.xlu1 %1557  ;;  %1600 = vst.msk [vmem:[#allocation3 + $0x20] sm:$0xff] %vm1595_vm9, %v1556_v29 }
 0x1e2   : > { %1601 = vst.msk [vmem:[#allocation3 + $0x28] sm:$0xff] %vm1595_vm9, %v1558_v28  ;;  %1373 = vrot.lane.b32.xlu0 %v4629_v31, %s3602_s18 }
 0x1e3   : > { %1375 = vrot.lane.b32.xlu1 %v4627_v30, %s3602_s18 }
 0x1e4   : > { %v2558_v37 = vpop.permute.xlu0 %2557 }
 0x1e5   : > { %v2560_v2 = vpop.permute.xlu1 %2559  ;;  %2605 = vst.msk [vmem:[#allocation3] sm:$0xff] %vm1595_vm9, %v2558_v37 }
 0x1e6   : > { %2606 = vst.msk [vmem:[#allocation3 + $0x8] sm:$0xff] %vm1595_vm9, %v2560_v2  ;;  %2377 = vrot.lane.b32.xlu0 %v4741_v44, %s3602_s18  ;;  %v4869_v2 = vld [vmem:[#allocation2 + $0x9a] sm:$0xff] }
 0x1e7   : > { %2379 = vrot.lane.b32.xlu1 %v4739_v16, %s3602_s18 }
 0x1e8   : > { %v1890_v31 = vpop.permute.xlu0 %1889  ;;  %v1617_v6 = vld [vmem:[#allocation3 + $0x20] sm:$0xff] }
 0x1e9   : > { %v1892_v45 = vpop.permute.xlu1 %1891  ;;  %v1618_v30 = vld [vmem:[#allocation3 + $0x28] sm:$0xff]  ;;  %1935 = vst.msk [vmem:[#allocation3 + $0x10] sm:$0xff] %vm914_vm2, %v1890_v31 }
 0x1ea   : > { %1936 = vst.msk [vmem:[#allocation3 + $0x18] sm:$0xff] %vm914_vm2, %v1892_v45  ;;  %v3186_v26 = vpack.c.bf16 %v1618_v30, %v1617_v6  ;;  %1470 = vrot.lane.b32.xlu0 %v4631_v5, %s3603_s30  ;;  %v4871_v45 = vld [vmem:[#allocation2 + $0x92] sm:$0xff] }
 0x1eb   : > { %1842 = vst.msk [vmem:[#allocation3 + $0x28] sm:$0xff] %vm762_vm0, %v4414_v52  ;;  %1472 = vrot.lane.b32.xlu1 %v4456_v13, %s3603_s30  ;;  %1841 = vst.msk [vmem:[#allocation3 + $0x20] sm:$0xff] %vm762_vm0, %v4418_v58 }
 0x1ec   : > { %3188 = vmatpush3.bf16.xpose.msk.msra.mxu0 %vm4596_vm11, %v3186_v26  ;;  %v1986_v50 = vpop.permute.xlu0 %1985  ;;  %v2622_v13 = vld [vmem:[#allocation3] sm:$0xff] }
 0x1ed   : > { %v1988_v43 = vpop.permute.xlu1 %1987  ;;  %v2623_v52 = vld [vmem:[#allocation3 + $0x8] sm:$0xff]  ;;  %3189 = vmatprep.subr.bf16.mxu0 %v3604_v34  ;;  %2031 = vst.msk [vmem:[#allocation3 + $0x10] sm:$0xff] %vm1011_vm3, %v1986_v50 }
 0x1ee   : > { %2032 = vst.msk [vmem:[#allocation3 + $0x18] sm:$0xff] %vm1011_vm3, %v1988_v43  ;;  %v3210_v58 = vpack.c.bf16 %v2623_v52, %v2622_v13  ;;  %2473 = vrot.lane.b32.xlu0 %v4763_v32, %s3603_s30 }
 0x1ef   : > { %2475 = vrot.lane.b32.xlu1 %v4759_v42, %s3603_s30 }
 0x1f0   : > { %3212 = vmatpush3.bf16.xpose.msk.msra.mxu1 %vm4596_vm11, %v3210_v58  ;;  %v2082_v48 = vpop.permute.xlu0 %2081 }
 0x1f1   : > { %v2084_v5 = vpop.permute.xlu1 %2083  ;;  %3213 = vmatprep.subr.bf16.mxu1 %v3604_v34  ;;  %2127 = vst.msk [vmem:[#allocation3 + $0x10] sm:$0xff] %vm1109_vm4, %v2082_v48 }
 0x1f2   : > { %2128 = vst.msk [vmem:[#allocation3 + $0x18] sm:$0xff] %vm1109_vm4, %v2084_v5  ;;  %1567 = vrot.lane.b32.xlu0 %v4636_v21, %s3605_s10 }
 0x1f3   : > { %1569 = vrot.lane.b32.xlu1 %v4458_v14, %s3605_s10 }
 0x1f4   : > { %v2178_v19 = vpop.permute.xlu0 %2177 }
 0x1f5   : > { %v2180_v54 = vpop.permute.xlu1 %2179  ;;  %2223 = vst.msk [vmem:[#allocation3 + $0x10] sm:$0xff] %vm1206_vm5, %v2178_v19 }
 0x1f6   : > { %2224 = vst.msk [vmem:[#allocation3 + $0x18] sm:$0xff] %vm1206_vm5, %v2180_v54  ;;  %2569 = vrot.lane.b32.xlu0 %v4783_v38, %s3605_s10 }
 0x1f7   : > { %2571 = vrot.lane.b32.xlu1 %v4781_v49, %s3605_s10 }
 0x1f8   : > { %v2274_v21 = vpop.permute.xlu0 %2273 }
 0x1f9   : > { %v2276_v14 = vpop.permute.xlu1 %2275  ;;  %2319 = vst.msk [vmem:[#allocation3 + $0x10] sm:$0xff] %vm1303_vm6, %v2274_v21 }
 0x1fa   : > { %2320 = vst.msk [vmem:[#allocation3 + $0x18] sm:$0xff] %vm1303_vm6, %v2276_v14  ;;  %1901 = vrot.lane.b32.xlu0 %v4654_v61, %s3597_s7 }
 0x1fb   : > { %1903 = vrot.lane.b32.xlu1 %v4651_v46, %s3597_s7 }
 0x1fc   : > { %v1366_v25 = vpop.permute.xlu0 %1365 }
 0x1fd   : > { %v1368_v57 = vpop.permute.xlu1 %1367  ;;  %1408 = vst.msk [vmem:[#allocation3 + $0x30] sm:$0xff] %vm1401_vm7, %v1366_v25 }
 0x1fe   : > { %1409 = vst.msk [vmem:[#allocation3 + $0x38] sm:$0xff] %vm1401_vm7, %v1368_v57  ;;  %1997 = vrot.lane.b32.xlu0 %v4677_v59, %s3598_s8 }
 0x1ff   : > { %1999 = vrot.lane.b32.xlu1 %v4675_v23, %s3598_s8 }
 0x200   : > { %v2370_v17 = vpop.permute.xlu0 %2369 }
 0x201   : > { %v2372_v40 = vpop.permute.xlu1 %2371  ;;  %2415 = vst.msk [vmem:[#allocation3 + $0x10] sm:$0xff] %vm1401_vm7, %v2370_v17 }
 0x202   : > { %2416 = vst.msk [vmem:[#allocation3 + $0x18] sm:$0xff] %vm1401_vm7, %v2372_v40  ;;  %2093 = vrot.lane.b32.xlu0 %v4741_v44, %s3599_s28  ;;  %v4944_v40 = vld [vmem:[#allocation2 + $0xb1] sm:$0xff] }
 0x203   : > { %2095 = vrot.lane.b32.xlu1 %v4739_v16, %s3599_s28 }
 0x204   : > { %v1463_v61 = vpop.permute.xlu0 %1462 }
 0x205   : > { %v1465_v46 = vpop.permute.xlu1 %1464  ;;  %1505 = vst.msk [vmem:[#allocation3 + $0x30] sm:$0xff] %vm1498_vm8, %v1463_v61 }
 0x206   : > { %1506 = vst.msk [vmem:[#allocation3 + $0x38] sm:$0xff] %vm1498_vm8, %v1465_v46  ;;  %2189 = vrot.lane.b32.xlu0 %v4763_v32, %s3600_s24  ;;  %v4948_v46 = vld [vmem:[#allocation2 + $0xa9] sm:$0xff] }
 0x207   : > { %2191 = vrot.lane.b32.xlu1 %v4759_v42, %s3600_s24 }
 0x208   : > { %v2466_v59 = vpop.permute.xlu0 %2465 }
 0x209   : > { %v2468_v23 = vpop.permute.xlu1 %2467  ;;  %2511 = vst.msk [vmem:[#allocation3 + $0x10] sm:$0xff] %vm1498_vm8, %v2466_v59 }
 0x20a   : > { %2512 = vst.msk [vmem:[#allocation3 + $0x18] sm:$0xff] %vm1498_vm8, %v2468_v23  ;;  %2285 = vrot.lane.b32.xlu0 %v4783_v38, %s3601_s29  ;;  %v4963_v23 = vld [vmem:[#allocation2 + $0xb2] sm:$0xff] }
 0x20b   : > { %2287 = vrot.lane.b32.xlu1 %v4781_v49, %s3601_s29 }
 0x20c   : > { %v1560_v35 = vpop.permute.xlu0 %1559 }
 0x20d   : > { %v1562_v20 = vpop.permute.xlu1 %1561  ;;  %1602 = vst.msk [vmem:[#allocation3 + $0x30] sm:$0xff] %vm1595_vm9, %v1560_v35 }
 0x20e   : > { %1603 = vst.msk [vmem:[#allocation3 + $0x38] sm:$0xff] %vm1595_vm9, %v1562_v20  ;;  %1377 = vrot.lane.b32.xlu0 %v4601_v15, %s3602_s18  ;;  %v4965_v20 = vld [vmem:[#allocation2 + $0xaa] sm:$0xff] }
 0x20f   : > { %1379 = vrot.lane.b32.xlu1 %v4546_v55, %s3602_s18 }
 0x210   : > { %v2562_v27 = vpop.permute.xlu0 %2561 }
 0x211   : > { %v2564_v3 = vpop.permute.xlu1 %2563  ;;  %2607 = vst.msk [vmem:[#allocation3 + $0x10] sm:$0xff] %vm1595_vm9, %v2562_v27 }
 0x212   : > { %2608 = vst.msk [vmem:[#allocation3 + $0x18] sm:$0xff] %vm1595_vm9, %v2564_v3  ;;  %2381 = vrot.lane.b32.xlu0 %v4829_v9, %s3602_s18 }
 0x213   : > { %2383 = vrot.lane.b32.xlu1 %v4827_v1, %s3602_s18 }
 0x214   : > { %v1894_v15 = vpop.permute.xlu0 %1893  ;;  %v1619_v12 = vld [vmem:[#allocation3 + $0x30] sm:$0xff] }
 0x215   : > { %v1896_v55 = vpop.permute.xlu1 %1895  ;;  %v1620_v33 = vld [vmem:[#allocation3 + $0x38] sm:$0xff]  ;;  %1937 = vst.msk [vmem:[#allocation3 + $0x20] sm:$0xff] %vm914_vm2, %v1894_v15 }
 0x216   : > { %1938 = vst.msk [vmem:[#allocation3 + $0x28] sm:$0xff] %vm914_vm2, %v1896_v55  ;;  %v3190_v7 = vpack.c.bf16 %v1620_v33, %v1619_v12  ;;  %1474 = vrot.lane.b32.xlu0 %v4553_v10, %s3603_s30 }
 0x217   : > { %1844 = vst.msk [vmem:[#allocation3 + $0x38] sm:$0xff] %vm762_vm0, %v4506_v22  ;;  %1476 = vrot.lane.b32.xlu1 %v4548_v56, %s3603_s30  ;;  %1843 = vst.msk [vmem:[#allocation3 + $0x30] sm:$0xff] %vm762_vm0, %v4510_v24 }
 0x218   : > { %3192 = vmatpush3.bf16.xpose.msk.msra.mxu0 %vm4596_vm11, %v3190_v7  ;;  %v1990_v28 = vpop.permute.xlu0 %1989  ;;  %v2624_v56 = vld [vmem:[#allocation3 + $0x10] sm:$0xff] }
 0x219   : > { %v1992_v47 = vpop.permute.xlu1 %1991  ;;  %v2625_v22 = vld [vmem:[#allocation3 + $0x18] sm:$0xff]  ;;  %3193 = vmatprep.subr.bf16.mxu0 %v3604_v34  ;;  %2033 = vst.msk [vmem:[#allocation3 + $0x20] sm:$0xff] %vm1011_vm3, %v1990_v28 }
 0x21a   : > { %2034 = vst.msk [vmem:[#allocation3 + $0x28] sm:$0xff] %vm1011_vm3, %v1992_v47  ;;  %v3214_v24 = vpack.c.bf16 %v2625_v22, %v2624_v56  ;;  %2477 = vrot.lane.b32.xlu0 %v4851_v53, %s3603_s30  ;;  %v2346_v47 = vld [vmem:[#allocation2 + $0xc8] sm:$0xff]  ;;  %v2345_v22 = vld [vmem:[#allocation2 + $0xc0] sm:$0xff] }
 0x21b   : > { %2479 = vrot.lane.b32.xlu1 %v4847_v8, %s3603_s30  ;;  %v2442_v56 = vld [vmem:[#allocation2 + $0xc9] sm:$0xff] }
 0x21c   : > { %3216 = vmatpush3.bf16.xpose.msk.msra.mxu1 %vm4596_vm11, %v3214_v24  ;;  %v2086_v29 = vpop.permute.xlu0 %2085 }
 0x21d   : > { %v2088_v10 = vpop.permute.xlu1 %2087  ;;  %3217 = vmatprep.subr.bf16.mxu1 %v3604_v34  ;;  %2129 = vst.msk [vmem:[#allocation3 + $0x20] sm:$0xff] %vm1109_vm4, %v2086_v29 }
 0x21e   : > { %2130 = vst.msk [vmem:[#allocation3 + $0x28] sm:$0xff] %vm1109_vm4, %v2088_v10  ;;  %1571 = vrot.lane.b32.xlu0 %v4557_v51, %s3605_s10  ;;  %v2441_v10 = vld [vmem:[#allocation2 + $0xc1] sm:$0xff] }
 0x21f   : > { %1573 = vrot.lane.b32.xlu1 %v4555_v11, %s3605_s10 }
 0x220   : > { %v2182_v30 = vpop.permute.xlu0 %2181 }
 0x221   : > { %v2184_v37 = vpop.permute.xlu1 %2183  ;;  %2225 = vst.msk [vmem:[#allocation3 + $0x20] sm:$0xff] %vm1206_vm5, %v2182_v30  ;;  %v2538_v30 = vld [vmem:[#allocation2 + $0xca] sm:$0xff] }
 0x222   : > { %2226 = vst.msk [vmem:[#allocation3 + $0x28] sm:$0xff] %vm1206_vm5, %v2184_v37  ;;  %2573 = vrot.lane.b32.xlu0 %v4871_v45, %s3605_s10 }
 0x223   : > { %2575 = vrot.lane.b32.xlu1 %v4869_v2, %s3605_s10 }
 0x224   : > { %v2278_v6 = vpop.permute.xlu0 %2277 }
 0x225   : > { %v2280_v31 = vpop.permute.xlu1 %2279  ;;  %2321 = vst.msk [vmem:[#allocation3 + $0x20] sm:$0xff] %vm1303_vm6, %v2278_v6  ;;  %v2537_v6 = vld [vmem:[#allocation2 + $0xc2] sm:$0xff] }
 0x226   : > { %2322 = vst.msk [vmem:[#allocation3 + $0x28] sm:$0xff] %vm1303_vm6, %v2280_v31  ;;  %1905 = vrot.lane.b32.xlu0 %v4763_v32, %s3597_s7 }
 0x227   : > { %1907 = vrot.lane.b32.xlu1 %v4759_v42, %s3597_s7 }
 0x228   : > { %v1370_v43 = vpop.permute.xlu0 %1369 }
 0x229   : > { %v1372_v26 = vpop.permute.xlu1 %1371  ;;  %1410 = vst.msk [vmem:[#allocation3 + $0x40] sm:$0xff] %vm1401_vm7, %v1370_v43 }
 0x22a   : > { %1411 = vst.msk [vmem:[#allocation3 + $0x48] sm:$0xff] %vm1401_vm7, %v1372_v26  ;;  %2001 = vrot.lane.b32.xlu0 %v4783_v38, %s3598_s8  ;;  %v4923_v38 = vld [vmem:[#allocation2 + $0xa8] sm:$0xff] }
 0x22b   : > { %2003 = vrot.lane.b32.xlu1 %v4781_v49, %s3598_s8 }
 0x22c   : > { %v2374_v50 = vpop.permute.xlu0 %2373 }
 0x22d   : > { %v2376_v52 = vpop.permute.xlu1 %2375  ;;  %2417 = vst.msk [vmem:[#allocation3 + $0x20] sm:$0xff] %vm1401_vm7, %v2374_v50 }
 0x22e   : > { %2418 = vst.msk [vmem:[#allocation3 + $0x28] sm:$0xff] %vm1401_vm7, %v2376_v52  ;;  %2097 = vrot.lane.b32.xlu0 %v4829_v9, %s3599_s28 }
 0x22f   : > { %2099 = vrot.lane.b32.xlu1 %v4827_v1, %s3599_s28 }
 0x230   : > { %v1467_v32 = vpop.permute.xlu0 %1466 }
 0x231   : > { %v1469_v42 = vpop.permute.xlu1 %1468  ;;  %1507 = vst.msk [vmem:[#allocation3 + $0x40] sm:$0xff] %vm1498_vm8, %v1467_v32 }
 0x232   : > { %1508 = vst.msk [vmem:[#allocation3 + $0x48] sm:$0xff] %vm1498_vm8, %v1469_v42  ;;  %2193 = vrot.lane.b32.xlu0 %v4851_v53, %s3600_s24 }
 0x233   : > { %2195 = vrot.lane.b32.xlu1 %v4847_v8, %s3600_s24 }
 0x234   : > { %v2470_v58 = vpop.permute.xlu0 %2469 }
 0x235   : > { %v2472_v13 = vpop.permute.xlu1 %2471  ;;  %2513 = vst.msk [vmem:[#allocation3 + $0x20] sm:$0xff] %vm1498_vm8, %v2470_v58 }
 0x236   : > { %2514 = vst.msk [vmem:[#allocation3 + $0x28] sm:$0xff] %vm1498_vm8, %v2472_v13  ;;  %1283 = vrot.lane.b32.xlu0 %v4557_v51, %s3601_s29 }
 0x237   : > { %1285 = vrot.lane.b32.xlu1 %v4555_v11, %s3601_s29  ;;  %v4921_v11 = vld [vmem:[#allocation2 + $0xb0] sm:$0xff] }
 0x238   : > { %v1564_v48 = vpop.permute.xlu0 %1563 }
 0x239   : > { %v1566_v5 = vpop.permute.xlu1 %1565  ;;  %1604 = vst.msk [vmem:[#allocation3 + $0x40] sm:$0xff] %vm1595_vm9, %v1564_v48 }
 0x23a   : > { %1605 = vst.msk [vmem:[#allocation3 + $0x48] sm:$0xff] %vm1595_vm9, %v1566_v5  ;;  %2289 = vrot.lane.b32.xlu0 %v4871_v45, %s3601_s29 }
 0x23b   : > { %2291 = vrot.lane.b32.xlu1 %v4869_v2, %s3601_s29 }
 0x23c   : > { %v2566_v54 = vpop.permute.xlu0 %2565 }
 0x23d   : > { %v2568_v49 = vpop.permute.xlu1 %2567  ;;  %2609 = vst.msk [vmem:[#allocation3 + $0x20] sm:$0xff] %vm1595_vm9, %v2566_v54 }
 0x23e   : > { %2610 = vst.msk [vmem:[#allocation3 + $0x28] sm:$0xff] %vm1595_vm9, %v2568_v49  ;;  %1381 = vrot.lane.b32.xlu0 %v4688_v62, %s3602_s18 }
 0x23f   : > { %1383 = vrot.lane.b32.xlu1 %v4686_v41, %s3602_s18 }
 0x240   : > { %v1898_v14 = vpop.permute.xlu0 %1897  ;;  %v1621_v21 = vld [vmem:[#allocation3 + $0x40] sm:$0xff] }
 0x241   : > { %v1900_v51 = vpop.permute.xlu1 %1899  ;;  %v1622_v19 = vld [vmem:[#allocation3 + $0x48] sm:$0xff]  ;;  %1939 = vst.msk [vmem:[#allocation3 + $0x30] sm:$0xff] %vm914_vm2, %v1898_v14 }
 0x242   : > { %1940 = vst.msk [vmem:[#allocation3 + $0x38] sm:$0xff] %vm914_vm2, %v1900_v51  ;;  %v3194_v41 = vpack.c.bf16 %v1622_v19, %v1621_v21  ;;  %2385 = vrot.lane.b32.xlu0 %v4923_v38, %s3602_s18  ;;  %v2348_v51 = vld [vmem:[#allocation2 + $0xe0] sm:$0xff]  ;;  %v2347_v14 = vld [vmem:[#allocation2 + $0xd8] sm:$0xff] }
 0x243   : > { %1846 = vst.msk [vmem:[#allocation3 + $0x48] sm:$0xff] %vm762_vm0, %v4614_v4  ;;  %2387 = vrot.lane.b32.xlu1 %v4921_v11, %s3602_s18  ;;  %1845 = vst.msk [vmem:[#allocation3 + $0x40] sm:$0xff] %vm762_vm0, %v4622_v18 }
 0x244   : > { %3196 = vmatpush3.bf16.xpose.msk.msra.mxu0 %vm4596_vm11, %v3194_v41  ;;  %v1994_v4 = vpop.permute.xlu0 %1993  ;;  %v2626_v25 = vld [vmem:[#allocation3 + $0x20] sm:$0xff]  ;;  %v2444_v41 = vld [vmem:[#allocation2 + $0xe1] sm:$0xff] }
 0x245   : > { %v1996_v62 = vpop.permute.xlu1 %1995  ;;  %v2627_v57 = vld [vmem:[#allocation3 + $0x28] sm:$0xff]  ;;  %3197 = vmatprep.subr.bf16.mxu0 %v3604_v34  ;;  %2035 = vst.msk [vmem:[#allocation3 + $0x30] sm:$0xff] %vm1011_vm3, %v1994_v4 }
 0x246   : > { %2036 = vst.msk [vmem:[#allocation3 + $0x38] sm:$0xff] %vm1011_vm3, %v1996_v62  ;;  %v3218_v18 = vpack.c.bf16 %v2627_v57, %v2626_v25  ;;  %1478 = vrot.lane.b32.xlu0 %v4695_v63, %s3603_s30  ;;  %v2443_v57 = vld [vmem:[#allocation2 + $0xd9] sm:$0xff]  ;;  %v2540_v25 = vld [vmem:[#allocation2 + $0xe2] sm:$0xff] }
 0x247   : > { %1480 = vrot.lane.b32.xlu1 %v4690_v60, %s3603_s30 }
 0x248   : > { %3220 = vmatpush3.bf16.xpose.msk.msra.mxu1 %vm4596_vm11, %v3218_v18  ;;  %v2090_v61 = vpop.permute.xlu0 %2089 }
 0x249   : > { %v2092_v17 = vpop.permute.xlu1 %2091  ;;  %3221 = vmatprep.subr.bf16.mxu1 %v3604_v34  ;;  %2131 = vst.msk [vmem:[#allocation3 + $0x30] sm:$0xff] %vm1109_vm4, %v2090_v61 }
 0x24a   : > { %2132 = vst.msk [vmem:[#allocation3 + $0x38] sm:$0xff] %vm1109_vm4, %v2092_v17  ;;  %2481 = vrot.lane.b32.xlu0 %v4948_v46, %s3603_s30 }
 0x24b   : > { %2483 = vrot.lane.b32.xlu1 %v4944_v40, %s3603_s30 }
 0x24c   : > { %v2186_v63 = vpop.permute.xlu0 %2185 }
 0x24d   : > { %v2188_v60 = vpop.permute.xlu1 %2187  ;;  %2227 = vst.msk [vmem:[#allocation3 + $0x30] sm:$0xff] %vm1206_vm5, %v2186_v63  ;;  %v2638_v63 = vld [vmem:[%s5228_s4] sm:$0xff] }
 0x24e   : > { %2228 = vst.msk [vmem:[#allocation3 + $0x38] sm:$0xff] %vm1206_vm5, %v2188_v60  ;;  %1575 = vrot.lane.b32.xlu0 %v4703_v39, %s3605_s10 }
 0x24f   : > { %1577 = vrot.lane.b32.xlu1 %v4697_v0, %s3605_s10 }
 0x250   : > { %v2282_v35 = vpop.permute.xlu0 %2281 }
 0x251   : > { %v2284_v59 = vpop.permute.xlu1 %2283  ;;  %2323 = vst.msk [vmem:[#allocation3 + $0x30] sm:$0xff] %vm1303_vm6, %v2282_v35 }
 0x252   : > { %2324 = vst.msk [vmem:[#allocation3 + $0x38] sm:$0xff] %vm1303_vm6, %v2284_v59  ;;  %2577 = vrot.lane.b32.xlu0 %v4965_v20, %s3605_s10 }
 0x253   : > { %2579 = vrot.lane.b32.xlu1 %v4963_v23, %s3605_s10 }
 0x254   : > { %v1374_v39 = vpop.permute.xlu0 %1373 }
 0x255   : > { %v1376_v0 = vpop.permute.xlu1 %1375  ;;  %1412 = vst.msk [vmem:[#allocation3 + $0x50] sm:$0xff] %vm1401_vm7, %v1374_v39 }
 0x256   : > { %1413 = vst.msk [vmem:[#allocation3 + $0x58] sm:$0xff] %vm1401_vm7, %v1376_v0  ;;  %1909 = vrot.lane.b32.xlu0 %v4851_v53, %s3597_s7 }
 0x257   : > { %1911 = vrot.lane.b32.xlu1 %v4847_v8, %s3597_s7 }
 0x258   : > { %v2378_v27 = vpop.permute.xlu0 %2377 }
 0x259   : > { %v2380_v3 = vpop.permute.xlu1 %2379  ;;  %2419 = vst.msk [vmem:[#allocation3 + $0x30] sm:$0xff] %vm1401_vm7, %v2378_v27 }
 0x25a   : > { %2420 = vst.msk [vmem:[#allocation3 + $0x38] sm:$0xff] %vm1401_vm7, %v2380_v3  ;;  %2005 = vrot.lane.b32.xlu0 %v4871_v45, %s3598_s8 }
 0x25b   : > { %2007 = vrot.lane.b32.xlu1 %v4869_v2, %s3598_s8 }
 0x25c   : > { %v1471_v33 = vpop.permute.xlu0 %1470 }
 0x25d   : > { %v1473_v55 = vpop.permute.xlu1 %1472  ;;  %1509 = vst.msk [vmem:[#allocation3 + $0x50] sm:$0xff] %vm1498_vm8, %v1471_v33 }
 0x25e   : > { %1510 = vst.msk [vmem:[#allocation3 + $0x58] sm:$0xff] %vm1498_vm8, %v1473_v55  ;;  %2101 = vrot.lane.b32.xlu0 %v4923_v38, %s3599_s28 }
 0x25f   : > { %2103 = vrot.lane.b32.xlu1 %v4921_v11, %s3599_s28 }
 0x260   : > { %v2474_v12 = vpop.permute.xlu0 %2473 }
 0x261   : > { %v2476_v15 = vpop.permute.xlu1 %2475  ;;  %2515 = vst.msk [vmem:[#allocation3 + $0x30] sm:$0xff] %vm1498_vm8, %v2474_v12 }
 0x262   : > { %2516 = vst.msk [vmem:[#allocation3 + $0x38] sm:$0xff] %vm1498_vm8, %v2476_v15  ;;  %2197 = vrot.lane.b32.xlu0 %v4948_v46, %s3600_s24 }
 0x263   : > { %2199 = vrot.lane.b32.xlu1 %v4944_v40, %s3600_s24 }
 0x264   : > { %v1568_v8 = vpop.permute.xlu0 %1567 }
 0x265   : > { %v1570_v7 = vpop.permute.xlu1 %1569  ;;  %1606 = vst.msk [vmem:[#allocation3 + $0x50] sm:$0xff] %vm1595_vm9, %v1568_v8 }
 0x266   : > { %1607 = vst.msk [vmem:[#allocation3 + $0x58] sm:$0xff] %vm1595_vm9, %v1570_v7  ;;  %2293 = vrot.lane.b32.xlu0 %v4965_v20, %s3601_s29 }
 0x267   : > { %2295 = vrot.lane.b32.xlu1 %v4963_v23, %s3601_s29 }
 0x268   : > { %v2570_v28 = vpop.permute.xlu0 %2569 }
 0x269   : > { %v2572_v53 = vpop.permute.xlu1 %2571  ;;  %2611 = vst.msk [vmem:[#allocation3 + $0x30] sm:$0xff] %vm1595_vm9, %v2570_v28 }
 0x26a   : > { %2612 = vst.msk [vmem:[#allocation3 + $0x38] sm:$0xff] %vm1595_vm9, %v2572_v53  ;;  %2389 = vrot.lane.b32.xlu0 %v2345_v22, %s3602_s18 }
 0x26b   : > { %2391 = vrot.lane.b32.xlu1 %v2346_v47, %s3602_s18 }
 0x26c   : > { %v1902_v2 = vpop.permute.xlu0 %1901  ;;  %v1623_v37 = vld [vmem:[#allocation3 + $0x50] sm:$0xff] }
 0x26d   : > { %v1904_v24 = vpop.permute.xlu1 %1903  ;;  %v1624_v29 = vld [vmem:[#allocation3 + $0x58] sm:$0xff]  ;;  %1941 = vst.msk [vmem:[#allocation3 + $0x40] sm:$0xff] %vm914_vm2, %v1902_v2 }
 0x26e   : > { %1942 = vst.msk [vmem:[#allocation3 + $0x48] sm:$0xff] %vm914_vm2, %v1904_v24  ;;  %v3198_v45 = vpack.c.bf16 %v1624_v29, %v1623_v37  ;;  %2485 = vrot.lane.b32.xlu0 %v2441_v10, %s3603_s30 }
 0x26f   : > { %1848 = vst.msk [vmem:[#allocation3 + $0x58] sm:$0xff] %vm762_vm0, %v4739_v16  ;;  %2487 = vrot.lane.b32.xlu1 %v2442_v56, %s3603_s30  ;;  %1847 = vst.msk [vmem:[#allocation3 + $0x50] sm:$0xff] %vm762_vm0, %v4741_v44 }
 0x270   : > { %3200 = vmatpush3.bf16.xpose.msk.msra.mxu0 %vm4596_vm11, %v3198_v45  ;;  %v1998_v16 = vpop.permute.xlu0 %1997  ;;  %v2628_v43 = vld [vmem:[#allocation3 + $0x30] sm:$0xff] }
 0x271   : > { %v2000_v31 = vpop.permute.xlu1 %1999  ;;  %v2629_v26 = vld [vmem:[#allocation3 + $0x38] sm:$0xff]  ;;  %3201 = vmatprep.subr.bf16.mxu0 %v3604_v34  ;;  %2037 = vst.msk [vmem:[#allocation3 + $0x40] sm:$0xff] %vm1011_vm3, %v1998_v16 }
 0x272   : > { %2038 = vst.msk [vmem:[#allocation3 + $0x48] sm:$0xff] %vm1011_vm3, %v2000_v31  ;;  %v3222_v44 = vpack.c.bf16 %v2629_v26, %v2628_v43  ;;  %2581 = vrot.lane.b32.xlu0 %v2537_v6, %s3605_s10 }
 0x273   : > { %2583 = vrot.lane.b32.xlu1 %v2538_v30, %s3605_s10 }
 0x274   : > { %3224 = vmatpush3.bf16.xpose.msk.msra.mxu1 %vm4596_vm11, %v3222_v44  ;;  %v2094_v50 = vpop.permute.xlu0 %2093 }
 0x275   : > { %v2096_v52 = vpop.permute.xlu1 %2095  ;;  %3225 = vmatprep.subr.bf16.mxu1 %v3604_v34  ;;  %2133 = vst.msk [vmem:[#allocation3 + $0x40] sm:$0xff] %vm1109_vm4, %v2094_v50 }
 0x276   : > { %2134 = vst.msk [vmem:[#allocation3 + $0x48] sm:$0xff] %vm1109_vm4, %v2096_v52  ;;  %1913 = vrot.lane.b32.xlu0 %v4948_v46, %s3597_s7  ;;  %v3607_v46 = vmov 0.0  }
 0x277   : > { %1915 = vrot.lane.b32.xlu1 %v4944_v40, %s3597_s7  ;;  %v2539_v40 = vld [vmem:[#allocation2 + $0xda] sm:$0xff]  ;;  %3139 = vmatprep.mubr.msk.f32.mxu0 %vm3606_vm12, %v3607_v46  ;;  %s2995_s7 = sshll.u32 %s3942_s6, 4 }
 0x278   : > { %v2190_v32 = vpop.permute.xlu0 %2189  ;;  %3174 = vmatprep.mubr.msk.f32.mxu1 %vm3606_vm12, %v3607_v46  ;;  %s722_s11 = scalar_lea.vmem [#allocation7], %s2995_s7 }
 0x279   : > { %v2192_v42 = vpop.permute.xlu1 %2191  ;;  %2229 = vst.msk [vmem:[#allocation3 + $0x40] sm:$0xff] %vm1206_vm5, %v2190_v32  ;;  %s2783_s12 = sshll.u32 %s722_s11, 4  ;;  %s5157_s12 = int_to_ptr.vmem [resolvable:$true] %s2783_s12 }
 0x27a   : > { %2230 = vst.msk [vmem:[#allocation3 + $0x48] sm:$0xff] %vm1206_vm5, %v2192_v42  ;;  %2009 = vrot.lane.b32.xlu0 %v4965_v20, %s3598_s8  ;;  %v3608_v20 = vmov 0  }
 0x27b   : > { %2011 = vrot.lane.b32.xlu1 %v4963_v23, %s3598_s8  ;;  %3418 = vset.pattern.permute.xlu0 %v3608_v20 }
 0x27c   : > { %v2286_v58 = vpop.permute.xlu0 %2285  ;;  %3419 = vset.pattern.permute.xlu1 %v3608_v20 }
 0x27d   : > { %v2288_v13 = vpop.permute.xlu1 %2287  ;;  %2325 = vst.msk [vmem:[#allocation3 + $0x40] sm:$0xff] %vm1303_vm6, %v2286_v58 }
 0x27e   : > { %2326 = vst.msk [vmem:[#allocation3 + $0x48] sm:$0xff] %vm1303_vm6, %v2288_v13  ;;  %2105 = vrot.lane.b32.xlu0 %v2345_v22, %s3599_s28 }
 0x27f   : > { %2107 = vrot.lane.b32.xlu1 %v2346_v47, %s3599_s28 }
 0x280   : > { %v1378_v48 = vpop.permute.xlu0 %1377 }
 0x281   : > { %v1380_v5 = vpop.permute.xlu1 %1379  ;;  %1414 = vst.msk [vmem:[#allocation3 + $0x60] sm:$0xff] %vm1401_vm7, %v1378_v48 }
 0x282   : > { %1415 = vst.msk [vmem:[#allocation3 + $0x68] sm:$0xff] %vm1401_vm7, %v1380_v5  ;;  %2201 = vrot.lane.b32.xlu0 %v2441_v10, %s3600_s24 }
 0x283   : > { %2203 = vrot.lane.b32.xlu1 %v2442_v56, %s3600_s24 }
 0x284   : > { %v2382_v54 = vpop.permute.xlu0 %2381 }
 0x285   : > { %v2384_v49 = vpop.permute.xlu1 %2383  ;;  %2421 = vst.msk [vmem:[#allocation3 + $0x40] sm:$0xff] %vm1401_vm7, %v2382_v54 }
 0x286   : > { %2422 = vst.msk [vmem:[#allocation3 + $0x48] sm:$0xff] %vm1401_vm7, %v2384_v49  ;;  %2297 = vrot.lane.b32.xlu0 %v2537_v6, %s3601_s29 }
 0x287   : > { %2299 = vrot.lane.b32.xlu1 %v2538_v30, %s3601_s29  ;;  %s5162_s29 = scalar_lea.hbm %s5229_s5, %s3062_s21 }
 0x288   : > { %v1475_v21 = vpop.permute.xlu0 %1474 }
 0x289   : > { %v1477_v19 = vpop.permute.xlu1 %1476  ;;  %1511 = vst.msk [vmem:[#allocation3 + $0x60] sm:$0xff] %vm1498_vm8, %v1475_v21 }
 0x28a   : > { %1512 = vst.msk [vmem:[#allocation3 + $0x68] sm:$0xff] %vm1498_vm8, %v1477_v19  ;;  %2393 = vrot.lane.b32.xlu0 %v2347_v14, %s3602_s18 }
 0x28b   : > { %2395 = vrot.lane.b32.xlu1 %v2348_v51, %s3602_s18  ;;  %s2768_s18 = scalar_lea.sflag [#allocation8], %s3942_s6 }
 0x28c   : > { %v2478_v4 = vpop.permute.xlu0 %2477 }
 0x28d   : > { %v2480_v62 = vpop.permute.xlu1 %2479  ;;  %2517 = vst.msk [vmem:[#allocation3 + $0x40] sm:$0xff] %vm1498_vm8, %v2478_v4 }
 0x28e   : > { %2518 = vst.msk [vmem:[#allocation3 + $0x48] sm:$0xff] %vm1498_vm8, %v2480_v62  ;;  %2489 = vrot.lane.b32.xlu0 %v2443_v57, %s3603_s30 }
 0x28f   : > { %2491 = vrot.lane.b32.xlu1 %v2444_v41, %s3603_s30  ;;  %s3420_s30 = scalar_lea.vmem %s5157_s12, 256 }
 0x290   : > { %v1572_v17 = vpop.permute.xlu0 %1571  ;;  %p3421_p13 = scmp.ne.s32.totalorder %s5157_s12, %s3420_s30 }
 0x291   : > { %v1574_v18 = vpop.permute.xlu1 %1573  ;;  %1608 = vst.msk [vmem:[#allocation3 + $0x60] sm:$0xff] %vm1595_vm9, %v1572_v17 }
 0x292   : > { %1609 = vst.msk [vmem:[#allocation3 + $0x68] sm:$0xff] %vm1595_vm9, %v1574_v18  ;;  %2585 = vrot.lane.b32.xlu0 %v2539_v40, %s3605_s10  ;;  %p3422_p0 = pnand %p3421_p13, %p3744_p12 }
 0x293   : > { %2587 = vrot.lane.b32.xlu1 %v2540_v25, %s3605_s10  ;;  %s3424_s10 = sshll.u32 %s3609_s25, 4  ;;  %s3425_s10 = int_to_ptr.vmem [resolvable:$false] %s3424_s10 }
 0x294   : > { %v2574_v60 = vpop.permute.xlu0 %2573  ;;  %p3423_p1 = pneg %p3422_p0  ;;  %s3426_s13 = scalar_lea.vmem %s3425_s10, 512 }
 0x295   : > { %v2576_v61 = vpop.permute.xlu1 %2575  ;;  %2613 = vst.msk [vmem:[#allocation3 + $0x40] sm:$0xff] %vm1595_vm9, %v2574_v60  ;;  %p3427_p2 = scmp.lt.s32.totalorder %s5157_s12, %s3425_s10  ;;  %p3428_p3 = scmp.lt.s32.totalorder %s3426_s13, %s3420_s30 }
 0x296   : > { %2614 = vst.msk [vmem:[#allocation3 + $0x48] sm:$0xff] %vm1595_vm9, %v2576_v61  ;;  %1632 = vperm.xlu0 %3418, %v2638_v63  }
 0x297   : > { %2641 = vperm.xlu1 %3419, %v2638_v63   ;;  %p3429_p6 = por %p3428_p3, %p3427_p2 }
 0x298   : > { %v1906_v35 = vpop.permute.xlu0 %1905  ;;  %v1625_v0 = vld [vmem:[#allocation3 + $0x60] sm:$0xff] }
 0x299   : > { %v1908_v23 = vpop.permute.xlu1 %1907  ;;  %v1626_v59 = vld [vmem:[#allocation3 + $0x68] sm:$0xff]  ;;  %1943 = vst.msk [vmem:[#allocation3 + $0x50] sm:$0xff] %vm914_vm2, %v1906_v35  ;;  %p3430_p8 = pnand %p3429_p6, %p3423_p1 }
 0x29a   : > { %1944 = vst.msk [vmem:[#allocation3 + $0x58] sm:$0xff] %vm914_vm2, %v1908_v23  ;;  %v3202_v39 = vpack.c.bf16 %v1626_v59, %v1625_v0 }
 0x29b   : > { %1850 = vst.msk [vmem:[#allocation3 + $0x68] sm:$0xff] %vm762_vm0, %v4827_v1  ;;  %1849 = vst.msk [vmem:[#allocation3 + $0x60] sm:$0xff] %vm762_vm0, %v4829_v9 }
 0x29c   : > { %3204 = vmatpush3.bf16.xpose.msk.msra.mxu0 %vm4596_vm11, %v3202_v39  ;;  %v2002_v55 = vpop.permute.xlu0 %2001  ;;  %v2630_v33 = vld [vmem:[#allocation3 + $0x40] sm:$0xff] }
 0x29d   : > { %v2004_v3 = vpop.permute.xlu1 %2003  ;;  %v2631_v27 = vld [vmem:[#allocation3 + $0x48] sm:$0xff]  ;;  %3205 = vmatprep.subr.bf16.mxu0 %v3604_v34  ;;  %2039 = vst.msk [vmem:[#allocation3 + $0x50] sm:$0xff] %vm1011_vm3, %v2002_v55 }
 0x29e   : > { %2040 = vst.msk [vmem:[#allocation3 + $0x58] sm:$0xff] %vm1011_vm3, %v2004_v3  ;;  %v3226_v1 = vpack.c.bf16 %v2631_v27, %v2630_v33 }
 0x2a0   : > { %3228 = vmatpush3.bf16.xpose.msk.msra.mxu1 %vm4596_vm11, %v3226_v1  ;;  %v2098_v9 = vpop.permute.xlu0 %2097 }
 0x2a1   : > { %v2100_v15 = vpop.permute.xlu1 %2099  ;;  %3229 = vmatprep.subr.bf16.mxu1 %v3604_v34  ;;  %2135 = vst.msk [vmem:[#allocation3 + $0x50] sm:$0xff] %vm1109_vm4, %v2098_v9 }
 0x2a2   : > { %2136 = vst.msk [vmem:[#allocation3 + $0x58] sm:$0xff] %vm1109_vm4, %v2100_v15 }
 0x2a4   : > { %v2194_v7 = vpop.permute.xlu0 %2193 }
 0x2a5   : > { %v2196_v12 = vpop.permute.xlu1 %2195  ;;  %2231 = vst.msk [vmem:[#allocation3 + $0x50] sm:$0xff] %vm1206_vm5, %v2194_v7 }
 0x2a6   : > { %2232 = vst.msk [vmem:[#allocation3 + $0x58] sm:$0xff] %vm1206_vm5, %v2196_v12 }
 0x2a8   : > { %v1284_v47 = vpop.permute.xlu0 %1283 }
 0x2a9   : > { %v1286_v8 = vpop.permute.xlu1 %1285  ;;  %1318 = vst.msk [vmem:[#allocation3 + $0x70] sm:$0xff] %vm1303_vm6, %v1284_v47 }
 0x2aa   : > { %1319 = vst.msk [vmem:[#allocation3 + $0x78] sm:$0xff] %vm1303_vm6, %v1286_v8 }
 0x2ac   : > { %v2290_v22 = vpop.permute.xlu0 %2289 }
 0x2ad   : > { %v2292_v53 = vpop.permute.xlu1 %2291  ;;  %2327 = vst.msk [vmem:[#allocation3 + $0x50] sm:$0xff] %vm1303_vm6, %v2290_v22 }
 0x2ae   : > { %2328 = vst.msk [vmem:[#allocation3 + $0x58] sm:$0xff] %vm1303_vm6, %v2292_v53 }
 0x2b0   : > { %v1382_v56 = vpop.permute.xlu0 %1381 }
 0x2b1   : > { %v1384_v28 = vpop.permute.xlu1 %1383  ;;  %1416 = vst.msk [vmem:[#allocation3 + $0x70] sm:$0xff] %vm1401_vm7, %v1382_v56 }
 0x2b2   : > { %1417 = vst.msk [vmem:[#allocation3 + $0x78] sm:$0xff] %vm1401_vm7, %v1384_v28 }
 0x2b4   : > { %v2386_v10 = vpop.permute.xlu0 %2385 }
 0x2b5   : > { %v2388_v24 = vpop.permute.xlu1 %2387  ;;  %2423 = vst.msk [vmem:[#allocation3 + $0x50] sm:$0xff] %vm1401_vm7, %v2386_v10 }
 0x2b6   : > { %2424 = vst.msk [vmem:[#allocation3 + $0x58] sm:$0xff] %vm1401_vm7, %v2388_v24 }
 0x2b8   : > { %v1479_v2 = vpop.permute.xlu0 %1478 }
 0x2b9   : > { %v1481_v29 = vpop.permute.xlu1 %1480  ;;  %1513 = vst.msk [vmem:[#allocation3 + $0x70] sm:$0xff] %vm1498_vm8, %v1479_v2 }
 0x2ba   : > { %1514 = vst.msk [vmem:[#allocation3 + $0x78] sm:$0xff] %vm1498_vm8, %v1481_v29 }
 0x2bc   : > { %v2482_v45 = vpop.permute.xlu0 %2481 }
 0x2bd   : > { %v2484_v37 = vpop.permute.xlu1 %2483  ;;  %2519 = vst.msk [vmem:[#allocation3 + $0x50] sm:$0xff] %vm1498_vm8, %v2482_v45 }
 0x2be   : > { %2520 = vst.msk [vmem:[#allocation3 + $0x58] sm:$0xff] %vm1498_vm8, %v2484_v37 }
 0x2c0   : > { %v1576_v31 = vpop.permute.xlu0 %1575 }
 0x2c1   : > { %v1578_v30 = vpop.permute.xlu1 %1577  ;;  %1610 = vst.msk [vmem:[#allocation3 + $0x70] sm:$0xff] %vm1595_vm9, %v1576_v31 }
 0x2c2   : > { %1611 = vst.msk [vmem:[#allocation3 + $0x78] sm:$0xff] %vm1595_vm9, %v1578_v30 }
 0x2c4   : > { %v2578_v26 = vpop.permute.xlu0 %2577 }
 0x2c5   : > { %v2580_v6 = vpop.permute.xlu1 %2579  ;;  %2615 = vst.msk [vmem:[#allocation3 + $0x50] sm:$0xff] %vm1595_vm9, %v2578_v26 }
 0x2c6   : > { %2616 = vst.msk [vmem:[#allocation3 + $0x58] sm:$0xff] %vm1595_vm9, %v2580_v6 }
 0x2c8   : > { %v1910_v44 = vpop.permute.xlu0 %1909  ;;  %v1627_v52 = vld [vmem:[#allocation3 + $0x70] sm:$0xff] }
 0x2c9   : > { %v1912_v16 = vpop.permute.xlu1 %1911  ;;  %v1628_v43 = vld [vmem:[#allocation3 + $0x78] sm:$0xff]  ;;  %1945 = vst.msk [vmem:[#allocation3 + $0x60] sm:$0xff] %vm914_vm2, %v1910_v44 }
 0x2ca   : > { %1946 = vst.msk [vmem:[#allocation3 + $0x68] sm:$0xff] %vm914_vm2, %v1912_v16  ;;  %v3206_v50 = vpack.c.bf16 %v1628_v43, %v1627_v52 }
 0x2cb   : > { %1852 = vst.msk [vmem:[#allocation3 + $0x78] sm:$0xff] %vm762_vm0, %v4921_v11  ;;  %1851 = vst.msk [vmem:[#allocation3 + $0x70] sm:$0xff] %vm762_vm0, %v4923_v38  ;;  %v5115_v38 = vld [vmem:[%s5227_s3] sm:$0xff] }
 0x2cc   : > { %3208 = vmatpush3.bf16.xpose.msk.msra.mxu0 %vm4596_vm11, %v3206_v50  ;;  %v2006_v13 = vpop.permute.xlu0 %2005  ;;  %v2632_v58 = vld [vmem:[#allocation3 + $0x50] sm:$0xff] }
 0x2cd   : > { %v2008_v42 = vpop.permute.xlu1 %2007  ;;  %v2633_v32 = vld [vmem:[#allocation3 + $0x58] sm:$0xff]  ;;  %2041 = vst.msk [vmem:[#allocation3 + $0x60] sm:$0xff] %vm1011_vm3, %v2006_v13 }
 0x2ce   : > { %2042 = vst.msk [vmem:[#allocation3 + $0x68] sm:$0xff] %vm1011_vm3, %v2008_v42  ;;  %v3230_v5 = vpack.c.bf16 %v2633_v32, %v2632_v58 }
 0x2d0   : > { %3232 = vmatpush3.bf16.xpose.msk.msra.mxu1 %vm4596_vm11, %v3230_v5  ;;  %v2102_v48 = vpop.permute.xlu0 %2101 }
 0x2d1   : > { %v2104_v11 = vpop.permute.xlu1 %2103  ;;  %3233 = vmatprep.subr.bf16.mxu1 %v3604_v34  ;;  %2137 = vst.msk [vmem:[#allocation3 + $0x60] sm:$0xff] %vm1109_vm4, %v2102_v48 }
 0x2d2   : > { %2138 = vst.msk [vmem:[#allocation3 + $0x68] sm:$0xff] %vm1109_vm4, %v2104_v11 }
 0x2d3   : > { %3140 = vmatmul.mubr.msk.f32.vlgmr.msra.gmra.mrb[0].mxu0 %vm1635_vm10, %v5115_v38 }
 0x2d4   : > { %v2198_v54 = vpop.permute.xlu0 %2197 }
 0x2d5   : > { %v2200_v49 = vpop.permute.xlu1 %2199  ;;  %2233 = vst.msk [vmem:[#allocation3 + $0x60] sm:$0xff] %vm1206_vm5, %v2198_v54 }
 0x2d6   : > { %2234 = vst.msk [vmem:[#allocation3 + $0x68] sm:$0xff] %vm1206_vm5, %v2200_v49 }
 0x2d8   : > { %v2294_v19 = vpop.permute.xlu0 %2293 }
 0x2d9   : > { %v2296_v51 = vpop.permute.xlu1 %2295  ;;  %2329 = vst.msk [vmem:[#allocation3 + $0x60] sm:$0xff] %vm1303_vm6, %v2294_v19 }
 0x2da   : > { %2330 = vst.msk [vmem:[#allocation3 + $0x68] sm:$0xff] %vm1303_vm6, %v2296_v51 }
 0x2dc   : > { %v2390_v21 = vpop.permute.xlu0 %2389 }
 0x2dd   : > { %v2392_v14 = vpop.permute.xlu1 %2391  ;;  %2425 = vst.msk [vmem:[#allocation3 + $0x60] sm:$0xff] %vm1401_vm7, %v2390_v21 }
 0x2de   : > { %2426 = vst.msk [vmem:[#allocation3 + $0x68] sm:$0xff] %vm1401_vm7, %v2392_v14 }
 0x2e0   : > { %v2486_v62 = vpop.permute.xlu0 %2485 }
 0x2e1   : > { %v2488_v41 = vpop.permute.xlu1 %2487  ;;  %2521 = vst.msk [vmem:[#allocation3 + $0x60] sm:$0xff] %vm1498_vm8, %v2486_v62 }
 0x2e2   : > { %2522 = vst.msk [vmem:[#allocation3 + $0x68] sm:$0xff] %vm1498_vm8, %v2488_v41 }
 0x2e4   : > { %v2582_v4 = vpop.permute.xlu0 %2581 }
 0x2e5   : > { %v2584_v57 = vpop.permute.xlu1 %2583  ;;  %2617 = vst.msk [vmem:[#allocation3 + $0x60] sm:$0xff] %vm1595_vm9, %v2582_v4 }
 0x2e6   : > { %2618 = vst.msk [vmem:[#allocation3 + $0x68] sm:$0xff] %vm1595_vm9, %v2584_v57 }
 0x2e8   : > { %v1914_v18 = vpop.permute.xlu0 %1913 }
 0x2e9   : > { %v1916_v25 = vpop.permute.xlu1 %1915  ;;  %1947 = vst.msk [vmem:[#allocation3 + $0x70] sm:$0xff] %vm914_vm2, %v1914_v18 }
 0x2ea   : > { %1948 = vst.msk [vmem:[#allocation3 + $0x78] sm:$0xff] %vm914_vm2, %v1916_v25 }
 0x2ec   : > { %v2010_v46 = vpop.permute.xlu0 %2009  ;;  %v2634_v61 = vld [vmem:[#allocation3 + $0x60] sm:$0xff] }
 0x2ed   : > { %v2012_v40 = vpop.permute.xlu1 %2011  ;;  %v2635_v17 = vld [vmem:[#allocation3 + $0x68] sm:$0xff]  ;;  %2043 = vst.msk [vmem:[#allocation3 + $0x70] sm:$0xff] %vm1011_vm3, %v2010_v46 }
 0x2ee   : > { %2044 = vst.msk [vmem:[#allocation3 + $0x78] sm:$0xff] %vm1011_vm3, %v2012_v40  ;;  %v3234_v60 = vpack.c.bf16 %v2635_v17, %v2634_v61 }
 0x2f0   : > { %3236 = vmatpush3.bf16.xpose.msk.msra.mxu1 %vm4596_vm11, %v3234_v60  ;;  %v2106_v23 = vpop.permute.xlu0 %2105 }
 0x2f1   : > { %v2108_v63 = vpop.permute.xlu1 %2107  ;;  %3237 = vmatprep.subr.bf16.mxu1 %v3604_v34  ;;  %2139 = vst.msk [vmem:[#allocation3 + $0x70] sm:$0xff] %vm1109_vm4, %v2106_v23 }
 0x2f2   : > { %2140 = vst.msk [vmem:[#allocation3 + $0x78] sm:$0xff] %vm1109_vm4, %v2108_v63 }
 0x2f4   : > { %v2202_v20 = vpop.permute.xlu0 %2201 }
 0x2f5   : > { %v2204_v59 = vpop.permute.xlu1 %2203  ;;  %2235 = vst.msk [vmem:[#allocation3 + $0x70] sm:$0xff] %vm1206_vm5, %v2202_v20 }
 0x2f6   : > { %2236 = vst.msk [vmem:[#allocation3 + $0x78] sm:$0xff] %vm1206_vm5, %v2204_v59 }
 0x2f8   : > { %v2298_v0 = vpop.permute.xlu0 %2297 }
 0x2f9   : > { %v2300_v35 = vpop.permute.xlu1 %2299  ;;  %2331 = vst.msk [vmem:[#allocation3 + $0x70] sm:$0xff] %vm1303_vm6, %v2298_v0 }
 0x2fa   : > { %2332 = vst.msk [vmem:[#allocation3 + $0x78] sm:$0xff] %vm1303_vm6, %v2300_v35 }
 0x2fc   : > { %v2394_v3 = vpop.permute.xlu0 %2393 }
 0x2fd   : > { %v2396_v39 = vpop.permute.xlu1 %2395  ;;  %2427 = vst.msk [vmem:[#allocation3 + $0x70] sm:$0xff] %vm1401_vm7, %v2394_v3 }
 0x2fe   : > { %2428 = vst.msk [vmem:[#allocation3 + $0x78] sm:$0xff] %vm1401_vm7, %v2396_v39 }
 0x300   : > { %v2490_v27 = vpop.permute.xlu0 %2489 }
 0x301   : > { %v2492_v34 = vpop.permute.xlu1 %2491  ;;  %2523 = vst.msk [vmem:[#allocation3 + $0x70] sm:$0xff] %vm1498_vm8, %v2490_v27 }
 0x302   : > { %2524 = vst.msk [vmem:[#allocation3 + $0x78] sm:$0xff] %vm1498_vm8, %v2492_v34 }
 0x304   : > { %v2586_v33 = vpop.permute.xlu0 %2585 }
 0x305   : > { %v2588_v55 = vpop.permute.xlu1 %2587  ;;  %2619 = vst.msk [vmem:[#allocation3 + $0x70] sm:$0xff] %vm1595_vm9, %v2586_v33 }
 0x306   : > { %2620 = vst.msk [vmem:[#allocation3 + $0x78] sm:$0xff] %vm1595_vm9, %v2588_v55 }
 0x30c   : > { %v2636_v15 = vld [vmem:[#allocation3 + $0x70] sm:$0xff] }
 0x30d   : > { %v2637_v1 = vld [vmem:[#allocation3 + $0x78] sm:$0xff] }
 0x30e   : > { %v3238_v9 = vpack.c.bf16 %v2637_v1, %v2636_v15 }
 0x310   : > { %3240 = vmatpush3.bf16.xpose.msk.msra.mxu1 %vm4596_vm11, %v3238_v9 }
 0x315   : > { %v1633_v12 = vpop.permute.xlu0 %1632 }
 0x316   : > { %v2642_v53 = vpop.permute.xlu1 %2641 }
 0x317   : > { %3175 = vmatmul.mubr.msk.f32.vlgmr.msra.gmra.mrb[0].mxu1 %vm1635_vm10, %v5115_v38 }
 0x3a6   : > { %v1753_v7 = vpop.f32.mrb[0].mxu0 }
 0x3a7   : > { %v1754_v8 = vadd.f32 %v1753_v7, %v1633_v12  ;;  %v3141_v47 = vpop.f32.mrb[1].mxu0 }
 0x3a9   : > { %1757 = vst [vmem:[%s722_s11] sm:$0xff] %v1754_v8 }
 0x3ea   : > { %v2761_v36 = vpop.f32.mrb[0].mxu1 }
 0x3eb   : > { %v2762_v22 = vadd.f32 %v2761_v36, %v2642_v53  ;;  %v3176_v28 = vpop.f32.mrb[1].mxu1 }
 0x3ed   : > { %3060 = vst [vmem:[%s722_s11 + $0x8] sm:$0xff] %v2762_v22 }
 0x3ee   : > { %3433 = shalt.err (!%p3430_p8)
}
 0x3ef   : > { %s3434_s16 = scalar_lea.hbm %s5162_s29, 256  ;;  %s3438_s17 = scalar_lea.hbm %s5229_s5, 512 }
 0x3f0   : > { %p3435_p9 = scmp.ne.s32.totalorder %s5162_s29, %s3434_s16  ;;  %p3439_p11 = scmp.lt.u32.totalorder %s5162_s29, %s5229_s5 }
 0x3f1   : > { %p3440_p13 = scmp.lt.u32.totalorder %s3438_s17, %s3434_s16  ;;  %p3442_p1 = scmp.lt.u32.totalorder %s3434_s16, %s5162_s29 }
 0x3f2   : > { %p3436_p7 = pnand %p3435_p9, %p3744_p12 }
 0x3f3   : > { %p3441_p0 = por %p3440_p13, %p3439_p11 }
 0x3f4   : > { %p3437_p10 = pneg %p3436_p7 }
 0x3f5   : > { %p3443_p2 = por %p3442_p1, %p3441_p0 }
 0x3f7   : > { %p3444_p3 = pnand %p3443_p2, %p3437_p10 }
 0x3f9   : > { %3447 = shalt.err (!%p3444_p3)
}
 0x3fa   : > { %s3610_s7 = smov 128   ;;  %s3611_s11 = smov 256  }
 0x3fb   : > { %3248 = dma.vmem_to_hbm [thread:$0]  (%p3744_p12), %s5157_s12, 256, %s5162_s29, %s2768_s18, %s3610_s7, %s3611_s11, %s3598_s8  }
 0x3fc PF: > { %s5256_s21 = sld [smem:[#allocation10_spill]]  ;;  %p3251_p6 = pnand %p2964_p5, %p3752_p4 }
 0x402   : > { %s2798_s24 = sand.u32 1, %s5256_s21  }
 0x403   : > { %s2799_s30 = scalar_lea.sflag [#allocation8], %s2798_s24 }
 0x404   : > { %3521 = dma.done.wait (!%p3251_p6), %s2799_s30, 256  }
 0x405   : > { %3523 = vsyncadd (!%p3251_p6), %s2799_s30, 4294967040  ;;  %s18_s27 = sadd.s32 1, %s3562_s27   ;;  %s5258_s9 = sld [smem:[#allocation15_spill]] }
 0x406   : > { %p15_p8 = scmp.ge.s32.totalorder %s18_s27, 4   ;;  %s5259_s6 = sld [smem:[#allocation14_spill]] }
 0x407   : > { %s5260_s8 = sld [smem:[#allocation11_spill]]  ;;  %s5261_s24 = sld [smem:[#allocation13_spill]] }
 0x408   : > { %s5262_s12 = sld [smem:[#allocation12_spill]]  ;;  %s5263_s18 = smov %s3546_s23 }
 0x409   : > { %s5264_s19 = smov %s3534_s20  ;;  %s5266_s21 = smov %s3542_s22 }
 0x40a   : > { %s5269_s25 = smov %s3558_s26  ;;  %17 = sbr.rel (!%p15_p8) target bundleno = 8 (0x8), region = 262 }
 0x40b   : > { %s5265_s20 = smov %s5258_s9 }
 0x40c   : > { %s5267_s22 = smov %s5259_s6 }
 0x40d   : > { %s5268_s23 = smov %s5260_s8 }
 0x40e   : > { %s5270_s26 = smov %s5262_s12 }
 0x411   :  { %2804 = vsyncpa [#allocation8], 1 }
 0x412   :  { %2806 = vsyncpa [#allocation8 + $0x1], 1 }

</bundles_post_ra>
